<compile_context>
chip_gen: v5e
topology: v5e:2x2
jax: 0.10.0
libtpu: 0.0.40
codegen_flags: <defaults>
</compile_context>

<pallas_src>
import functools

import jax
import jax.numpy as jnp
from jax import lax
from jax.experimental import pallas as pl
from jax.experimental.pallas import tpu as pltpu


def _cell_cls_kernel(x_ref, mask_ref, w1_ref, w23_ref, w4_ref, w5_ref,
                     b14_ref, b5_ref,
                     o_ref,
                     act_ref,
                     *, Wp, OFF, WIN, LBUF, F):
    """One batch element per grid step, channels-on-sublanes layout.

    x_ref   : (1, CinP, LBUF) f32   zero-haloed input, flattened (H+2)*(W+2) grid placed
                                    at lanes [OFF-(Wp+1), ...) so the window is 128-aligned
    mask_ref: (1, WIN)        f32   1.0 at interior pixels of the window, else 0.0
    w1_ref  : (9, F, CinP)    bf16  layer-1 3x3 taps [k, f_out, f_in], k = dy*3+dx
    w23_ref : (18, F, F)      bf16  layer-2/3 3x3 taps, rows l*9+k
    w4_ref  : (F, F)          bf16  1x1 conv [f_out, f_in]
    w5_ref  : (Kp, F)         bf16  output 1x1 conv (rows >= K are zero padding)
    b14_ref : (4, F, 1)       f32   biases of layers 1-4
    b5_ref  : (Kp, 1)         f32
    o_ref   : (1, Kp, WIN)    f32   lane-dense sigmoid outputs over the window
    act_ref : (F, LBUF)       bf16  scratch: current layer's padded activations
    """
    shifts = tuple((dy - 1) * Wp + (dx - 1) for dy in range(3) for dx in range(3))
    mask = mask_ref[...]                                       # (1, WIN) f32

    def leaky(v):                                              # LeakyReLU(0.1)
        return jnp.where(v > 0, v, 0.1 * v)

    # Zero only the lane strips outside the compute window, once; the window itself is
    # fully rewritten by every layer (halo columns inside it are re-zeroed by the mask).
    act_ref[:, :OFF] = jnp.zeros((F, OFF), jnp.bfloat16)
    if LBUF > OFF + WIN:
        act_ref[:, OFF + WIN:] = jnp.zeros((F, LBUF - OFF - WIN), jnp.bfloat16)

    def conv3x3(read_slice, w_tap, bias):
        acc = None
        for k, s in enumerate(shifts):
            part = jnp.dot(w_tap(k), read_slice(OFF + s),
                           preferred_element_type=jnp.float32)  # (F, WIN) f32
            acc = part if acc is None else acc + part
        # bias + LeakyReLU in f32, mask re-zeroes halo columns, single bf16 writeback
        act_ref[:, OFF:OFF + WIN] = (leaky(acc + bias) * mask).astype(jnp.bfloat16)

    # ---- layer 1: 3x3 conv straight off the Cin-channel input block ----
    xin = x_ref[0].astype(jnp.bfloat16)                        # (CinP, LBUF), one cast
    conv3x3(lambda lo: xin[:, lo:lo + WIN],
            lambda k: w1_ref[k],
            b14_ref[0])

    # ---- layers 2 & 3: 3x3 conv from the bf16 activation buffer ----
    for l in range(2):
        conv3x3(lambda lo: act_ref[:, lo:lo + WIN],
                lambda k, _l=l: w23_ref[_l * 9 + k],
                b14_ref[l + 1])

    h = act_ref[:, OFF:OFF + WIN]                              # (F, WIN) bf16, aligned

    # ---- 1x1 conv + LeakyReLU ----
    h4 = leaky(jnp.dot(w4_ref[...], h, preferred_element_type=jnp.float32)
               + b14_ref[3])

    # ---- output 1x1 conv + sigmoid, lane-dense (Kp, WIN) store ----
    logits = jnp.dot(w5_ref[...], h4.astype(jnp.bfloat16),
                     preferred_element_type=jnp.float32) + b5_ref[...]
    o_ref[0] = jax.nn.sigmoid(logits)


def cell_classification_pallas(x_nchw, params, feature_size):
    """PyTorch-equivalent forward. x_nchw: (N, Cin, H, W) f32 -> (N, K, H, W) f32."""
    w1, b1, w2, b2, w3, b3, w4, b4, w5, b5 = params
    N, Cin, H, W = x_nchw.shape
    F = feature_size
    K = w5.shape[-1]
    Kp = max(8, ((K + 7) // 8) * 8)          # tiny output-channel dim -> 8 sublanes
    CinP = max(8, ((Cin + 7) // 8) * 8)      # input channels -> 8 sublanes (NOT to F)

    rup = lambda v: ((v + 127) // 128) * 128
    Hp, Wp = H + 2, W + 2
    Lp = Hp * Wp                             # flattened padded grid
    halo = Wp + 1                            # grid-flat index of first interior pixel
    OFF = rup(halo)                          # 128-aligned window start lane
    FRONT = OFF - halo                       # front lane padding before the grid
    WIN = rup(Lp - 2 * halo)                 # lane-dense window width (multiple of 128)
    LBUF = rup(OFF + halo + WIN)             # buffer length; covers every tap shift

    # ---------- layout glue only (no compute hoisted) ----------
    x = x_nchw.astype(jnp.float32)
    if CinP > Cin:
        x = jnp.pad(x, ((0, 0), (0, CinP - Cin), (0, 0), (0, 0)))
    x = jnp.pad(x, ((0, 0), (0, 0), (1, 1), (1, 1))).reshape(N, CinP, Lp)
    x = jnp.pad(x, ((0, 0), (0, 0), (FRONT, LBUF - FRONT - Lp)))

    # interior-pixel mask over the compute window
    q = halo + jnp.arange(WIN)               # padded-grid flat index of each window lane
    hh, ww = q // Wp, q % Wp
    mask = ((q < Lp) & (hh >= 1) & (hh <= H) & (ww >= 1) & (ww <= W))
    mask = mask.astype(jnp.float32).reshape(1, WIN)

    # weights: [f_out, f_in] per tap, bf16 matmul operands, f32 biases
    wb = jnp.bfloat16
    w1t = jnp.transpose(jnp.pad(w1, ((0, 0), (0, CinP - Cin), (0, 0))),
                        (0, 2, 1)).astype(wb)                              # (9, F, CinP)
    w23t = jnp.concatenate([jnp.transpose(w2, (0, 2, 1)),
                            jnp.transpose(w3, (0, 2, 1))], axis=0).astype(wb)  # (18, F, F)
    w4t = w4.T.astype(wb)                                                  # (F, F)
    w5t = jnp.pad(w5.T, ((0, Kp - K), (0, 0))).astype(wb)                  # (Kp, F)
    b14 = jnp.transpose(jnp.stack([b1, b2, b3, b4], 0), (0, 2, 1))
    b14 = b14.astype(jnp.float32)                                          # (4, F, 1)
    b5t = jnp.pad(b5.T, ((0, Kp - K), (0, 0))).astype(jnp.float32)         # (Kp, 1)

    full = lambda shape: pl.BlockSpec(shape, lambda n, _s=shape: (0,) * len(_s))
    kernel = functools.partial(_cell_cls_kernel,
                               Wp=Wp, OFF=OFF, WIN=WIN, LBUF=LBUF, F=F)

    out_win = pl.pallas_call(
        kernel,
        out_shape=jax.ShapeDtypeStruct((N, Kp, WIN), jnp.float32),
        grid_spec=pltpu.PrefetchScalarGridSpec(
            num_scalar_prefetch=0,
            grid=(N,),
            in_specs=[
                pl.BlockSpec((1, CinP, LBUF), lambda n: (n, 0, 0)),
                full((1, WIN)),
                full((9, F, CinP)),
                full((18, F, F)),
                full((F, F)),
                full((Kp, F)),
                full((4, F, 1)),
                full((Kp, 1)),
            ],
            out_specs=pl.BlockSpec((1, Kp, WIN), lambda n: (n, 0, 0)),
            scratch_shapes=[pltpu.VMEM((F, LBUF), jnp.bfloat16)],
        ),
        compiler_params=pltpu.CompilerParams(
            dimension_semantics=("parallel",)),
    )(x, mask, w1t, w23t, w4t, w5t, b14, b5t)

    # ---------- glue back: window -> padded grid -> crop -> NCHW ----------
    tail = max(0, Lp - (halo + WIN))
    out = jnp.pad(out_win, ((0, 0), (0, 0), (halo, tail)))[:, :, :Lp]
    out = out.reshape(N, Kp, Hp, Wp)[:, :K, 1:H + 1, 1:W + 1]
    return out


def _reference(x_nchw, params, feature_size):
    """Plain-JAX reference with the same bf16-operand / f32-accumulate matmul precision."""
    w1, b1, w2, b2, w3, b3, w4, b4, w5, b5 = params
    N, Cin, H, W = x_nchw.shape
    F = feature_size
    x = jnp.transpose(x_nchw, (0, 2, 3, 1)).astype(jnp.float32)

    def conv(h, w_hwio, b, padding):
        y = lax.conv_general_dilated(
            h.astype(jnp.bfloat16), w_hwio.astype(jnp.bfloat16), (1, 1), padding,
            dimension_numbers=('NHWC', 'HWIO', 'NHWC'),
            preferred_element_type=jnp.float32)
        return y + b.reshape(1, 1, 1, -1).astype(jnp.float32)

    leaky = lambda v: jnp.where(v > 0, v, 0.1 * v)

    h = leaky(conv(x, w1.reshape(3, 3, Cin, F), b1, 'SAME'))
    h = leaky(conv(h, w2.reshape(3, 3, F, F), b2, 'SAME'))
    h = leaky(conv(h, w3.reshape(3, 3, F, F), b3, 'SAME'))
    h = leaky(conv(h, w4.reshape(1, 1, F, F), b4, 'VALID'))
    h = jax.nn.sigmoid(conv(h, w5.reshape(1, 1, F, -1), b5, 'VALID'))
    return jnp.transpose(h, (0, 3, 1, 2))


def init_params(key, num_features_in, feature_size, num_out):
    """Deterministic synthetic parameters (shapes match the nn.Module), O(1) activations."""
    F, Cin, K = feature_size, num_features_in, num_out
    ks = jax.random.split(key, 10)
    w1 = jax.random.normal(ks[0], (9, Cin, F), jnp.float32) / jnp.sqrt(9.0 * Cin)
    b1 = jax.random.normal(ks[1], (1, F), jnp.float32) * 0.1
    w2 = jax.random.normal(ks[2], (9, F, F), jnp.float32) / jnp.sqrt(9.0 * F)
    b2 = jax.random.normal(ks[3], (1, F), jnp.float32) * 0.1
    w3 = jax.random.normal(ks[4], (9, F, F), jnp.float32) / jnp.sqrt(9.0 * F)
    b3 = jax.random.normal(ks[5], (1, F), jnp.float32) * 0.1
    w4 = jax.random.normal(ks[6], (F, F), jnp.float32) / jnp.sqrt(1.0 * F)
    b4 = jax.random.normal(ks[7], (1, F), jnp.float32) * 0.1
    w5 = jax.random.normal(ks[8], (F, K), jnp.float32) * (1.5 / jnp.sqrt(1.0 * F))
    b5 = jax.random.normal(ks[9], (1, K), jnp.float32) * 0.1
    return (w1, b1, w2, b2, w3, b3, w4, b4, w5, b5)


if __name__ == "__main__":
    # Small shapes consistent with CellClassification:
    N, Cin, H, W = 2, 4, 16, 16
    feature_size = 32
    num_anchors, num_classes = 1, 1
    K = num_anchors * num_classes

    key = jax.random.PRNGKey(0)
    k_x, k_p = jax.random.split(key)
    x = jax.random.normal(k_x, (N, Cin, H, W), jnp.float32)
    params = init_params(k_p, Cin, feature_size, K)

    fwd = jax.jit(functools.partial(cell_classification_pallas,
                                    feature_size=feature_size))
    out = jax.block_until_ready(fwd(x, params))

    ref = _reference(x, params, feature_size)
    assert out.shape == (N, K, H, W), out.shape
    err = float(jnp.max(jnp.abs(out - ref)))
    # bf16 matmul operands (in both kernel and reference) leave only summation-order
    # and re-rounding noise; bugs show up at >=2e-2, so 3e-3 is a meaningful bound.
    assert err < 3e-3, f"max abs err {err}"

    print("KERNEL_OK")
</pallas_src>

<mosaic_0001>
module attributes {stable_mosaic.version = 11 : i64} {
  func.func @_cell_cls_kernel(%arg0: i32, %arg1: memref<1x8x640xf32, #tpu.memory_space<vmem>>, %arg2: memref<1x384xf32, #tpu.memory_space<vmem>>, %arg3: memref<9x32x8xbf16, #tpu.memory_space<vmem>>, %arg4: memref<18x32x32xbf16, #tpu.memory_space<vmem>>, %arg5: memref<32x32xbf16, #tpu.memory_space<vmem>>, %arg6: memref<8x32xbf16, #tpu.memory_space<vmem>>, %arg7: memref<4x32x1xf32, #tpu.memory_space<vmem>>, %arg8: memref<8x1xf32, #tpu.memory_space<vmem>>, %arg9: memref<1x8x384xf32, #tpu.memory_space<vmem>>, %arg10: memref<32x640xbf16, #tpu.memory_space<vmem>>) attributes {dimension_semantics = [#tpu.dimension_semantics<parallel>], iteration_bounds = array<i64: 2>, scalar_prefetch = 0 : i64, scratch_operands = 1 : i64, tpu.core_type = #tpu.core_type<tc>, window_params = [{transform_indices = @transform_0, window_bounds = array<i64: 1, 8, 640>}, {pipeline_mode = #tpu.pipeline_mode<synchronous>, transform_indices = @transform_1, window_bounds = array<i64: 1, 384>}, {pipeline_mode = #tpu.pipeline_mode<synchronous>, transform_indices = @transform_2, window_bounds = array<i64: 9, 32, 8>}, {pipeline_mode = #tpu.pipeline_mode<synchronous>, transform_indices = @transform_3, window_bounds = array<i64: 18, 32, 32>}, {pipeline_mode = #tpu.pipeline_mode<synchronous>, transform_indices = @transform_4, window_bounds = array<i64: 32, 32>}, {pipeline_mode = #tpu.pipeline_mode<synchronous>, transform_indices = @transform_5, window_bounds = array<i64: 8, 32>}, {pipeline_mode = #tpu.pipeline_mode<synchronous>, transform_indices = @transform_6, window_bounds = array<i64: 4, 32, 1>}, {pipeline_mode = #tpu.pipeline_mode<synchronous>, transform_indices = @transform_7, window_bounds = array<i64: 8, 1>}, {transform_indices = @transform_8, window_bounds = array<i64: 1, 8, 384>}]} {
    %c0 = arith.constant 0 : index
    %c0_0 = arith.constant 0 : index
    %0 = vector.load %arg2[%c0, %c0_0] : memref<1x384xf32, #tpu.memory_space<vmem>>, vector<1x384xf32>
    %cst = arith.constant 0.000000e+00 : bf16
    %1 = vector.broadcast %cst : bf16 to vector<32x128xbf16>
    %c0_1 = arith.constant 0 : index
    %c0_2 = arith.constant 0 : index
    %2 = vector.load %arg10[%c0_1, %c0_2] : memref<32x640xbf16, #tpu.memory_space<vmem>>, vector<32x128xbf16>
    tpu.vector_store %arg10[%c0_1, %c0_2], %1 {strides = array<i32>} : memref<32x640xbf16, #tpu.memory_space<vmem>>, vector<32x128xbf16>,
    %cst_3 = arith.constant 0.000000e+00 : bf16
    %3 = vector.broadcast %cst_3 : bf16 to vector<32x128xbf16>
    %c0_4 = arith.constant 0 : index
    %c512 = arith.constant 512 : index
    %4 = vector.load %arg10[%c0_4, %c512] : memref<32x640xbf16, #tpu.memory_space<vmem>>, vector<32x128xbf16>
    tpu.vector_store %arg10[%c0_4, %c512], %3 {strides = array<i32>} : memref<32x640xbf16, #tpu.memory_space<vmem>>, vector<32x128xbf16>,
    %c0_5 = arith.constant 0 : index
    %c0_6 = arith.constant 0 : index
    %c0_7 = arith.constant 0 : index
    %5 = vector.load %arg1[%c0_5, %c0_6, %c0_7] : memref<1x8x640xf32, #tpu.memory_space<vmem>>, vector<1x8x640xf32>
    %6 = vector.shape_cast %5 : vector<1x8x640xf32> to vector<8x640xf32>
    %7 = arith.truncf %6 : vector<8x640xf32> to vector<8x640xbf16>
    %c0_8 = arith.constant 0 : index
    %c0_9 = arith.constant 0 : index
    %c0_10 = arith.constant 0 : index
    %8 = vector.load %arg7[%c0_8, %c0_9, %c0_10] : memref<4x32x1xf32, #tpu.memory_space<vmem>>, vector<1x32x1xf32>
    %9 = vector.shape_cast %8 : vector<1x32x1xf32> to vector<32x1xf32>
    %c0_11 = arith.constant 0 : index
    %c0_12 = arith.constant 0 : index
    %c0_13 = arith.constant 0 : index
    %10 = vector.load %arg3[%c0_11, %c0_12, %c0_13] : memref<9x32x8xbf16, #tpu.memory_space<vmem>>, vector<1x32x8xbf16>
    %11 = vector.shape_cast %10 : vector<1x32x8xbf16> to vector<32x8xbf16>
    %12 = vector.extract_strided_slice %7 {offsets = [0, 109], sizes = [8, 384], strides = [1, 1]} : vector<8x640xbf16> to vector<8x384xbf16>
    %cst_14 = arith.constant dense<0.000000e+00> : vector<32x384xf32>
    %13 = tpu.matmul %11, %12, %cst_14 {dimension_numbers = #tpu.dot_dimension_numbers<[1], [0], [0], [1], [0, 0, 1, 1], [], []>} : vector<32x8xbf16>, vector<8x384xbf16>, vector<32x384xf32> -> vector<32x384xf32>
    %c1 = arith.constant 1 : index
    %c0_15 = arith.constant 0 : index
    %c0_16 = arith.constant 0 : index
    %14 = vector.load %arg3[%c1, %c0_15, %c0_16] : memref<9x32x8xbf16, #tpu.memory_space<vmem>>, vector<1x32x8xbf16>
    %15 = vector.shape_cast %14 : vector<1x32x8xbf16> to vector<32x8xbf16>
    %16 = vector.extract_strided_slice %7 {offsets = [0, 110], sizes = [8, 384], strides = [1, 1]} : vector<8x640xbf16> to vector<8x384xbf16>
    %cst_17 = arith.constant dense<0.000000e+00> : vector<32x384xf32>
    %17 = tpu.matmul %15, %16, %cst_17 {dimension_numbers = #tpu.dot_dimension_numbers<[1], [0], [0], [1], [0, 0, 1, 1], [], []>} : vector<32x8xbf16>, vector<8x384xbf16>, vector<32x384xf32> -> vector<32x384xf32>
    %18 = arith.addf %13, %17 : vector<32x384xf32>
    %c2 = arith.constant 2 : index
    %c0_18 = arith.constant 0 : index
    %c0_19 = arith.constant 0 : index
    %19 = vector.load %arg3[%c2, %c0_18, %c0_19] : memref<9x32x8xbf16, #tpu.memory_space<vmem>>, vector<1x32x8xbf16>
    %20 = vector.shape_cast %19 : vector<1x32x8xbf16> to vector<32x8xbf16>
    %21 = vector.extract_strided_slice %7 {offsets = [0, 111], sizes = [8, 384], strides = [1, 1]} : vector<8x640xbf16> to vector<8x384xbf16>
    %cst_20 = arith.constant dense<0.000000e+00> : vector<32x384xf32>
    %22 = tpu.matmul %20, %21, %cst_20 {dimension_numbers = #tpu.dot_dimension_numbers<[1], [0], [0], [1], [0, 0, 1, 1], [], []>} : vector<32x8xbf16>, vector<8x384xbf16>, vector<32x384xf32> -> vector<32x384xf32>
    %23 = arith.addf %18, %22 : vector<32x384xf32>
    %c3 = arith.constant 3 : index
    %c0_21 = arith.constant 0 : index
    %c0_22 = arith.constant 0 : index
    %24 = vector.load %arg3[%c3, %c0_21, %c0_22] : memref<9x32x8xbf16, #tpu.memory_space<vmem>>, vector<1x32x8xbf16>
    %25 = vector.shape_cast %24 : vector<1x32x8xbf16> to vector<32x8xbf16>
    %26 = vector.extract_strided_slice %7 {offsets = [0, 127], sizes = [8, 384], strides = [1, 1]} : vector<8x640xbf16> to vector<8x384xbf16>
    %cst_23 = arith.constant dense<0.000000e+00> : vector<32x384xf32>
    %27 = tpu.matmul %25, %26, %cst_23 {dimension_numbers = #tpu.dot_dimension_numbers<[1], [0], [0], [1], [0, 0, 1, 1], [], []>} : vector<32x8xbf16>, vector<8x384xbf16>, vector<32x384xf32> -> vector<32x384xf32>
    %28 = arith.addf %23, %27 : vector<32x384xf32>
    %c4 = arith.constant 4 : index
    %c0_24 = arith.constant 0 : index
    %c0_25 = arith.constant 0 : index
    %29 = vector.load %arg3[%c4, %c0_24, %c0_25] : memref<9x32x8xbf16, #tpu.memory_space<vmem>>, vector<1x32x8xbf16>
    %30 = vector.shape_cast %29 : vector<1x32x8xbf16> to vector<32x8xbf16>
    %31 = vector.extract_strided_slice %7 {offsets = [0, 128], sizes = [8, 384], strides = [1, 1]} : vector<8x640xbf16> to vector<8x384xbf16>
    %cst_26 = arith.constant dense<0.000000e+00> : vector<32x384xf32>
    %32 = tpu.matmul %30, %31, %cst_26 {dimension_numbers = #tpu.dot_dimension_numbers<[1], [0], [0], [1], [0, 0, 1, 1], [], []>} : vector<32x8xbf16>, vector<8x384xbf16>, vector<32x384xf32> -> vector<32x384xf32>
    %33 = arith.addf %28, %32 : vector<32x384xf32>
    %c5 = arith.constant 5 : index
    %c0_27 = arith.constant 0 : index
    %c0_28 = arith.constant 0 : index
    %34 = vector.load %arg3[%c5, %c0_27, %c0_28] : memref<9x32x8xbf16, #tpu.memory_space<vmem>>, vector<1x32x8xbf16>
    %35 = vector.shape_cast %34 : vector<1x32x8xbf16> to vector<32x8xbf16>
    %36 = vector.extract_strided_slice %7 {offsets = [0, 129], sizes = [8, 384], strides = [1, 1]} : vector<8x640xbf16> to vector<8x384xbf16>
    %cst_29 = arith.constant dense<0.000000e+00> : vector<32x384xf32>
    %37 = tpu.matmul %35, %36, %cst_29 {dimension_numbers = #tpu.dot_dimension_numbers<[1], [0], [0], [1], [0, 0, 1, 1], [], []>} : vector<32x8xbf16>, vector<8x384xbf16>, vector<32x384xf32> -> vector<32x384xf32>
    %38 = arith.addf %33, %37 : vector<32x384xf32>
    %c6 = arith.constant 6 : index
    %c0_30 = arith.constant 0 : index
    %c0_31 = arith.constant 0 : index
    %39 = vector.load %arg3[%c6, %c0_30, %c0_31] : memref<9x32x8xbf16, #tpu.memory_space<vmem>>, vector<1x32x8xbf16>
    %40 = vector.shape_cast %39 : vector<1x32x8xbf16> to vector<32x8xbf16>
    %41 = vector.extract_strided_slice %7 {offsets = [0, 145], sizes = [8, 384], strides = [1, 1]} : vector<8x640xbf16> to vector<8x384xbf16>
    %cst_32 = arith.constant dense<0.000000e+00> : vector<32x384xf32>
    %42 = tpu.matmul %40, %41, %cst_32 {dimension_numbers = #tpu.dot_dimension_numbers<[1], [0], [0], [1], [0, 0, 1, 1], [], []>} : vector<32x8xbf16>, vector<8x384xbf16>, vector<32x384xf32> -> vector<32x384xf32>
    %43 = arith.addf %38, %42 : vector<32x384xf32>
    %c7 = arith.constant 7 : index
    %c0_33 = arith.constant 0 : index
    %c0_34 = arith.constant 0 : index
    %44 = vector.load %arg3[%c7, %c0_33, %c0_34] : memref<9x32x8xbf16, #tpu.memory_space<vmem>>, vector<1x32x8xbf16>
    %45 = vector.shape_cast %44 : vector<1x32x8xbf16> to vector<32x8xbf16>
    %46 = vector.extract_strided_slice %7 {offsets = [0, 146], sizes = [8, 384], strides = [1, 1]} : vector<8x640xbf16> to vector<8x384xbf16>
    %cst_35 = arith.constant dense<0.000000e+00> : vector<32x384xf32>
    %47 = tpu.matmul %45, %46, %cst_35 {dimension_numbers = #tpu.dot_dimension_numbers<[1], [0], [0], [1], [0, 0, 1, 1], [], []>} : vector<32x8xbf16>, vector<8x384xbf16>, vector<32x384xf32> -> vector<32x384xf32>
    %48 = arith.addf %43, %47 : vector<32x384xf32>
    %c8 = arith.constant 8 : index
    %c0_36 = arith.constant 0 : index
    %c0_37 = arith.constant 0 : index
    %49 = vector.load %arg3[%c8, %c0_36, %c0_37] : memref<9x32x8xbf16, #tpu.memory_space<vmem>>, vector<1x32x8xbf16>
    %50 = vector.shape_cast %49 : vector<1x32x8xbf16> to vector<32x8xbf16>
    %51 = vector.extract_strided_slice %7 {offsets = [0, 147], sizes = [8, 384], strides = [1, 1]} : vector<8x640xbf16> to vector<8x384xbf16>
    %cst_38 = arith.constant dense<0.000000e+00> : vector<32x384xf32>
    %52 = tpu.matmul %50, %51, %cst_38 {dimension_numbers = #tpu.dot_dimension_numbers<[1], [0], [0], [1], [0, 0, 1, 1], [], []>} : vector<32x8xbf16>, vector<8x384xbf16>, vector<32x384xf32> -> vector<32x384xf32>
    %53 = arith.addf %48, %52 : vector<32x384xf32>
    %54 = vector.broadcast %9 : vector<32x1xf32> to vector<32x384xf32>
    %55 = arith.addf %53, %54 : vector<32x384xf32>
    %cst_39 = arith.constant 0.000000e+00 : f32
    %56 = vector.broadcast %cst_39 : f32 to vector<32x384xf32>
    %57 = arith.cmpf ogt, %55, %56 : vector<32x384xf32>
    %cst_40 = arith.constant 1.000000e-01 : f32
    %58 = vector.broadcast %cst_40 : f32 to vector<32x384xf32>
    %59 = arith.mulf %58, %55 : vector<32x384xf32>
    %60 = arith.select %57, %55, %59 : vector<32x384xi1>, vector<32x384xf32>
    %61 = vector.broadcast %0 : vector<1x384xf32> to vector<32x384xf32>
    %62 = arith.mulf %60, %61 : vector<32x384xf32>
    %63 = arith.truncf %62 : vector<32x384xf32> to vector<32x384xbf16>
    %c0_41 = arith.constant 0 : index
    %c128 = arith.constant 128 : index
    %64 = vector.load %arg10[%c0_41, %c128] : memref<32x640xbf16, #tpu.memory_space<vmem>>, vector<32x384xbf16>
    tpu.vector_store %arg10[%c0_41, %c128], %63 {strides = array<i32>} : memref<32x640xbf16, #tpu.memory_space<vmem>>, vector<32x384xbf16>,
    %c1_42 = arith.constant 1 : index
    %c0_43 = arith.constant 0 : index
    %c0_44 = arith.constant 0 : index
    %65 = vector.load %arg7[%c1_42, %c0_43, %c0_44] : memref<4x32x1xf32, #tpu.memory_space<vmem>>, vector<1x32x1xf32>
    %66 = vector.shape_cast %65 : vector<1x32x1xf32> to vector<32x1xf32>
    %c0_45 = arith.constant 0 : index
    %c0_46 = arith.constant 0 : index
    %c0_47 = arith.constant 0 : index
    %67 = vector.load %arg4[%c0_45, %c0_46, %c0_47] : memref<18x32x32xbf16, #tpu.memory_space<vmem>>, vector<1x32x32xbf16>
    %68 = vector.shape_cast %67 : vector<1x32x32xbf16> to vector<32x32xbf16>
    %c0_48 = arith.constant 0 : index
    %c109 = arith.constant 109 : index
    %69 = vector.load %arg10[%c0_48, %c109] : memref<32x640xbf16, #tpu.memory_space<vmem>>, vector<32x384xbf16>
    %cst_49 = arith.constant dense<0.000000e+00> : vector<32x384xf32>
    %70 = tpu.matmul %68, %69, %cst_49 {dimension_numbers = #tpu.dot_dimension_numbers<[1], [0], [0], [1], [0, 0, 1, 1], [], []>} : vector<32x32xbf16>, vector<32x384xbf16>, vector<32x384xf32> -> vector<32x384xf32>
    %c1_50 = arith.constant 1 : index
    %c0_51 = arith.constant 0 : index
    %c0_52 = arith.constant 0 : index
    %71 = vector.load %arg4[%c1_50, %c0_51, %c0_52] : memref<18x32x32xbf16, #tpu.memory_space<vmem>>, vector<1x32x32xbf16>
    %72 = vector.shape_cast %71 : vector<1x32x32xbf16> to vector<32x32xbf16>
    %c0_53 = arith.constant 0 : index
    %c110 = arith.constant 110 : index
    %73 = vector.load %arg10[%c0_53, %c110] : memref<32x640xbf16, #tpu.memory_space<vmem>>, vector<32x384xbf16>
    %cst_54 = arith.constant dense<0.000000e+00> : vector<32x384xf32>
    %74 = tpu.matmul %72, %73, %cst_54 {dimension_numbers = #tpu.dot_dimension_numbers<[1], [0], [0], [1], [0, 0, 1, 1], [], []>} : vector<32x32xbf16>, vector<32x384xbf16>, vector<32x384xf32> -> vector<32x384xf32>
    %75 = arith.addf %70, %74 : vector<32x384xf32>
    %c2_55 = arith.constant 2 : index
    %c0_56 = arith.constant 0 : index
    %c0_57 = arith.constant 0 : index
    %76 = vector.load %arg4[%c2_55, %c0_56, %c0_57] : memref<18x32x32xbf16, #tpu.memory_space<vmem>>, vector<1x32x32xbf16>
    %77 = vector.shape_cast %76 : vector<1x32x32xbf16> to vector<32x32xbf16>
    %c0_58 = arith.constant 0 : index
    %c111 = arith.constant 111 : index
    %78 = vector.load %arg10[%c0_58, %c111] : memref<32x640xbf16, #tpu.memory_space<vmem>>, vector<32x384xbf16>
    %cst_59 = arith.constant dense<0.000000e+00> : vector<32x384xf32>
    %79 = tpu.matmul %77, %78, %cst_59 {dimension_numbers = #tpu.dot_dimension_numbers<[1], [0], [0], [1], [0, 0, 1, 1], [], []>} : vector<32x32xbf16>, vector<32x384xbf16>, vector<32x384xf32> -> vector<32x384xf32>
    %80 = arith.addf %75, %79 : vector<32x384xf32>
    %c3_60 = arith.constant 3 : index
    %c0_61 = arith.constant 0 : index
    %c0_62 = arith.constant 0 : index
    %81 = vector.load %arg4[%c3_60, %c0_61, %c0_62] : memref<18x32x32xbf16, #tpu.memory_space<vmem>>, vector<1x32x32xbf16>
    %82 = vector.shape_cast %81 : vector<1x32x32xbf16> to vector<32x32xbf16>
    %c0_63 = arith.constant 0 : index
    %c127 = arith.constant 127 : index
    %83 = vector.load %arg10[%c0_63, %c127] : memref<32x640xbf16, #tpu.memory_space<vmem>>, vector<32x384xbf16>
    %cst_64 = arith.constant dense<0.000000e+00> : vector<32x384xf32>
    %84 = tpu.matmul %82, %83, %cst_64 {dimension_numbers = #tpu.dot_dimension_numbers<[1], [0], [0], [1], [0, 0, 1, 1], [], []>} : vector<32x32xbf16>, vector<32x384xbf16>, vector<32x384xf32> -> vector<32x384xf32>
    %85 = arith.addf %80, %84 : vector<32x384xf32>
    %c4_65 = arith.constant 4 : index
    %c0_66 = arith.constant 0 : index
    %c0_67 = arith.constant 0 : index
    %86 = vector.load %arg4[%c4_65, %c0_66, %c0_67] : memref<18x32x32xbf16, #tpu.memory_space<vmem>>, vector<1x32x32xbf16>
    %87 = vector.shape_cast %86 : vector<1x32x32xbf16> to vector<32x32xbf16>
    %c0_68 = arith.constant 0 : index
    %c128_69 = arith.constant 128 : index
    %88 = vector.load %arg10[%c0_68, %c128_69] : memref<32x640xbf16, #tpu.memory_space<vmem>>, vector<32x384xbf16>
    %cst_70 = arith.constant dense<0.000000e+00> : vector<32x384xf32>
    %89 = tpu.matmul %87, %88, %cst_70 {dimension_numbers = #tpu.dot_dimension_numbers<[1], [0], [0], [1], [0, 0, 1, 1], [], []>} : vector<32x32xbf16>, vector<32x384xbf16>, vector<32x384xf32> -> vector<32x384xf32>
    %90 = arith.addf %85, %89 : vector<32x384xf32>
    %c5_71 = arith.constant 5 : index
    %c0_72 = arith.constant 0 : index
    %c0_73 = arith.constant 0 : index
    %91 = vector.load %arg4[%c5_71, %c0_72, %c0_73] : memref<18x32x32xbf16, #tpu.memory_space<vmem>>, vector<1x32x32xbf16>
    %92 = vector.shape_cast %91 : vector<1x32x32xbf16> to vector<32x32xbf16>
    %c0_74 = arith.constant 0 : index
    %c129 = arith.constant 129 : index
    %93 = vector.load %arg10[%c0_74, %c129] : memref<32x640xbf16, #tpu.memory_space<vmem>>, vector<32x384xbf16>
    %cst_75 = arith.constant dense<0.000000e+00> : vector<32x384xf32>
    %94 = tpu.matmul %92, %93, %cst_75 {dimension_numbers = #tpu.dot_dimension_numbers<[1], [0], [0], [1], [0, 0, 1, 1], [], []>} : vector<32x32xbf16>, vector<32x384xbf16>, vector<32x384xf32> -> vector<32x384xf32>
    %95 = arith.addf %90, %94 : vector<32x384xf32>
    %c6_76 = arith.constant 6 : index
    %c0_77 = arith.constant 0 : index
    %c0_78 = arith.constant 0 : index
    %96 = vector.load %arg4[%c6_76, %c0_77, %c0_78] : memref<18x32x32xbf16, #tpu.memory_space<vmem>>, vector<1x32x32xbf16>
    %97 = vector.shape_cast %96 : vector<1x32x32xbf16> to vector<32x32xbf16>
    %c0_79 = arith.constant 0 : index
    %c145 = arith.constant 145 : index
    %98 = vector.load %arg10[%c0_79, %c145] : memref<32x640xbf16, #tpu.memory_space<vmem>>, vector<32x384xbf16>
    %cst_80 = arith.constant dense<0.000000e+00> : vector<32x384xf32>
    %99 = tpu.matmul %97, %98, %cst_80 {dimension_numbers = #tpu.dot_dimension_numbers<[1], [0], [0], [1], [0, 0, 1, 1], [], []>} : vector<32x32xbf16>, vector<32x384xbf16>, vector<32x384xf32> -> vector<32x384xf32>
    %100 = arith.addf %95, %99 : vector<32x384xf32>
    %c7_81 = arith.constant 7 : index
    %c0_82 = arith.constant 0 : index
    %c0_83 = arith.constant 0 : index
    %101 = vector.load %arg4[%c7_81, %c0_82, %c0_83] : memref<18x32x32xbf16, #tpu.memory_space<vmem>>, vector<1x32x32xbf16>
    %102 = vector.shape_cast %101 : vector<1x32x32xbf16> to vector<32x32xbf16>
    %c0_84 = arith.constant 0 : index
    %c146 = arith.constant 146 : index
    %103 = vector.load %arg10[%c0_84, %c146] : memref<32x640xbf16, #tpu.memory_space<vmem>>, vector<32x384xbf16>
    %cst_85 = arith.constant dense<0.000000e+00> : vector<32x384xf32>
    %104 = tpu.matmul %102, %103, %cst_85 {dimension_numbers = #tpu.dot_dimension_numbers<[1], [0], [0], [1], [0, 0, 1, 1], [], []>} : vector<32x32xbf16>, vector<32x384xbf16>, vector<32x384xf32> -> vector<32x384xf32>
    %105 = arith.addf %100, %104 : vector<32x384xf32>
    %c8_86 = arith.constant 8 : index
    %c0_87 = arith.constant 0 : index
    %c0_88 = arith.constant 0 : index
    %106 = vector.load %arg4[%c8_86, %c0_87, %c0_88] : memref<18x32x32xbf16, #tpu.memory_space<vmem>>, vector<1x32x32xbf16>
    %107 = vector.shape_cast %106 : vector<1x32x32xbf16> to vector<32x32xbf16>
    %c0_89 = arith.constant 0 : index
    %c147 = arith.constant 147 : index
    %108 = vector.load %arg10[%c0_89, %c147] : memref<32x640xbf16, #tpu.memory_space<vmem>>, vector<32x384xbf16>
    %cst_90 = arith.constant dense<0.000000e+00> : vector<32x384xf32>
    %109 = tpu.matmul %107, %108, %cst_90 {dimension_numbers = #tpu.dot_dimension_numbers<[1], [0], [0], [1], [0, 0, 1, 1], [], []>} : vector<32x32xbf16>, vector<32x384xbf16>, vector<32x384xf32> -> vector<32x384xf32>
    %110 = arith.addf %105, %109 : vector<32x384xf32>
    %111 = vector.broadcast %66 : vector<32x1xf32> to vector<32x384xf32>
    %112 = arith.addf %110, %111 : vector<32x384xf32>
    %cst_91 = arith.constant 0.000000e+00 : f32
    %113 = vector.broadcast %cst_91 : f32 to vector<32x384xf32>
    %114 = arith.cmpf ogt, %112, %113 : vector<32x384xf32>
    %cst_92 = arith.constant 1.000000e-01 : f32
    %115 = vector.broadcast %cst_92 : f32 to vector<32x384xf32>
    %116 = arith.mulf %115, %112 : vector<32x384xf32>
    %117 = arith.select %114, %112, %116 : vector<32x384xi1>, vector<32x384xf32>
    %118 = vector.broadcast %0 : vector<1x384xf32> to vector<32x384xf32>
    %119 = arith.mulf %117, %118 : vector<32x384xf32>
    %120 = arith.truncf %119 : vector<32x384xf32> to vector<32x384xbf16>
    %c0_93 = arith.constant 0 : index
    %c128_94 = arith.constant 128 : index
    %121 = vector.load %arg10[%c0_93, %c128_94] : memref<32x640xbf16, #tpu.memory_space<vmem>>, vector<32x384xbf16>
    tpu.vector_store %arg10[%c0_93, %c128_94], %120 {strides = array<i32>} : memref<32x640xbf16, #tpu.memory_space<vmem>>, vector<32x384xbf16>,
    %c2_95 = arith.constant 2 : index
    %c0_96 = arith.constant 0 : index
    %c0_97 = arith.constant 0 : index
    %122 = vector.load %arg7[%c2_95, %c0_96, %c0_97] : memref<4x32x1xf32, #tpu.memory_space<vmem>>, vector<1x32x1xf32>
    %123 = vector.shape_cast %122 : vector<1x32x1xf32> to vector<32x1xf32>
    %c9 = arith.constant 9 : index
    %c0_98 = arith.constant 0 : index
    %c0_99 = arith.constant 0 : index
    %124 = vector.load %arg4[%c9, %c0_98, %c0_99] : memref<18x32x32xbf16, #tpu.memory_space<vmem>>, vector<1x32x32xbf16>
    %125 = vector.shape_cast %124 : vector<1x32x32xbf16> to vector<32x32xbf16>
    %c0_100 = arith.constant 0 : index
    %c109_101 = arith.constant 109 : index
    %126 = vector.load %arg10[%c0_100, %c109_101] : memref<32x640xbf16, #tpu.memory_space<vmem>>, vector<32x384xbf16>
    %cst_102 = arith.constant dense<0.000000e+00> : vector<32x384xf32>
    %127 = tpu.matmul %125, %126, %cst_102 {dimension_numbers = #tpu.dot_dimension_numbers<[1], [0], [0], [1], [0, 0, 1, 1], [], []>} : vector<32x32xbf16>, vector<32x384xbf16>, vector<32x384xf32> -> vector<32x384xf32>
    %c10 = arith.constant 10 : index
    %c0_103 = arith.constant 0 : index
    %c0_104 = arith.constant 0 : index
    %128 = vector.load %arg4[%c10, %c0_103, %c0_104] : memref<18x32x32xbf16, #tpu.memory_space<vmem>>, vector<1x32x32xbf16>
    %129 = vector.shape_cast %128 : vector<1x32x32xbf16> to vector<32x32xbf16>
    %c0_105 = arith.constant 0 : index
    %c110_106 = arith.constant 110 : index
    %130 = vector.load %arg10[%c0_105, %c110_106] : memref<32x640xbf16, #tpu.memory_space<vmem>>, vector<32x384xbf16>
    %cst_107 = arith.constant dense<0.000000e+00> : vector<32x384xf32>
    %131 = tpu.matmul %129, %130, %cst_107 {dimension_numbers = #tpu.dot_dimension_numbers<[1], [0], [0], [1], [0, 0, 1, 1], [], []>} : vector<32x32xbf16>, vector<32x384xbf16>, vector<32x384xf32> -> vector<32x384xf32>
    %132 = arith.addf %127, %131 : vector<32x384xf32>
    %c11 = arith.constant 11 : index
    %c0_108 = arith.constant 0 : index
    %c0_109 = arith.constant 0 : index
    %133 = vector.load %arg4[%c11, %c0_108, %c0_109] : memref<18x32x32xbf16, #tpu.memory_space<vmem>>, vector<1x32x32xbf16>
    %134 = vector.shape_cast %133 : vector<1x32x32xbf16> to vector<32x32xbf16>
    %c0_110 = arith.constant 0 : index
    %c111_111 = arith.constant 111 : index
    %135 = vector.load %arg10[%c0_110, %c111_111] : memref<32x640xbf16, #tpu.memory_space<vmem>>, vector<32x384xbf16>
    %cst_112 = arith.constant dense<0.000000e+00> : vector<32x384xf32>
    %136 = tpu.matmul %134, %135, %cst_112 {dimension_numbers = #tpu.dot_dimension_numbers<[1], [0], [0], [1], [0, 0, 1, 1], [], []>} : vector<32x32xbf16>, vector<32x384xbf16>, vector<32x384xf32> -> vector<32x384xf32>
    %137 = arith.addf %132, %136 : vector<32x384xf32>
    %c12 = arith.constant 12 : index
    %c0_113 = arith.constant 0 : index
    %c0_114 = arith.constant 0 : index
    %138 = vector.load %arg4[%c12, %c0_113, %c0_114] : memref<18x32x32xbf16, #tpu.memory_space<vmem>>, vector<1x32x32xbf16>
    %139 = vector.shape_cast %138 : vector<1x32x32xbf16> to vector<32x32xbf16>
    %c0_115 = arith.constant 0 : index
    %c127_116 = arith.constant 127 : index
    %140 = vector.load %arg10[%c0_115, %c127_116] : memref<32x640xbf16, #tpu.memory_space<vmem>>, vector<32x384xbf16>
    %cst_117 = arith.constant dense<0.000000e+00> : vector<32x384xf32>
    %141 = tpu.matmul %139, %140, %cst_117 {dimension_numbers = #tpu.dot_dimension_numbers<[1], [0], [0], [1], [0, 0, 1, 1], [], []>} : vector<32x32xbf16>, vector<32x384xbf16>, vector<32x384xf32> -> vector<32x384xf32>
    %142 = arith.addf %137, %141 : vector<32x384xf32>
    %c13 = arith.constant 13 : index
    %c0_118 = arith.constant 0 : index
    %c0_119 = arith.constant 0 : index
    %143 = vector.load %arg4[%c13, %c0_118, %c0_119] : memref<18x32x32xbf16, #tpu.memory_space<vmem>>, vector<1x32x32xbf16>
    %144 = vector.shape_cast %143 : vector<1x32x32xbf16> to vector<32x32xbf16>
    %c0_120 = arith.constant 0 : index
    %c128_121 = arith.constant 128 : index
    %145 = vector.load %arg10[%c0_120, %c128_121] : memref<32x640xbf16, #tpu.memory_space<vmem>>, vector<32x384xbf16>
    %cst_122 = arith.constant dense<0.000000e+00> : vector<32x384xf32>
    %146 = tpu.matmul %144, %145, %cst_122 {dimension_numbers = #tpu.dot_dimension_numbers<[1], [0], [0], [1], [0, 0, 1, 1], [], []>} : vector<32x32xbf16>, vector<32x384xbf16>, vector<32x384xf32> -> vector<32x384xf32>
    %147 = arith.addf %142, %146 : vector<32x384xf32>
    %c14 = arith.constant 14 : index
    %c0_123 = arith.constant 0 : index
    %c0_124 = arith.constant 0 : index
    %148 = vector.load %arg4[%c14, %c0_123, %c0_124] : memref<18x32x32xbf16, #tpu.memory_space<vmem>>, vector<1x32x32xbf16>
    %149 = vector.shape_cast %148 : vector<1x32x32xbf16> to vector<32x32xbf16>
    %c0_125 = arith.constant 0 : index
    %c129_126 = arith.constant 129 : index
    %150 = vector.load %arg10[%c0_125, %c129_126] : memref<32x640xbf16, #tpu.memory_space<vmem>>, vector<32x384xbf16>
    %cst_127 = arith.constant dense<0.000000e+00> : vector<32x384xf32>
    %151 = tpu.matmul %149, %150, %cst_127 {dimension_numbers = #tpu.dot_dimension_numbers<[1], [0], [0], [1], [0, 0, 1, 1], [], []>} : vector<32x32xbf16>, vector<32x384xbf16>, vector<32x384xf32> -> vector<32x384xf32>
    %152 = arith.addf %147, %151 : vector<32x384xf32>
    %c15 = arith.constant 15 : index
    %c0_128 = arith.constant 0 : index
    %c0_129 = arith.constant 0 : index
    %153 = vector.load %arg4[%c15, %c0_128, %c0_129] : memref<18x32x32xbf16, #tpu.memory_space<vmem>>, vector<1x32x32xbf16>
    %154 = vector.shape_cast %153 : vector<1x32x32xbf16> to vector<32x32xbf16>
    %c0_130 = arith.constant 0 : index
    %c145_131 = arith.constant 145 : index
    %155 = vector.load %arg10[%c0_130, %c145_131] : memref<32x640xbf16, #tpu.memory_space<vmem>>, vector<32x384xbf16>
    %cst_132 = arith.constant dense<0.000000e+00> : vector<32x384xf32>
    %156 = tpu.matmul %154, %155, %cst_132 {dimension_numbers = #tpu.dot_dimension_numbers<[1], [0], [0], [1], [0, 0, 1, 1], [], []>} : vector<32x32xbf16>, vector<32x384xbf16>, vector<32x384xf32> -> vector<32x384xf32>
    %157 = arith.addf %152, %156 : vector<32x384xf32>
    %c16 = arith.constant 16 : index
    %c0_133 = arith.constant 0 : index
    %c0_134 = arith.constant 0 : index
    %158 = vector.load %arg4[%c16, %c0_133, %c0_134] : memref<18x32x32xbf16, #tpu.memory_space<vmem>>, vector<1x32x32xbf16>
    %159 = vector.shape_cast %158 : vector<1x32x32xbf16> to vector<32x32xbf16>
    %c0_135 = arith.constant 0 : index
    %c146_136 = arith.constant 146 : index
    %160 = vector.load %arg10[%c0_135, %c146_136] : memref<32x640xbf16, #tpu.memory_space<vmem>>, vector<32x384xbf16>
    %cst_137 = arith.constant dense<0.000000e+00> : vector<32x384xf32>
    %161 = tpu.matmul %159, %160, %cst_137 {dimension_numbers = #tpu.dot_dimension_numbers<[1], [0], [0], [1], [0, 0, 1, 1], [], []>} : vector<32x32xbf16>, vector<32x384xbf16>, vector<32x384xf32> -> vector<32x384xf32>
    %162 = arith.addf %157, %161 : vector<32x384xf32>
    %c17 = arith.constant 17 : index
    %c0_138 = arith.constant 0 : index
    %c0_139 = arith.constant 0 : index
    %163 = vector.load %arg4[%c17, %c0_138, %c0_139] : memref<18x32x32xbf16, #tpu.memory_space<vmem>>, vector<1x32x32xbf16>
    %164 = vector.shape_cast %163 : vector<1x32x32xbf16> to vector<32x32xbf16>
    %c0_140 = arith.constant 0 : index
    %c147_141 = arith.constant 147 : index
    %165 = vector.load %arg10[%c0_140, %c147_141] : memref<32x640xbf16, #tpu.memory_space<vmem>>, vector<32x384xbf16>
    %cst_142 = arith.constant dense<0.000000e+00> : vector<32x384xf32>
    %166 = tpu.matmul %164, %165, %cst_142 {dimension_numbers = #tpu.dot_dimension_numbers<[1], [0], [0], [1], [0, 0, 1, 1], [], []>} : vector<32x32xbf16>, vector<32x384xbf16>, vector<32x384xf32> -> vector<32x384xf32>
    %167 = arith.addf %162, %166 : vector<32x384xf32>
    %168 = vector.broadcast %123 : vector<32x1xf32> to vector<32x384xf32>
    %169 = arith.addf %167, %168 : vector<32x384xf32>
    %cst_143 = arith.constant 0.000000e+00 : f32
    %170 = vector.broadcast %cst_143 : f32 to vector<32x384xf32>
    %171 = arith.cmpf ogt, %169, %170 : vector<32x384xf32>
    %cst_144 = arith.constant 1.000000e-01 : f32
    %172 = vector.broadcast %cst_144 : f32 to vector<32x384xf32>
    %173 = arith.mulf %172, %169 : vector<32x384xf32>
    %174 = arith.select %171, %169, %173 : vector<32x384xi1>, vector<32x384xf32>
    %175 = vector.broadcast %0 : vector<1x384xf32> to vector<32x384xf32>
    %176 = arith.mulf %174, %175 : vector<32x384xf32>
    %177 = arith.truncf %176 : vector<32x384xf32> to vector<32x384xbf16>
    %c0_145 = arith.constant 0 : index
    %c128_146 = arith.constant 128 : index
    %178 = vector.load %arg10[%c0_145, %c128_146] : memref<32x640xbf16, #tpu.memory_space<vmem>>, vector<32x384xbf16>
    tpu.vector_store %arg10[%c0_145, %c128_146], %177 {strides = array<i32>} : memref<32x640xbf16, #tpu.memory_space<vmem>>, vector<32x384xbf16>,
    %c0_147 = arith.constant 0 : index
    %c128_148 = arith.constant 128 : index
    %179 = vector.load %arg10[%c0_147, %c128_148] : memref<32x640xbf16, #tpu.memory_space<vmem>>, vector<32x384xbf16>
    %c0_149 = arith.constant 0 : index
    %c0_150 = arith.constant 0 : index
    %180 = vector.load %arg5[%c0_149, %c0_150] : memref<32x32xbf16, #tpu.memory_space<vmem>>, vector<32x32xbf16>
    %cst_151 = arith.constant dense<0.000000e+00> : vector<32x384xf32>
    %181 = tpu.matmul %180, %179, %cst_151 {dimension_numbers = #tpu.dot_dimension_numbers<[1], [0], [0], [1], [0, 0, 1, 1], [], []>} : vector<32x32xbf16>, vector<32x384xbf16>, vector<32x384xf32> -> vector<32x384xf32>
    %c3_152 = arith.constant 3 : index
    %c0_153 = arith.constant 0 : index
    %c0_154 = arith.constant 0 : index
    %182 = vector.load %arg7[%c3_152, %c0_153, %c0_154] : memref<4x32x1xf32, #tpu.memory_space<vmem>>, vector<1x32x1xf32>
    %183 = vector.shape_cast %182 : vector<1x32x1xf32> to vector<32x1xf32>
    %184 = vector.broadcast %183 : vector<32x1xf32> to vector<32x384xf32>
    %185 = arith.addf %181, %184 : vector<32x384xf32>
    %cst_155 = arith.constant 0.000000e+00 : f32
    %186 = vector.broadcast %cst_155 : f32 to vector<32x384xf32>
    %187 = arith.cmpf ogt, %185, %186 : vector<32x384xf32>
    %cst_156 = arith.constant 1.000000e-01 : f32
    %188 = vector.broadcast %cst_156 : f32 to vector<32x384xf32>
    %189 = arith.mulf %188, %185 : vector<32x384xf32>
    %190 = arith.select %187, %185, %189 : vector<32x384xi1>, vector<32x384xf32>
    %c0_157 = arith.constant 0 : index
    %c0_158 = arith.constant 0 : index
    %191 = vector.load %arg6[%c0_157, %c0_158] : memref<8x32xbf16, #tpu.memory_space<vmem>>, vector<8x32xbf16>
    %192 = arith.truncf %190 : vector<32x384xf32> to vector<32x384xbf16>
    %cst_159 = arith.constant dense<0.000000e+00> : vector<8x384xf32>
    %193 = tpu.matmul %191, %192, %cst_159 {dimension_numbers = #tpu.dot_dimension_numbers<[1], [0], [0], [1], [0, 0, 1, 1], [], []>} : vector<8x32xbf16>, vector<32x384xbf16>, vector<8x384xf32> -> vector<8x384xf32>
    %c0_160 = arith.constant 0 : index
    %c0_161 = arith.constant 0 : index
    %194 = vector.load %arg8[%c0_160, %c0_161] : memref<8x1xf32, #tpu.memory_space<vmem>>, vector<8x1xf32>
    %195 = vector.broadcast %194 : vector<8x1xf32> to vector<8x384xf32>
    %196 = arith.addf %193, %195 : vector<8x384xf32>
    %197 = arith.negf %196 : vector<8x384xf32>
    %198 = math.exp %197 : vector<8x384xf32>
    %cst_162 = arith.constant 1.000000e+00 : f32
    %199 = vector.broadcast %cst_162 : f32 to vector<8x384xf32>
    %200 = arith.addf %199, %198 : vector<8x384xf32>
    %201 = arith.divf %199, %200 : vector<8x384xf32>
    %c0_163 = arith.constant 0 : index
    %c0_164 = arith.constant 0 : index
    %c0_165 = arith.constant 0 : index
    %202 = vector.load %arg9[%c0_163, %c0_164, %c0_165] : memref<1x8x384xf32, #tpu.memory_space<vmem>>, vector<1x8x384xf32>
    %203 = vector.shape_cast %202 : vector<1x8x384xf32> to vector<8x384xf32>
    %204 = vector.shape_cast %201 : vector<8x384xf32> to vector<1x8x384xf32>
    tpu.vector_store %arg9[%c0_163, %c0_164, %c0_165], %204 {strides = array<i32>} : memref<1x8x384xf32, #tpu.memory_space<vmem>>, vector<1x8x384xf32>,
    return
  }
  func.func @transform_0(%arg0: i32) -> (i32, i32, i32) {
    %c0_i32 = arith.constant 0 : i32
    %c0_i32_0 = arith.constant 0 : i32
    %c0_i32_1 = arith.constant 0 : i32
    return %arg0, %c0_i32, %c0_i32_0 : i32, i32, i32
  }
  func.func @transform_1(%arg0: i32) -> (i32, i32) {
    %c0_i32 = arith.constant 0 : i32
    %c0_i32_0 = arith.constant 0 : i32
    %c0_i32_1 = arith.constant 0 : i32
    return %c0_i32, %c0_i32_0 : i32, i32
  }
  func.func @transform_2(%arg0: i32) -> (i32, i32, i32) {
    %c0_i32 = arith.constant 0 : i32
    %c0_i32_0 = arith.constant 0 : i32
    %c0_i32_1 = arith.constant 0 : i32
    %c0_i32_2 = arith.constant 0 : i32
    return %c0_i32, %c0_i32_0, %c0_i32_1 : i32, i32, i32
  }
  func.func @transform_3(%arg0: i32) -> (i32, i32, i32) {
    %c0_i32 = arith.constant 0 : i32
    %c0_i32_0 = arith.constant 0 : i32
    %c0_i32_1 = arith.constant 0 : i32
    %c0_i32_2 = arith.constant 0 : i32
    return %c0_i32, %c0_i32_0, %c0_i32_1 : i32, i32, i32
  }
  func.func @transform_4(%arg0: i32) -> (i32, i32) {
    %c0_i32 = arith.constant 0 : i32
    %c0_i32_0 = arith.constant 0 : i32
    %c0_i32_1 = arith.constant 0 : i32
    return %c0_i32, %c0_i32_0 : i32, i32
  }
  func.func @transform_5(%arg0: i32) -> (i32, i32) {
    %c0_i32 = arith.constant 0 : i32
    %c0_i32_0 = arith.constant 0 : i32
    %c0_i32_1 = arith.constant 0 : i32
    return %c0_i32, %c0_i32_0 : i32, i32
  }
  func.func @transform_6(%arg0: i32) -> (i32, i32, i32) {
    %c0_i32 = arith.constant 0 : i32
    %c0_i32_0 = arith.constant 0 : i32
    %c0_i32_1 = arith.constant 0 : i32
    %c0_i32_2 = arith.constant 0 : i32
    return %c0_i32, %c0_i32_0, %c0_i32_1 : i32, i32, i32
  }
  func.func @transform_7(%arg0: i32) -> (i32, i32) {
    %c0_i32 = arith.constant 0 : i32
    %c0_i32_0 = arith.constant 0 : i32
    %c0_i32_1 = arith.constant 0 : i32
    return %c0_i32, %c0_i32_0 : i32, i32
  }
  func.func @transform_8(%arg0: i32) -> (i32, i32, i32) {
    %c0_i32 = arith.constant 0 : i32
    %c0_i32_0 = arith.constant 0 : i32
    %c0_i32_1 = arith.constant 0 : i32
    return %arg0, %c0_i32, %c0_i32_0 : i32, i32, i32
  }
}

</mosaic_0001>

<bundles_post_ra>
// kernel: cell_classification_pallas.1
= control target key start
LH: loop header
LB: loop body
LE: loop exit
PB: predicated region body
PF: predicated region fallthrough
CT: control target
= control target key end

     0   :  { %s5139_s27 = smov 0   ;;  %s6542_s0 = inlined_call_operand.vmem [shape: f32[2,8,640], index: 0, kind: input, shape index: {}]   ;;  %s6543_s1 = inlined_call_operand.vmem [shape: f32[1,384], index: 1, kind: input, shape index: {}]   ;;  %s6544_s2 = inlined_call_operand.vmem [shape: bf16[9,32,8], index: 2, kind: input, shape index: {}]   ;;  %s6545_s3 = inlined_call_operand.vmem [shape: bf16[18,32,32], index: 3, kind: input, shape index: {}]   ;;  %s6546_s4 = inlined_call_operand.vmem [shape: bf16[32,32], index: 4, kind: input, shape index: {}]   ;;  %s6547_s5 = inlined_call_operand.vmem [shape: bf16[8,32], index: 5, kind: input, shape index: {}]   ;;  %s6548_s6 = inlined_call_operand.vmem [shape: f32[4,32,1], index: 6, kind: input, shape index: {}]   ;;  %s6549_s7 = inlined_call_operand.vmem [shape: f32[8,1], index: 7, kind: input, shape index: {}]   ;;  %s6550_s8 = inlined_call_operand.vmem [shape: f32[2,8,384], index: 8, kind: output, shape index: {}]  }
   0x1 LB: > { %s4218_s28 = sadd.s32 4294967295, %s5083_s27   ;;  %p4222_p0 = scmp.ge.s32.totalorder %s5083_s27, 1  ;;  %s5083_s27 = sphi %s5139_s27, %s18_s27  }
   0x2   : > { %p262_p1 = scmp.lt.s32.totalorder %s5083_s27, 3 }
   0x4   : > { %p263_p2 = pnand %p4222_p0, %p262_p1 }
   0x6   : > { %266 = sbr.rel (%p263_p2) target bundleno = 1840 (0x730), region = 52 }
   0xb   : > { %p296_p3 = scmp.lt.s32.totalorder %s4218_s28, 1  ;;  %s5085_s11 = smov 18   ;;  %vm461_vm0 = vcmask 154624   ;;  %vm376_vm1 = vcmask 1043456   ;;  %v5214_v22 = vld [vmem:[%s6544_s2] sm:$0xff]  ;;  %vm369_vm2 = vcmask 64512  }
   0xc   : > { %s5086_s12 = smov 19   ;;  %s5087_s13 = smov 17   ;;  %v5231_v25 = vld [vmem:[%s6544_s2 + $0x8] sm:$0xff]  ;;  %vm365_vm3 = vcmask 146432   ;;  %v4939_v32 = vld [vmem:[%s6544_s2 + $0x10] sm:$0xff]  ;;  %vm560_vm4 = vcmask 138240  }
   0xd   : > { %s6624_s28 = smov (!%p296_p3, %s4218_s28), 1  ;;  %s5088_s14 = smov 1   ;;  %v4940_v46 = vld [vmem:[%s6544_s2 + $0x18] sm:$0xff]  ;;  %v4941_v52 = vld [vmem:[%s6544_s2 + $0x20] sm:$0xff]  ;;  %vm671_vm5 = vcmask 7168   ;;  %v4942_v63 = vld [vmem:[%s6544_s2 + $0x28] sm:$0xff] }
   0xe   : > { %s5043_s29 = smul.u32 40, %s6624_s28  ;;  %s5089_s15 = smov 127   ;;  %vm884_vm6 = vcmask 1039360   ;;  %vm995_vm7 = vcmask 908288   ;;  %vm1106_vm8 = vcmask 900096   ;;  %vm1217_vm9 = vcmask 891904  }
   0xf   : > { %s5090_s16 = smov 111   ;;  %s5091_s17 = smov 110  }
  0x10   : > { %s5153_s10 = scalar_lea.vmem %s6542_s0, %s5043_s29  ;;  %s5092_s20 = smov 109  }
  0x11   : > { %v318_v0 = vld [vmem:[%s5153_s10 + $0x10] sm:$0xff]  ;;  %v319_v1 = vld [vmem:[%s5153_s10 + $0x18] sm:$0xff]  ;;  %v316_v2 = vld [vmem:[%s5153_s10] sm:$0xff] }
  0x12   : > { %v322_v3 = vpack.c.bf16 %v319_v1, %v318_v0  ;;  %v317_v4 = vld [vmem:[%s5153_s10 + $0x8] sm:$0xff]  ;;  %v320_v14 = vld [vmem:[%s5153_s10 + $0x20] sm:$0xff]  ;;  %v4943_v0 = vld [vmem:[%s6544_s2 + $0x30] sm:$0xff] }
  0x13   : > { %v321_v5 = vpack.c.bf16 %v317_v4, %v316_v2  ;;  %v323_v15 = vpack.c.bf16 %v320_v14, %v320_v14 }
  0x14   : > { %v351_v6 = vunpack.c.l.b16 %v322_v3  ;;  %v352_v10 = vunpack.c.h.b16 %v322_v3 }
  0x15   : > { %v349_v7 = vunpack.c.l.b16 %v321_v5  ;;  %v350_v11 = vunpack.c.h.b16 %v321_v5  ;;  %v874_v16 = vunpack.c.l.b16 %v323_v15 }
  0x16   : > { %v5159_v8 = vpack.c.b16 %v351_v6, %v351_v6  ;;  %v5165_v12 = vpack.c.b16 %v352_v10, %v352_v10 }
  0x17   : > { %v353_v9 = vpack.c.b16 %v349_v7, %v349_v7  ;;  %v5167_v13 = vpack.c.b16 %v350_v11, %v350_v11  ;;  %v875_v18 = vpack.c.b16 %v874_v16, %v874_v16 }
  0x18   : > { %361 = vrot.lane.b32.xlu1 %v5159_v8, %s5085_s11  ;;  %v787_v3 = vsel %vm376_vm1, %v5165_v12, 0  ;;  %v784_v6 = vsel %vm376_vm1, %v5159_v8, 0 }
  0x19   : > { %357 = vrot.lane.b32.xlu0 %v353_v9, %s5085_s11  ;;  %453 = vrot.lane.b32.xlu2 %v353_v9, %s5086_s12  ;;  %v781_v5 = vsel %vm376_vm1, %v5167_v13, 0 }
  0x20   : > { %363 = vrot.lane.b32.xlu1 %v5165_v12, %s5085_s11 }
  0x21   : > { %359 = vrot.lane.b32.xlu0 %v5167_v13, %s5085_s11  ;;  %455 = vrot.lane.b32.xlu2 %v5167_v13, %s5086_s12 }
  0x28   : > { %459 = vrot.lane.b32.xlu1 %v5165_v12, %s5086_s12 }
  0x29   : > { %457 = vrot.lane.b32.xlu0 %v5159_v8, %s5086_s12  ;;  %552 = vrot.lane.b32.xlu2 %v353_v9, %s5087_s13 }
  0x30   : > { %556 = vrot.lane.b32.xlu1 %v5159_v8, %s5087_s13 }
  0x31   : > { %554 = vrot.lane.b32.xlu0 %v5167_v13, %s5087_s13  ;;  %558 = vrot.lane.b32.xlu2 %v5165_v12, %s5087_s13 }
  0x38   : > { %665 = vrot.lane.b32.xlu1 %v5167_v13, %s5088_s14 }
  0x39   : > { %663 = vrot.lane.b32.xlu0 %v353_v9, %s5088_s14  ;;  %667 = vrot.lane.b32.xlu2 %v5159_v8, %s5088_s14  ;;  %v4944_v9 = vld [vmem:[%s6544_s2 + $0x38] sm:$0xff] }
  0x40   : > { %876 = vrot.lane.b32.xlu1 %v5167_v13, %s5089_s15 }
  0x41   : > { %669 = vrot.lane.b32.xlu0 %v5165_v12, %s5088_s14  ;;  %878 = vrot.lane.b32.xlu2 %v5159_v8, %s5089_s15 }
  0x48   : > { %882 = vrot.lane.b32.xlu1 %v875_v18, %s5089_s15 }
  0x49   : > { %880 = vrot.lane.b32.xlu0 %v5165_v12, %s5089_s15  ;;  %987 = vrot.lane.b32.xlu2 %v5167_v13, %s5090_s16 }
  0x50   : > { %991 = vrot.lane.b32.xlu1 %v5165_v12, %s5090_s16 }
  0x51   : > { %989 = vrot.lane.b32.xlu0 %v5159_v8, %s5090_s16  ;;  %993 = vrot.lane.b32.xlu2 %v875_v18, %s5090_s16 }
  0x58   : > { %1100 = vrot.lane.b32.xlu1 %v5159_v8, %s5091_s17 }
  0x59   : > { %1098 = vrot.lane.b32.xlu0 %v5167_v13, %s5091_s17  ;;  %1102 = vrot.lane.b32.xlu2 %v5165_v12, %s5091_s17 }
  0x60   : > { %1209 = vrot.lane.b32.xlu1 %v5167_v13, %s5092_s20 }
  0x61   : > { %1104 = vrot.lane.b32.xlu0 %v875_v18, %s5091_s17  ;;  %1211 = vrot.lane.b32.xlu2 %v5159_v8, %s5092_s20  ;;  %v4947_v8 = vld [vmem:[%s6544_s2 + $0x50] sm:$0xff] }
  0x68   : > { %1215 = vrot.lane.b32.xlu1 %v875_v18, %s5092_s20 }
  0x69   : > { %1213 = vrot.lane.b32.xlu0 %v5165_v12, %s5092_s20 }
  0x73   : > { %v454_v17 = vpop.permute.xlu2 %453 }
  0x7b   : > { %v456_v19 = vpop.permute.xlu2 %455 }
  0x7c   : > { %v462_v20 = vsel %vm461_vm0, %v454_v17, %v456_v19 }
  0x7d   : > { %v472_v21 = vsel %vm376_vm1, %v462_v20, 0 }
  0x7e   : > { %487 = vmatpush.bf16.msra.mxu3 %v472_v21 }
  0x81   : > { %4251 = vmatmul.msk.bf16.vlgmr.msra.gmra.mxu3 %vm369_vm2, %v5214_v22 }
  0x83   : > { %v553_v35 = vpop.permute.xlu2 %552 }
  0x8a   : > { %v362_v23 = vpop.permute.xlu1 %361 }
  0x8b   : > { %v358_v24 = vpop.permute.xlu0 %357  ;;  %v559_v42 = vpop.permute.xlu2 %558 }
  0x91   : > { %4252 = vmatmul.msk.bf16.gmra.mxu3 %vm369_vm2, %v5231_v25 }
  0x92   : > { %v364_v26 = vpop.permute.xlu1 %363 }
  0x93   : > { %v360_v27 = vpop.permute.xlu0 %359  ;;  %v368_v28 = vsel %vm365_vm3, %v362_v23, %v364_v26  ;;  %v668_v54 = vpop.permute.xlu2 %667 }
  0x94   : > { %v366_v29 = vsel %vm365_vm3, %v358_v24, %v360_v27  ;;  %v367_v30 = vsel %vm365_vm3, %v360_v27, %v362_v23  ;;  %v384_v31 = vsel %vm376_vm1, %v368_v28, 0  ;;  %v4945_v23 = vld [vmem:[%s6544_s2 + $0x40] sm:$0xff]  ;;  %v4948_v24 = vld [vmem:[%s6544_s2 + $0x58] sm:$0xff] }
  0x95   : > { %v378_v33 = vsel %vm376_vm1, %v366_v29, 0  ;;  %v381_v34 = vsel %vm376_vm1, %v367_v30, 0  ;;  %431 = vmatpush.bf16.msra.mxu2 %v384_v31  ;;  %v5340_v27 = vld [vmem:[%s6544_s2 + $0x60] sm:$0xff] }
  0x96   : > { %393 = vmatpush.bf16.msra.mxu0 %v378_v33  ;;  %412 = vmatpush.bf16.msra.mxu1 %v381_v34 }
  0x98   : > { %4241 = vmatmul.msk.bf16.vlgmr.msra.gmra.mxu2 %vm369_vm2, %v4939_v32 }
  0x99   : > { %4237 = vmatmul.msk.bf16.vlgmr.msra.gmra.mxu0 %vm369_vm2, %v4939_v32  ;;  %4239 = vmatmul.msk.bf16.vlgmr.msra.gmra.mxu1 %vm369_vm2, %v4939_v32 }
  0x9a   : > { %v460_v36 = vpop.permute.xlu1 %459 }
  0x9b   : > { %v458_v37 = vpop.permute.xlu0 %457  ;;  %v879_v2 = vpop.permute.xlu2 %878 }
  0x9c   : > { %v463_v38 = vsel %vm461_vm0, %v456_v19, %v458_v37  ;;  %v464_v39 = vsel %vm461_vm0, %v458_v37, %v460_v36 }
  0x9d   : > { %v475_v40 = vsel %vm376_vm1, %v463_v38, 0  ;;  %v478_v41 = vsel %vm376_vm1, %v464_v39, 0 }
  0x9e   : > { %506 = vmatpush.bf16.msrb.mxu0 %v475_v40  ;;  %525 = vmatpush.bf16.msrb.mxu1 %v478_v41 }
  0xa2   : > { %v557_v43 = vpop.permute.xlu1 %556 }
  0xa3   : > { %v555_v44 = vpop.permute.xlu0 %554  ;;  %v563_v45 = vsel %vm560_vm4, %v557_v43, %v559_v42  ;;  %v988_v16 = vpop.permute.xlu2 %987 }
  0xa4   : > { %v561_v47 = vsel %vm560_vm4, %v553_v35, %v555_v44  ;;  %v562_v48 = vsel %vm560_vm4, %v555_v44, %v557_v43  ;;  %v577_v49 = vsel %vm376_vm1, %v563_v45, 0  ;;  %v5360_v44 = vld [vmem:[%s6544_s2 + $0x68] sm:$0xff] }
  0xa5   : > { %v571_v50 = vsel %vm376_vm1, %v561_v47, 0  ;;  %v574_v51 = vsel %vm376_vm1, %v562_v48, 0  ;;  %624 = vmatpush.bf16.msra.mxu0 %v577_v49 }
  0xa6   : > { %586 = vmatpush.bf16.msrb.mxu2 %v571_v50  ;;  %605 = vmatpush.bf16.msrb.mxu3 %v574_v51 }
  0xa8   : > { %4242 = vmatmul.msk.bf16.gmra.mxu2 %vm369_vm2, %v4940_v46 }
  0xa9   : > { %4238 = vmatmul.msk.bf16.gmra.mxu0 %vm369_vm2, %v4940_v46  ;;  %4240 = vmatmul.msk.bf16.gmra.mxu1 %vm369_vm2, %v4940_v46 }
  0xaa   : > { %4271 = vmatmul.msk.bf16.vlgmr.msrb.gmra.mxu3 %vm369_vm2, %v4941_v52  ;;  %v666_v53 = vpop.permute.xlu1 %665 }
  0xab   : > { %v664_v55 = vpop.permute.xlu0 %663  ;;  %v673_v56 = vsel %vm671_vm5, %v666_v53, %v668_v54  ;;  %v994_v28 = vpop.permute.xlu2 %993 }
  0xac   : > { %v672_v57 = vsel %vm671_vm5, %v664_v55, %v666_v53  ;;  %v685_v58 = vsel %vm376_vm1, %v673_v56, 0 }
  0xad   : > { %v682_v59 = vsel %vm376_vm1, %v672_v57, 0  ;;  %716 = vmatpush.bf16.msra.mxu2 %v685_v58 }
  0xae   : > { %697 = vmatpush.bf16.msra.mxu1 %v682_v59 }
  0xb2   : > { %v877_v1 = vpop.permute.xlu1 %876 }
  0xb3   : > { %v670_v60 = vpop.permute.xlu0 %669  ;;  %v885_v4 = vsel %vm884_vm6, %v877_v1, %v879_v2  ;;  %v1103_v33 = vpop.permute.xlu2 %1102 }
  0xb4   : > { %v674_v61 = vsel %vm671_vm5, %v668_v54, %v670_v60  ;;  %v895_v7 = vsel %vm376_vm1, %v885_v4, 0  ;;  %v4951_v54 = vld [vmem:[%s6544_s2 + $0x70] sm:$0xff] }
  0xb5   : > { %v688_v62 = vsel %vm376_vm1, %v674_v61, 0 }
  0xb6   : > { %735 = vmatpush.bf16.msra.mxu3 %v688_v62 }
  0xb8   : > { %4269 = vmatmul.msk.bf16.vlgmr.msrb.gmra.mxu2 %vm369_vm2, %v4941_v52 }
  0xb9   : > { %4253 = vmatmul.msk.bf16.vlgmr.msrb.gmra.mxu0 %vm369_vm2, %v5214_v22  ;;  %4255 = vmatmul.msk.bf16.vlgmr.msrb.gmra.mxu1 %vm369_vm2, %v5214_v22 }
  0xba   : > { %4272 = vmatmul.msk.bf16.gmra.mxu3 %vm369_vm2, %v4942_v63  ;;  %834 = vmatpush.bf16.msrb.mxu2 %v787_v3  ;;  %v883_v12 = vpop.permute.xlu1 %882 }
  0xbb   : > { %796 = vmatpush.bf16.msrb.mxu0 %v781_v5  ;;  %815 = vmatpush.bf16.msrb.mxu1 %v784_v6  ;;  %v881_v10 = vpop.permute.xlu0 %880  ;;  %v1212_v57 = vpop.permute.xlu2 %1211 }
  0xbc   : > { %910 = vmatpush.bf16.msrb.mxu3 %v895_v7  ;;  %v886_v11 = vsel %vm884_vm6, %v879_v2, %v881_v10  ;;  %v887_v13 = vsel %vm884_vm6, %v881_v10, %v883_v12 }
  0xbd   : > { %v898_v14 = vsel %vm376_vm1, %v886_v11, 0  ;;  %v901_v15 = vsel %vm376_vm1, %v887_v13, 0 }
  0xc2   : > { %v992_v20 = vpop.permute.xlu1 %991 }
  0xc3   : > { %v990_v17 = vpop.permute.xlu0 %989  ;;  %v998_v30 = vsel %vm995_vm7, %v992_v20, %v994_v28 }
  0xc4   : > { %v996_v18 = vsel %vm995_vm7, %v988_v16, %v990_v17  ;;  %v997_v21 = vsel %vm995_vm7, %v990_v17, %v992_v20  ;;  %v1012_v31 = vsel %vm376_vm1, %v998_v30, 0  ;;  %v324_v20 = vld [vmem:[%s6548_s6] sm:$0xff] }
  0xc5   : > { %v1006_v19 = vsel %vm376_vm1, %v996_v18, 0  ;;  %v1009_v22 = vsel %vm376_vm1, %v997_v21, 0  ;;  %v5093_v21 = vmov 0  }
  0xc6   : > { %5064 = vset.pattern.permute.xlu1 %v5093_v21  ;;  %308 = vst [vmem:[#allocation2] sm:$0xf] %v5093_v21  ;;  %5063 = vset.pattern.permute.xlu0 %v5093_v21 }
  0xc7   : > { %309 = vst [vmem:[#allocation2 + $0x14] sm:$0xf] %v5093_v21  ;;  %1307 = vperm.xlu1 %5064, %v324_v20   ;;  %5062 = vset.pattern.permute.xlu2 %v5093_v21 }
  0xc8   : > { %4270 = vmatmul.msk.bf16.gmra.mxu2 %vm369_vm2, %v4942_v63  ;;  %310 = vst [vmem:[#allocation2 + $0x28] sm:$0xf] %v5093_v21 }
  0xc9   : > { %4254 = vmatmul.msk.bf16.gmra.mxu0 %vm369_vm2, %v5231_v25  ;;  %4256 = vmatmul.msk.bf16.gmra.mxu1 %vm369_vm2, %v5231_v25  ;;  %v4946_v25 = vld [vmem:[%s6544_s2 + $0x48] sm:$0xff]  ;;  %311 = vst [vmem:[#allocation2 + $0x3c] sm:$0xf] %v5093_v21 }
  0xca   : > { %4291 = vmatmul.msk.bf16.vlgmr.msra.gmra.mxu3 %vm369_vm2, %v4943_v0  ;;  %v1101_v32 = vpop.permute.xlu1 %1100  ;;  %312 = vst [vmem:[#allocation2 + $0x10] sm:$0xf] %v5093_v21 }
  0xcb   : > { %1040 = vmatpush.bf16.msra.mxu3 %v1009_v22  ;;  %v1099_v29 = vpop.permute.xlu0 %1098  ;;  %v1108_v36 = vsel %vm1106_vm8, %v1101_v32, %v1103_v33  ;;  %313 = vst [vmem:[#allocation2 + $0x24] sm:$0xf] %v5093_v21 }
  0xcc   : > { %v1107_v35 = vsel %vm1106_vm8, %v1099_v29, %v1101_v32  ;;  %v1120_v40 = vsel %vm376_vm1, %v1108_v36, 0  ;;  %314 = vst [vmem:[#allocation2 + $0x38] sm:$0xf] %v5093_v21 }
  0xcd   : > { %v1117_v39 = vsel %vm376_vm1, %v1107_v35, 0  ;;  %315 = vst [vmem:[#allocation2 + $0x4c] sm:$0xf] %v5093_v21  ;;  %v4953_v35 = vld [vmem:[%s6544_s2 + $0x80] sm:$0xff] }
  0xd2   : > { %v1210_v56 = vpop.permute.xlu1 %1209 }
  0xd3   : > { %v1105_v37 = vpop.permute.xlu0 %1104  ;;  %v1218_v58 = vsel %vm1217_vm9, %v1210_v56, %v1212_v57 }
  0xd4   : > { %v1109_v38 = vsel %vm1106_vm8, %v1103_v33, %v1105_v37  ;;  %v1228_v59 = vsel %vm376_vm1, %v1218_v58, 0 }
  0xd5   : > { %v1123_v41 = vsel %vm376_vm1, %v1109_v38, 0 }
  0xd8   : > { %4289 = vmatmul.msk.bf16.vlgmr.msra.gmra.mxu2 %vm369_vm2, %v4943_v0 }
  0xd9   : > { %4273 = vmatmul.msk.bf16.vlgmr.msra.gmra.mxu0 %vm369_vm2, %v4941_v52  ;;  %4287 = vmatmul.msk.bf16.vlgmr.msra.gmra.mxu1 %vm369_vm2, %v4943_v0 }
  0xda   : > { %4292 = vmatmul.msk.bf16.gmra.mxu3 %vm369_vm2, %v4944_v9  ;;  %929 = vmatpush.bf16.msra.mxu0 %v898_v14  ;;  %v1216_v0 = vpop.permute.xlu1 %1215 }
  0xdb   : > { %948 = vmatpush.bf16.msra.mxu1 %v901_v15  ;;  %1021 = vmatpush.bf16.msra.mxu2 %v1006_v19  ;;  %v1214_v1 = vpop.permute.xlu0 %1213 }
  0xdc   : > { %v1219_v2 = vsel %vm1217_vm9, %v1212_v57, %v1214_v1  ;;  %v1220_v3 = vsel %vm1217_vm9, %v1214_v1, %v1216_v0 }
  0xdd   : > { %v1231_v4 = vsel %vm376_vm1, %v1219_v2, 0  ;;  %v1234_v5 = vsel %vm376_vm1, %v1220_v3, 0 }
  0xe8   : > { %4290 = vmatmul.msk.bf16.gmra.mxu2 %vm369_vm2, %v4944_v9 }
  0xe9   : > { %4274 = vmatmul.msk.bf16.gmra.mxu0 %vm369_vm2, %v4942_v63  ;;  %4288 = vmatmul.msk.bf16.gmra.mxu1 %vm369_vm2, %v4944_v9 }
  0xea   : > { %4323 = vmatmul.msk.bf16.vlgmr.msrb.gmra.mxu3 %vm369_vm2, %v4947_v8 }
  0xeb   : > { %1170 = vmatpush.bf16.msrb.mxu3 %v1123_v41 }
  0xf8   : > { %4309 = vmatmul.msk.bf16.vlgmr.msrb.gmra.mxu2 %vm369_vm2, %v4945_v23 }
  0xf9   : > { %4305 = vmatmul.msk.bf16.vlgmr.msrb.gmra.mxu0 %vm369_vm2, %v4945_v23  ;;  %4307 = vmatmul.msk.bf16.vlgmr.msrb.gmra.mxu1 %vm369_vm2, %v4945_v23 }
  0xfa   : > { %4324 = vmatmul.msk.bf16.gmra.mxu3 %vm369_vm2, %v4948_v24  ;;  %1059 = vmatpush.bf16.msrb.mxu0 %v1012_v31 }
  0xfb   : > { %1132 = vmatpush.bf16.msrb.mxu1 %v1117_v39  ;;  %1151 = vmatpush.bf16.msrb.mxu2 %v1120_v40 }
 0x104   : > { %v489_v26 = vpop.f32.mrf.mxu3 }
 0x108   : > { %4310 = vmatmul.msk.bf16.gmra.mxu2 %vm369_vm2, %v4946_v25 }
 0x109   : > { %4306 = vmatmul.msk.bf16.gmra.mxu0 %vm369_vm2, %v4946_v25  ;;  %4308 = vmatmul.msk.bf16.gmra.mxu1 %vm369_vm2, %v4946_v25 }
 0x10a   : > { %4343 = vmatmul.msk.bf16.vlgmr.msra.gmra.mxu3 %vm369_vm2, %v5340_v27 }
 0x10c   : > { %v5349_v34 = vpop.f32.mrf.mxu3 }
 0x114   : > { %v494_v46 = vpop.f32.mrf.mxu3 }
 0x116   : > { %v395_v42 = vpop.f32.mrf.mxu0  ;;  %v414_v43 = vpop.f32.mrf.mxu1 }
 0x117   : > { %v490_v45 = vadd.f32 %v489_v26, %v395_v42 }
 0x118   : > { %4341 = vmatmul.msk.bf16.vlgmr.msra.gmra.mxu2 %vm369_vm2, %v5340_v27 }
 0x119   : > { %4325 = vmatmul.msk.bf16.vlgmr.msra.gmra.mxu0 %vm369_vm2, %v4947_v8  ;;  %4327 = vmatmul.msk.bf16.vlgmr.msra.gmra.mxu1 %vm369_vm2, %v4947_v8  ;;  %v4952_v8 = vld [vmem:[%s6544_s2 + $0x78] sm:$0xff] }
 0x11a   : > { %4344 = vmatmul.msk.bf16.gmra.mxu3 %vm369_vm2, %v5360_v44  ;;  %1243 = vmatpush.bf16.msra.mxu0 %v1228_v59 }
 0x11b   : > { %v433_v47 = vpop.f32.mrf.mxu2  ;;  %1262 = vmatpush.bf16.msra.mxu1 %v1231_v4  ;;  %1281 = vmatpush.bf16.msra.mxu2 %v1234_v5 }
 0x11c   : > { %v5374_v51 = vpop.f32.mrf.mxu3 }
 0x11e   : > { %v5368_v48 = vpop.f32.mrf.mxu0  ;;  %v5370_v49 = vpop.f32.mrf.mxu1 }
 0x123   : > { %v5372_v50 = vpop.f32.mrf.mxu2 }
 0x126   : > { %v400_v52 = vpop.f32.mrf.mxu0  ;;  %v419_v53 = vpop.f32.mrf.mxu1 }
 0x127   : > { %v5379_v55 = vadd.f32 %v494_v46, %v400_v52 }
 0x128   : > { %4342 = vmatmul.msk.bf16.gmra.mxu2 %vm369_vm2, %v5360_v44 }
 0x129   : > { %4326 = vmatmul.msk.bf16.gmra.mxu0 %vm369_vm2, %v4948_v24  ;;  %4328 = vmatmul.msk.bf16.gmra.mxu1 %vm369_vm2, %v4948_v24 }
 0x12a   : > { %4363 = vmatmul.msk.bf16.vlgmr.msrb.gmra.mxu3 %vm369_vm2, %v4951_v54 }
 0x12b   : > { %v438_v60 = vpop.f32.mrf.mxu2 }
 0x12d   : > { %v607_v61 = vpop.f32.mrf.mxu3 }
 0x12e   : > { %v5388_v62 = vpop.f32.mrf.mxu0  ;;  %v5390_v63 = vpop.f32.mrf.mxu1 }
 0x133   : > { %v5396_v6 = vpop.f32.mrf.mxu2 }
 0x135   : > { %v5398_v7 = vpop.f32.mrf.mxu3 }
 0x136   : > { %v508_v9 = vpop.f32.mrf.mxu0  ;;  %v527_v10 = vpop.f32.mrf.mxu1 }
 0x137   : > { %v509_v11 = vadd.f32 %v508_v9, %v414_v43  ;;  %v528_v12 = vadd.f32 %v527_v10, %v433_v47 }
 0x138   : > { %4361 = vmatmul.msk.bf16.vlgmr.msrb.gmra.mxu2 %vm369_vm2, %v4951_v54 }
 0x139   : > { %v637_v13 = vadd.f32 %v607_v61, %v509_v11  ;;  %4345 = vmatmul.msk.bf16.vlgmr.msrb.gmra.mxu0 %vm369_vm2, %v5340_v27  ;;  %4359 = vmatmul.msk.bf16.vlgmr.msrb.gmra.mxu1 %vm369_vm2, %v4951_v54  ;;  %v325_v54 = vld [vmem:[%s6548_s6 + $0x8] sm:$0xff] }
 0x13a   : > { %4364 = vmatmul.msk.bf16.gmra.mxu3 %vm369_vm2, %v4952_v8 }
 0x13b   : > { %v588_v14 = vpop.f32.mrf.mxu2 }
 0x13c   : > { %v636_v15 = vadd.f32 %v588_v14, %v490_v45  ;;  %v327_v45 = vld [vmem:[%s6548_s6 + $0x18] sm:$0xff] }
 0x13d   : > { %v612_v16 = vpop.f32.mrf.mxu3  ;;  %1322 = vperm.xlu0 %5063, %v327_v45  }
 0x13e   : > { %v5408_v17 = vpop.f32.mrf.mxu0  ;;  %v5410_v18 = vpop.f32.mrf.mxu1 }
 0x143   : > { %v5412_v19 = vpop.f32.mrf.mxu2 }
 0x145   : > { %v5417_v26 = vpop.f32.mrf.mxu3 }
 0x146   : > { %v513_v22 = vpop.f32.mrf.mxu0  ;;  %v532_v23 = vpop.f32.mrf.mxu1 }
 0x147   : > { %v514_v24 = vadd.f32 %v513_v22, %v419_v53  ;;  %v533_v25 = vadd.f32 %v532_v23, %v438_v60  ;;  %v4954_v53 = vld [vmem:[%s6544_s2 + $0x88] sm:$0xff] }
 0x148   : > { %4362 = vmatmul.msk.bf16.gmra.mxu2 %vm369_vm2, %v4952_v8 }
 0x149   : > { %v643_v27 = vadd.f32 %v612_v16, %v514_v24  ;;  %4346 = vmatmul.msk.bf16.gmra.mxu0 %vm369_vm2, %v5360_v44  ;;  %4360 = vmatmul.msk.bf16.gmra.mxu1 %vm369_vm2, %v4952_v8  ;;  %v326_v44 = vld [vmem:[%s6548_s6 + $0x10] sm:$0xff] }
 0x14a   : > { %1317 = vperm.xlu2 %5062, %v326_v44  }
 0x14b   : > { %v593_v28 = vpop.f32.mrf.mxu2 }
 0x14c   : > { %v642_v29 = vadd.f32 %v593_v28, %v5379_v55 }
 0x14d   : > { %v737_v32 = vpop.f32.mrf.mxu3 }
 0x14e   : > { %v5424_v30 = vpop.f32.mrf.mxu0  ;;  %v5426_v31 = vpop.f32.mrf.mxu1 }
 0x152   : > { %1312 = vperm.xlu2 %5062, %v325_v54  }
 0x153   : > { %v5428_v33 = vpop.f32.mrf.mxu2 }
 0x155   : > { %v5436_v42 = vpop.f32.mrf.mxu3 }
 0x156   : > { %v626_v36 = vpop.f32.mrf.mxu0  ;;  %v699_v37 = vpop.f32.mrf.mxu1 }
 0x157   : > { %v638_v38 = vadd.f32 %v626_v36, %v528_v12  ;;  %v747_v39 = vadd.f32 %v699_v37, %v636_v15 }
 0x158   : > { %4381 = vmatmul.msk.bf16.vlgmr.msra.gmra.mxu2 %vm369_vm2, %v4953_v35 }
 0x159   : > { %v749_v40 = vadd.f32 %v737_v32, %v638_v38  ;;  %4377 = vmatmul.msk.bf16.vlgmr.msra.gmra.mxu0 %vm369_vm2, %v4953_v35  ;;  %4379 = vmatmul.msk.bf16.vlgmr.msra.gmra.mxu1 %vm369_vm2, %v4953_v35 }
 0x15b   : > { %v718_v41 = vpop.f32.mrf.mxu2 }
 0x15c   : > { %v748_v43 = vadd.f32 %v718_v41, %v637_v13 }
 0x15d   : > { %v742_v55 = vpop.f32.mrf.mxu3 }
 0x15e   : > { %v5444_v46 = vpop.f32.mrf.mxu0  ;;  %v5446_v47 = vpop.f32.mrf.mxu1 }
 0x163   : > { %v5448_v52 = vpop.f32.mrf.mxu2 }
 0x165   : > { %v5465_v9 = vpop.f32.mrf.mxu3 }
 0x166   : > { %v631_v56 = vpop.f32.mrf.mxu0  ;;  %v704_v57 = vpop.f32.mrf.mxu1  ;;  %6555 = vst [vmem:[#allocation3_spill] sm:$0xff] %v5465_v9 }
 0x167   : > { %v644_v58 = vadd.f32 %v631_v56, %v533_v25  ;;  %v753_v59 = vadd.f32 %v704_v57, %v642_v29 }
 0x168   : > { %4382 = vmatmul.msk.bf16.gmra.mxu2 %vm369_vm2, %v4954_v53 }
 0x169   : > { %v755_v60 = vadd.f32 %v742_v55, %v644_v58  ;;  %4378 = vmatmul.msk.bf16.gmra.mxu0 %vm369_vm2, %v4954_v53  ;;  %4380 = vmatmul.msk.bf16.gmra.mxu1 %vm369_vm2, %v4954_v53 }
 0x16b   : > { %v723_v61 = vpop.f32.mrf.mxu2 }
 0x16c   : > { %v754_v0 = vadd.f32 %v723_v61, %v643_v27 }
 0x16d   : > { %v912_v15 = vpop.f32.mrf.mxu3 }
 0x16e   : > { %v5459_v1 = vpop.f32.mrf.mxu0  ;;  %v5461_v2 = vpop.f32.mrf.mxu1 }
 0x173   : > { %v5463_v3 = vpop.f32.mrf.mxu2 }
 0x175   : > { %v5477_v24 = vpop.f32.mrf.mxu3 }
 0x176   : > { %v798_v4 = vpop.f32.mrf.mxu0  ;;  %v817_v5 = vpop.f32.mrf.mxu1 }
 0x177   : > { %v846_v10 = vadd.f32 %v798_v4, %v747_v39  ;;  %v847_v8 = vadd.f32 %v817_v5, %v748_v43 }
 0x17b   : > { %v836_v11 = vpop.f32.mrf.mxu2 }
 0x17c   : > { %v5467_v12 = vadd.f32 %v836_v11, %v749_v40 }
 0x17d   : > { %v5487_v35 = vpop.f32.mrf.mxu3 }
 0x17e   : > { %v5469_v13 = vpop.f32.mrf.mxu0  ;;  %v819_v14 = vpop.f32.mrf.mxu1 }
 0x183   : > { %v5471_v16 = vpop.f32.mrf.mxu2 }
 0x185   : > { %v5491_v41 = vpop.f32.mrf.mxu3 }
 0x186   : > { %v803_v20 = vpop.f32.mrf.mxu0  ;;  %v822_v21 = vpop.f32.mrf.mxu1  ;;  %6558 = vst [vmem:[#allocation6_spill] sm:$0xff] %v5491_v41 }
 0x187   : > { %v5473_v22 = vadd.f32 %v803_v20, %v753_v59  ;;  %v5475_v23 = vadd.f32 %v822_v21, %v754_v0 }
 0x18b   : > { %v841_v25 = vpop.f32.mrf.mxu2 }
 0x18c   : > { %v5479_v27 = vadd.f32 %v841_v25, %v755_v60 }
 0x18d   : > { %v1042_v53 = vpop.f32.mrf.mxu3 }
 0x18e   : > { %6556 = vst [vmem:[#allocation4_spill] sm:$0xff] %v5479_v27  ;;  %v5481_v28 = vpop.f32.mrf.mxu0  ;;  %v5483_v29 = vpop.f32.mrf.mxu1 }
 0x193   : > { %v5485_v32 = vpop.f32.mrf.mxu2 }
 0x194   : > { %6557 = vst [vmem:[#allocation5_spill] sm:$0xff] %v5485_v32  ;;  %v4963_v32 = vld [vmem:[#allocation2 + $0x38] sm:$0xf0] }
 0x195   : > { %v1044_v57 = vpop.f32.mrf.mxu3 }
 0x196   : > { %v931_v36 = vpop.f32.mrf.mxu0  ;;  %v950_v37 = vpop.f32.mrf.mxu1 }
 0x19b   : > { %v1023_v38 = vpop.f32.mrf.mxu2 }
 0x19d   : > { %v5507_v0 = vpop.f32.mrf.mxu3 }
 0x19e   : > { %v933_v39 = vpop.f32.mrf.mxu0  ;;  %v5489_v40 = vpop.f32.mrf.mxu1 }
 0x1a3   : > { %v5493_v43 = vpop.f32.mrf.mxu2 }
 0x1a5   : > { %v5519_v25 = vpop.f32.mrf.mxu3 }
 0x1a6   : > { %v5495_v44 = vpop.f32.mrf.mxu0  ;;  %v5497_v45 = vpop.f32.mrf.mxu1  ;;  %6566 = vst [vmem:[#allocation14_spill] sm:$0xff] %v5519_v25 }
 0x1a7   : > { %6559 = vst [vmem:[#allocation7_spill] sm:$0xff] %v5497_v45  ;;  %v961_v45 = vadd.f32 %v931_v36, %v847_v8  ;;  %v5544_v8 = vpop.permute.xlu2 %1317  ;;  %v535_v36 = vadd.f32 %v5426_v31, %v5396_v6 }
 0x1ab   : > { %v5499_v54 = vpop.f32.mrf.mxu2 }
 0x1ac   : > { %6560 = vst [vmem:[#allocation8_spill] sm:$0xff] %v5499_v54 }
 0x1ae   : > { %v5501_v55 = vpop.f32.mrf.mxu0  ;;  %v5503_v56 = vpop.f32.mrf.mxu1 }
 0x1af   : > { %6561 = vst [vmem:[#allocation9_spill] sm:$0xff] %v5501_v55  ;;  %v492_v55 = vadd.f32 %v5349_v34, %v5368_v48  ;;  %v4401_v48 = vld [vmem:[#allocation2] sm:$0xf] }
 0x1b0   : > { %6562 = vst [vmem:[#allocation10_spill] sm:$0xff] %v5503_v56  ;;  %v4417_v56 = vld [vmem:[#allocation2 + $0x28] sm:$0xf] }
 0x1b1   : > { %v5525_v9 = vor.u32 %v4963_v32, %v4417_v56  ;;  %v960_v56 = vadd.f32 %v912_v15, %v846_v10  ;;  %v1308_v15 = vpop.permute.xlu1 %1307 }
 0x1b3   : > { %v5505_v58 = vpop.f32.mrf.mxu2  ;;  %6568 = vst [vmem:[#allocation16_spill] sm:$0xff] %v5525_v9  ;;  %1480 = vrot.lane.b32.xlu1 %v5525_v9, %s5085_s11  ;;  %v1071_v54 = vadd.f32 %v1023_v38, %v960_v56 }
 0x1b4   : > { %6563 = vst [vmem:[#allocation11_spill] sm:$0xff] %v5505_v58  ;;  %v511_v58 = vadd.f32 %v5408_v17, %v5370_v49  ;;  %v530_v49 = vadd.f32 %v5410_v18, %v5372_v50  ;;  %v639_v17 = vadd.f32 %v5412_v19, %v492_v55  ;;  %v516_v18 = vadd.f32 %v5424_v30, %v5390_v63 }
 0x1b6   : > { %v1061_v59 = vpop.f32.mrf.mxu0  ;;  %v1134_v60 = vpop.f32.mrf.mxu1  ;;  %v640_v25 = vadd.f32 %v5398_v7, %v511_v58  ;;  %v641_v9 = vadd.f32 %v5444_v46, %v530_v49  ;;  %v750_v34 = vadd.f32 %v5446_v47, %v639_v17  ;;  %v962_v46 = vadd.f32 %v950_v37, %v5467_v12 }
 0x1b7   : > { %v1182_v47 = vadd.f32 %v1134_v60, %v1071_v54  ;;  %v646_v37 = vadd.f32 %v5417_v26, %v516_v18 }
 0x1b8   : > { %v751_v32 = vadd.f32 %v5448_v52, %v640_v25  ;;  %v849_v19 = vadd.f32 %v5469_v13, %v750_v34  ;;  %v1073_v38 = vadd.f32 %v1061_v59, %v962_v46  ;;  %v752_v30 = vadd.f32 %v5436_v42, %v641_v9 }
 0x1b9   : > { %v757_v56 = vadd.f32 %v5463_v3, %v646_v37 }
 0x1ba   : > { %v850_v27 = vadd.f32 %v819_v14, %v751_v32  ;;  %v497_v14 = vadd.f32 %v5374_v51, %v5388_v62  ;;  %v5565_v51 = vadd.f32 %v5459_v1, %v535_v36  ;;  %v963_v62 = vadd.f32 %v5477_v24, %v849_v19  ;;  %v6573_v36 = vld [vmem:[#allocation4_spill] sm:$0xff] }
 0x1bb   : > { %v1153_v61 = vpop.f32.mrf.mxu2  ;;  %v851_v6 = vadd.f32 %v5471_v16, %v752_v30  ;;  %v856_v18 = vadd.f32 %v5483_v29, %v757_v56 }
 0x1bc   : > { %v964_v52 = vadd.f32 %v933_v39, %v850_v27  ;;  %v307_v27 = vld [vmem:[%s6543_s1] sm:$0x7]  ;;  %v645_v39 = vadd.f32 %v5428_v33, %v497_v14  ;;  %v1074_v9 = vadd.f32 %v5493_v43, %v963_v62 }
 0x1bd   : > { %v5570_v55 = vperm.slane %v307_v27, 0  ;;  %v5572_v58 = vperm.slane %v307_v27, 1  ;;  %v965_v16 = vadd.f32 %v5489_v40, %v851_v6 }
 0x1be   : > { %v5509_v4 = vpop.f32.mrf.mxu0  ;;  %v5511_v5 = vpop.f32.mrf.mxu1  ;;  %v1075_v31 = vadd.f32 %v1044_v57, %v964_v52  ;;  %v756_v24 = vadd.f32 %v5461_v2, %v645_v39  ;;  %v967_v57 = vadd.f32 %v5495_v44, %v5475_v23  ;;  %v5584_v23 = vperm.slane %v307_v27, 2 }
 0x1bf   : > { %v1076_v25 = vadd.f32 %v5509_v4, %v965_v16 }
 0x1c0   : > { %6571 = vst [vmem:[#allocation19_spill] sm:$0xff] %v5584_v23  ;;  %v855_v4 = vadd.f32 %v5481_v28, %v756_v24  ;;  %v1078_v52 = vadd.f32 %v5507_v0, %v967_v57  ;;  %v6580_v57 = vld [vmem:[#allocation6_spill] sm:$0xff] }
 0x1c3   : > { %v5513_v11 = vpop.f32.mrf.mxu2 }
 0x1c4   : > { %v1186_v43 = vadd.f32 %v5513_v11, %v1075_v31  ;;  %v966_v11 = vadd.f32 %v5487_v35, %v5473_v22 }
 0x1c6   : > { %v5515_v20 = vpop.f32.mrf.mxu0  ;;  %v5517_v21 = vpop.f32.mrf.mxu1 }
 0x1c7   : > { %6564 = vst [vmem:[#allocation12_spill] sm:$0xff] %v5515_v20 }
 0x1c8   : > { %6565 = vst [vmem:[#allocation13_spill] sm:$0xff] %v5517_v21 }
 0x1cb   : > { %v5523_v41 = vpop.f32.mrf.mxu2 }
 0x1cc   : > { %6567 = vst [vmem:[#allocation15_spill] sm:$0xff] %v5523_v41  ;;  %v1172_v41 = vpop.f32.mrf.mxu3 }
 0x1cd   : > { %v1184_v54 = vadd.f32 %v1172_v41, %v1073_v38  ;;  %v1185_v41 = vadd.f32 %v5511_v5, %v1074_v9  ;;  %v6574_v38 = vld [vmem:[#allocation7_spill] sm:$0xff] }
 0x1ce   : > { %v5531_v20 = vpop.f32.mrf.mxu0  ;;  %v5533_v21 = vpop.f32.mrf.mxu1  ;;  %v968_v28 = vadd.f32 %v6574_v38, %v6573_v36  ;;  %v6578_v6 = vld [vmem:[#allocation12_spill] sm:$0xff] }
 0x1cf   : > { %6569 = vst [vmem:[#allocation17_spill] sm:$0xff] %v5531_v20  ;;  %v4959_v20 = vld [vmem:[#allocation2 + $0x10] sm:$0xf0] }
 0x1d0   : > { %6570 = vst [vmem:[#allocation18_spill] sm:$0xff] %v5533_v21  ;;  %v1072_v21 = vadd.f32 %v1042_v53, %v961_v45  ;;  %v5546_v50 = vor.u32 %v4959_v20, %v4401_v48  ;;  %v1079_v31 = vadd.f32 %v6578_v6, %v968_v28 }
 0x1d2   : > { %v1183_v10 = vadd.f32 %v1153_v61, %v1072_v21  ;;  %1472 = vrot.lane.b32.xlu0 %v5546_v50, %s5085_s11  ;;  %v1313_v21 = vpop.permute.xlu2 %1312 }
 0x1d3   : > { %v5542_v7 = vpop.f32.mrf.mxu2  ;;  %v6577_v27 = vld [vmem:[#allocation15_spill] sm:$0xff] }
 0x1d4   : > { %v1174_v26 = vpop.f32.mrf.mxu3  ;;  %v1189_v37 = vadd.f32 %v6577_v27, %v1078_v52 }
 0x1d6   : > { %v1245_v45 = vpop.f32.mrf.mxu0  ;;  %v1264_v63 = vpop.f32.mrf.mxu1 }
 0x1d7   : > { %v1293_v13 = vadd.f32 %v1245_v45, %v1182_v47  ;;  %v1294_v12 = vadd.f32 %v1264_v63, %v1183_v10  ;;  %v6572_v47 = vld [vmem:[#allocation8_spill] sm:$0xff]  ;;  %v1187_v10 = vadd.f32 %v1174_v26, %v1076_v25  ;;  %v6575_v45 = vld [vmem:[#allocation9_spill] sm:$0xff] }
 0x1d8   : > { %v1077_v3 = vadd.f32 %v6572_v47, %v966_v11  ;;  %v970_v29 = vadd.f32 %v6575_v45, %v856_v18  ;;  %v6584_v11 = vld [vmem:[#allocation10_spill] sm:$0xff] }
 0x1d9   : > { %v1325_v53 = vadd.f32 %v1308_v15, %v1293_v13  ;;  %v1326_v42 = vadd.f32 %v1308_v15, %v1294_v12  ;;  %v6576_v13 = vld [vmem:[#allocation13_spill] sm:$0xff]  ;;  %v6585_v18 = vld [vmem:[#allocation18_spill] sm:$0xff] }
 0x1da   : > { %v1188_v0 = vadd.f32 %v6576_v13, %v1077_v3  ;;  %v1323_v3 = vpop.permute.xlu0 %1322 }
 0x1db   : > { %vm1337_vm10 = vcmp.gt.f32.partialorder %v1325_v53, 0.0  ;;  %vm1338_vm11 = vcmp.gt.f32.partialorder %v1326_v42, 0.0  ;;  %v1349_v33 = vmul.f32 0.1, %v1325_v53  ;;  %v1350_v1 = vmul.f32 0.1, %v1326_v42  ;;  %v1283_v59 = vpop.f32.mrf.mxu2 }
 0x1dc   : > { %v1295_v60 = vadd.f32 %v1283_v59, %v1184_v54  ;;  %v1177_v12 = vpop.f32.mrf.mxu3 }
 0x1dd   : > { %v1361_v61 = vsel %vm1337_vm10, %v1325_v53, %v1349_v33  ;;  %v1362_v20 = vsel %vm1338_vm11, %v1326_v42, %v1350_v1  ;;  %v6579_v33 = vld [vmem:[#allocation3_spill] sm:$0xff] }
 0x1de   : > { %v1380_v49 = vmul.f32 %v5570_v55, %v1361_v61  ;;  %v1381_v17 = vmul.f32 %v5572_v58, %v1362_v20  ;;  %v1327_v2 = vadd.f32 %v1308_v15, %v1295_v60  ;;  %v1247_v32 = vpop.f32.mrf.mxu0  ;;  %v1266_v40 = vpop.f32.mrf.mxu1  ;;  %v758_v1 = vadd.f32 %v6579_v33, %v5565_v51 }
 0x1df   : > { %v1296_v44 = vadd.f32 %v1247_v32, %v1185_v41  ;;  %v1297_v5 = vadd.f32 %v1266_v40, %v1186_v43  ;;  %v969_v60 = vadd.f32 %v6580_v57, %v855_v4  ;;  %v6581_v43 = vld [vmem:[#allocation5_spill] sm:$0xff]  ;;  %v1190_v32 = vadd.f32 %v1177_v12, %v1079_v31 }
 0x1e0   : > { %v1392_v34 = vpack.c.bf16 %v1381_v17, %v1380_v49  ;;  %vm1339_vm12 = vcmp.gt.f32.partialorder %v1327_v2, 0.0  ;;  %v1351_v48 = vmul.f32 0.1, %v1327_v2  ;;  %v857_v61 = vadd.f32 %v6581_v43, %v758_v1  ;;  %v6582_v49 = vld [vmem:[#allocation14_spill] sm:$0xff] }
 0x1e1   : > { %v1328_v19 = vadd.f32 %v1313_v21, %v1296_v44  ;;  %v1329_v46 = vadd.f32 %v1313_v21, %v1297_v5  ;;  %v1081_v17 = vadd.f32 %v6582_v49, %v970_v29 }
 0x1e2   : > { %1400 = vst [vmem:[#allocation2 + $0x4] sm:$0xff] %v1392_v34  ;;  %v1363_v15 = vsel %vm1339_vm12, %v1327_v2, %v1351_v48  ;;  %v6583_v2 = vld [vmem:[#allocation11_spill] sm:$0xff]  ;;  %v971_v34 = vadd.f32 %v6584_v11, %v857_v61 }
 0x1e3   : > { %v1382_v14 = vmul.f32 %v5584_v23, %v1363_v15  ;;  %vm1340_vm13 = vcmp.gt.f32.partialorder %v1328_v19, 0.0  ;;  %vm1341_vm14 = vcmp.gt.f32.partialorder %v1329_v46, 0.0  ;;  %v1352_v22 = vmul.f32 0.1, %v1328_v19  ;;  %v1285_v35 = vpop.f32.mrf.mxu2 }
 0x1e4   : > { %v1353_v63 = vmul.f32 0.1, %v1329_v46  ;;  %v1298_v30 = vadd.f32 %v1285_v35, %v1187_v10  ;;  %v1080_v51 = vadd.f32 %v6583_v2, %v969_v60  ;;  %v6586_v10 = vld [vmem:[#allocation17_spill] sm:$0xff]  ;;  %v1179_v28 = vpop.f32.mrf.mxu3 }
 0x1e5   : > { %v1393_v39 = vpack.c.bf16 %v1382_v14, %v1382_v14  ;;  %v1364_v62 = vsel %vm1340_vm13, %v1328_v19, %v1352_v22  ;;  %v1082_v15 = vadd.f32 %v6586_v10, %v971_v34 }
 0x1e6   : > { %v1365_v53 = vsel %vm1341_vm14, %v1329_v46, %v1353_v63  ;;  %v1383_v42 = vmul.f32 %v5570_v55, %v1364_v62  ;;  %v1330_v9 = vadd.f32 %v1313_v21, %v1298_v30  ;;  %v1250_v54 = vpop.f32.mrf.mxu0  ;;  %v1269_v26 = vpop.f32.mrf.mxu1  ;;  %v1191_v19 = vadd.f32 %v6585_v18, %v1080_v51 }
 0x1e7   : > { %1401 = vst [vmem:[#allocation2 + $0xc] sm:$0xf] %v1393_v39  ;;  %v1384_v59 = vmul.f32 %v5572_v58, %v1365_v53  ;;  %v1299_v24 = vadd.f32 %v1250_v54, %v1188_v0  ;;  %v1300_v16 = vadd.f32 %v1269_v26, %v1189_v37  ;;  %v1192_v46 = vadd.f32 %v5542_v7, %v1081_v17 }
 0x1e8   : > { %vm1342_vm15 = vcmp.gt.f32.partialorder %v1330_v9, 0.0  ;;  %v1354_v41 = vmul.f32 0.1, %v1330_v9  ;;  %v1193_v12 = vadd.f32 %v1179_v28, %v1082_v15  ;;  %vm1500_vm14 = vcmask 261120  }
 0x1e9   : > { %v1394_v20 = vpack.c.bf16 %v1384_v59, %v1383_v42  ;;  %v1331_v25 = vadd.f32 %v5544_v8, %v1299_v24  ;;  %v1332_v21 = vadd.f32 %v5544_v8, %v1300_v16  ;;  %v4957_v37 = vld [vmem:[#allocation2 + $0x4] sm:$0xf]  ;;  %v4409_v43 = vld [vmem:[#allocation2 + $0x8] sm:$0xf] }
 0x1ea   : > { %v1366_v40 = vsel %vm1342_vm15, %v1330_v9, %v1354_v41  ;;  %v4543_v15 = vld [vmem:[#allocation2 + $0x4] sm:$0xf] }
 0x1eb   : > { %1402 = vst [vmem:[#allocation2 + $0x18] sm:$0xff] %v1394_v20  ;;  %v1385_v56 = vmul.f32 %v5584_v23, %v1366_v40  ;;  %vm1343_vm1 = vcmp.gt.f32.partialorder %v1331_v25, 0.0  ;;  %v1355_v44 = vmul.f32 0.1, %v1331_v25  ;;  %vm1344_vm2 = vcmp.gt.f32.partialorder %v1332_v21, 0.0  ;;  %v1288_v5 = vpop.f32.mrf.mxu2 }
 0x1ec   : > { %v1356_v48 = vmul.f32 0.1, %v1332_v21  ;;  %v1301_v4 = vadd.f32 %v1288_v5, %v1190_v32  ;;  %v6587_v5 = vld [vmem:[#allocation16_spill] sm:$0xff] }
 0x1ed   : > { %v1395_v52 = vpack.c.bf16 %v1385_v56, %v1385_v56  ;;  %v1367_v47 = vsel %vm1343_vm1, %v1331_v25, %v1355_v44 }
 0x1ee   : > { %v1386_v14 = vmul.f32 %v5570_v55, %v1367_v47  ;;  %v1368_v22 = vsel %vm1344_vm2, %v1332_v21, %v1356_v48  ;;  %v1333_v35 = vadd.f32 %v5544_v8, %v1301_v4  ;;  %v1252_v36 = vpop.f32.mrf.mxu0  ;;  %v1271_v38 = vpop.f32.mrf.mxu1  ;;  %v4958_v11 = vld [vmem:[#allocation2 + $0xc] sm:$0xf] }
 0x1ef   : > { %1403 = vst [vmem:[#allocation2 + $0x20] sm:$0xf] %v1395_v52  ;;  %v1387_v45 = vmul.f32 %v5572_v58, %v1368_v22  ;;  %v1302_v29 = vadd.f32 %v1252_v36, %v1191_v19  ;;  %v1303_v63 = vadd.f32 %v1271_v38, %v1192_v46  ;;  %v4981_v19 = vld [vmem:[#allocation2 + $0x8] sm:$0xf]  ;;  %v4986_v36 = vld [vmem:[#allocation2 + $0x38] sm:$0xf] }
 0x1f0   : > { %vm1345_vm10 = vcmp.gt.f32.partialorder %v1333_v35, 0.0  ;;  %v1357_v7 = vmul.f32 0.1, %v1333_v35  ;;  %v4569_v38 = vld [vmem:[#allocation2 + $0x48] sm:$0xf0] }
 0x1f1   : > { %v1396_v30 = vpack.c.bf16 %v1387_v45, %v1386_v14  ;;  %v1334_v13 = vadd.f32 %v1323_v3, %v1302_v29  ;;  %v1335_v0 = vadd.f32 %v1323_v3, %v1303_v63  ;;  %v5685_v29 = vor.u32 %v4986_v36, %v4569_v38 }
 0x1f2   : > { %v1369_v27 = vsel %vm1345_vm10, %v1333_v35, %v1357_v7  ;;  %v4403_v39 = vld [vmem:[#allocation2 + $0x14] sm:$0xf0]  ;;  %v4960_v57 = vld [vmem:[#allocation2 + $0x18] sm:$0xf0]  ;;  %v4551_v35 = vld [vmem:[#allocation2 + $0xc] sm:$0xf] }
 0x1f3   : > { %1404 = vst [vmem:[#allocation2 + $0x2c] sm:$0xff] %v1396_v30  ;;  %v1388_v8 = vmul.f32 %v5584_v23, %v1369_v27  ;;  %vm1346_vm11 = vcmp.gt.f32.partialorder %v1334_v13, 0.0  ;;  %vm1347_vm12 = vcmp.gt.f32.partialorder %v1335_v0, 0.0  ;;  %v1358_v62 = vmul.f32 0.1, %v1334_v13  ;;  %v1290_v6 = vpop.f32.mrf.mxu2 }
 0x1f4   : > { %v1359_v31 = vmul.f32 0.1, %v1335_v0  ;;  %v1304_v53 = vadd.f32 %v1290_v6, %v1193_v12  ;;  %v5618_v42 = vor.u32 %v4957_v37, %v4403_v39  ;;  %v4410_v61 = vor.u32 %v4960_v57, %v4409_v43  ;;  %v4983_v10 = vld [vmem:[#allocation2 + $0x14] sm:$0xf0]  ;;  %v4553_v12 = vld [vmem:[#allocation2 + $0x20] sm:$0xf0] }
 0x1f5   : > { %v1397_v9 = vpack.c.bf16 %v1388_v8, %v1388_v8  ;;  %v1370_v54 = vsel %vm1346_vm11, %v1334_v13, %v1358_v62  ;;  %v5677_v14 = vor.u32 %v4983_v10, %v4543_v15 }
 0x1f6   : > { %v1371_v26 = vsel %vm1347_vm12, %v1335_v0, %v1359_v31  ;;  %v1389_v33 = vmul.f32 %v5570_v55, %v1370_v54  ;;  %v1336_v1 = vadd.f32 %v1323_v3, %v1304_v53  ;;  %1474 = vrot.lane.b32.xlu1 %v5618_v42, %s5085_s11  ;;  %v4411_v44 = vld [vmem:[#allocation2 + $0x1c] sm:$0xf0]  ;;  %v4982_v0 = vld [vmem:[#allocation2 + $0x10] sm:$0xf] }
 0x1f7   : > { %1405 = vst [vmem:[#allocation2 + $0x34] sm:$0xf] %v1397_v9  ;;  %v1390_v59 = vmul.f32 %v5572_v58, %v1371_v26  ;;  %v4414_v34 = vor.u32 %v4958_v11, %v4411_v44  ;;  %v4984_v22 = vld [vmem:[#allocation2 + $0x1c] sm:$0xf0]  ;;  %v5693_v37 = vor.u32 %v4982_v0, %v4553_v12  ;;  %v4965_v53 = vld [vmem:[%s6545_s3 + $0x10] sm:$0xff] }
 0x1f8   : > { %vm1348_vm13 = vcmp.gt.f32.partialorder %v1336_v1, 0.0  ;;  %v1360_v24 = vmul.f32 0.1, %v1336_v1  ;;  %v5681_v28 = vor.u32 %v4984_v22, %v4551_v35  ;;  %v4386_v35 = vld [vmem:[%s6548_s6 + $0x38] sm:$0xff]  ;;  %v4973_v12 = vld [vmem:[#allocation2 + $0x8] sm:$0xf] }
 0x1f9   : > { %v1398_v16 = vpack.c.bf16 %v1390_v59, %v1389_v33  ;;  %v4966_v59 = vld [vmem:[%s6545_s3 + $0x18] sm:$0xff] }
 0x1fa   : > { %v1372_v60 = vsel %vm1348_vm13, %v1336_v1, %v1360_v24  ;;  %v4961_v25 = vld [vmem:[#allocation2 + $0x2c] sm:$0xf]  ;;  %v4425_v40 = vld [vmem:[#allocation2 + $0x30] sm:$0xf] }
 0x1fb   : > { %1406 = vst [vmem:[#allocation2 + $0x40] sm:$0xff] %v1398_v16  ;;  %v1391_v41 = vmul.f32 %v5584_v23, %v1372_v60  ;;  %v4985_v4 = vld [vmem:[#allocation2 + $0x30] sm:$0xf]  ;;  %v4559_v47 = vld [vmem:[#allocation2 + $0x2c] sm:$0xf] }
 0x1fc   : > { %v4976_v38 = vld [vmem:[#allocation2 + $0x30] sm:$0xf]  ;;  %v4513_v0 = vld [vmem:[#allocation2 + $0x2c] sm:$0xf] }
 0x1fd   : > { %v1399_v20 = vpack.c.bf16 %v1391_v41, %v1391_v41 }
 0x1fe   : > { %1476 = vrot.lane.b32.xlu1 %v4410_v61, %s5085_s11  ;;  %v4962_v17 = vld [vmem:[#allocation2 + $0x34] sm:$0xf] }
 0x1ff   : > { %1407 = vst [vmem:[#allocation2 + $0x48] sm:$0xf] %v1399_v20  ;;  %v4567_v13 = vld [vmem:[#allocation2 + $0x34] sm:$0xf] }
 0x202   : > { %v4419_v21 = vld [vmem:[#allocation2 + $0x3c] sm:$0xf0]  ;;  %v4964_v32 = vld [vmem:[#allocation2 + $0x40] sm:$0xf0] }
 0x203   : > { %v4422_v49 = vor.u32 %v4961_v25, %v4419_v21  ;;  %v4426_v56 = vor.u32 %v4964_v32, %v4425_v40  ;;  %v4561_v48 = vld [vmem:[#allocation2 + $0x40] sm:$0xf0]  ;;  %v4987_v52 = vld [vmem:[#allocation2 + $0x3c] sm:$0xf0] }
 0x204   : > { %v5658_v18 = vor.u32 %v4985_v4, %v4561_v48  ;;  %v5670_v3 = vor.u32 %v4987_v52, %v4559_v47  ;;  %v4956_v48 = vld [vmem:[%s6545_s3 + $0x8] sm:$0xff]  ;;  %v4383_v4 = vld [vmem:[%s6548_s6 + $0x20] sm:$0xff] }
 0x205   : > { %1482 = vrot.lane.b32.xlu2 %v4422_v49, %s5085_s11  ;;  %v4967_v47 = vld [vmem:[%s6545_s3 + $0x20] sm:$0xff] }
 0x206   : > { %1584 = vrot.lane.b32.xlu1 %v4422_v49, %s5086_s12  ;;  %v4427_v2 = vld [vmem:[#allocation2 + $0x44] sm:$0xf0] }
 0x207   : > { %v4430_v51 = vor.u32 %v4962_v17, %v4427_v2  ;;  %v4988_v30 = vld [vmem:[#allocation2 + $0x44] sm:$0xf0]  ;;  %v4955_v17 = vld [vmem:[%s6545_s3] sm:$0xff] }
 0x208   : > { %v4568_v27 = vor.u32 %v4988_v30, %v4567_v13  ;;  %v4503_v30 = vld [vmem:[#allocation2 + $0x18] sm:$0xf0] }
 0x209   : > { %1486 = vrot.lane.b32.xlu0 %v4430_v51, %s5085_s11 }
 0x20d   : > { %1484 = vrot.lane.b32.xlu2 %v4426_v56, %s5085_s11 }
 0x20e   : > { %1576 = vrot.lane.b32.xlu1 %v5618_v42, %s5086_s12 }
 0x211   : > { %1582 = vrot.lane.b32.xlu0 %v6587_v5, %s5086_s12 }
 0x215   : > { %1478 = vrot.lane.b32.xlu2 %v4414_v34, %s5085_s11 }
 0x216   : > { %1688 = vrot.lane.b32.xlu1 %v6587_v5, %s5087_s13 }
 0x219   : > { %1574 = vrot.lane.b32.xlu0 %v5546_v50, %s5086_s12 }
 0x21d   : > { %1586 = vrot.lane.b32.xlu2 %v4426_v56, %s5086_s12 }
 0x21e   : > { %1680 = vrot.lane.b32.xlu1 %v5546_v50, %s5087_s13 }
 0x221   : > { %1588 = vrot.lane.b32.xlu0 %v4430_v51, %s5086_s12 }
 0x225   : > { %1578 = vrot.lane.b32.xlu2 %v4410_v61, %s5086_s12  ;;  %v1481_v45 = vpop.permute.xlu1 %1480 }
 0x226   : > { %1694 = vrot.lane.b32.xlu1 %v4430_v51, %s5087_s13 }
 0x229   : > { %1580 = vrot.lane.b32.xlu0 %v4414_v34, %s5086_s12 }
 0x22d   : > { %1690 = vrot.lane.b32.xlu2 %v4422_v49, %s5087_s13 }
 0x22e   : > { %1806 = vrot.lane.b32.xlu1 %v6587_v5, %s5088_s14 }
 0x231   : > { %1692 = vrot.lane.b32.xlu0 %v4426_v56, %s5087_s13 }
 0x235   : > { %1682 = vrot.lane.b32.xlu2 %v5618_v42, %s5087_s13 }
 0x236   : > { %1798 = vrot.lane.b32.xlu1 %v5546_v50, %s5088_s14  ;;  %v4545_v50 = vld [vmem:[#allocation2 + $0x18] sm:$0xf0] }
 0x237   : > { %v5664_v46 = vor.u32 %v4981_v19, %v4545_v50 }
 0x239   : > { %1686 = vrot.lane.b32.xlu0 %v4414_v34, %s5087_s13 }
 0x23d   : > { %1684 = vrot.lane.b32.xlu2 %v4410_v61, %s5087_s13 }
 0x23e   : > { %1812 = vrot.lane.b32.xlu1 %v4430_v51, %s5088_s14 }
 0x241   : > { %1810 = vrot.lane.b32.xlu0 %v4426_v56, %s5088_s14 }
 0x244   : > { %v1473_v39 = vpop.permute.xlu0 %1472 }
 0x245   : > { %1808 = vrot.lane.b32.xlu2 %v4422_v49, %s5088_s14 }
 0x246   : > { %2096 = vrot.lane.b32.xlu1 %v5658_v18, %s5089_s15 }
 0x249   : > { %1802 = vrot.lane.b32.xlu0 %v4410_v61, %s5088_s14 }
 0x24d   : > { %1800 = vrot.lane.b32.xlu2 %v5618_v42, %s5088_s14 }
 0x24e   : > { %2088 = vrot.lane.b32.xlu1 %v5664_v46, %s5089_s15 }
 0x251   : > { %2094 = vrot.lane.b32.xlu0 %v5670_v3, %s5089_s15 }
 0x255   : > { %1804 = vrot.lane.b32.xlu2 %v4414_v34, %s5088_s14 }
 0x256   : > { %2212 = vrot.lane.b32.xlu1 %v5670_v3, %s5090_s16 }
 0x259   : > { %2086 = vrot.lane.b32.xlu0 %v5677_v14, %s5089_s15 }
 0x25d   : > { %2090 = vrot.lane.b32.xlu2 %v5681_v28, %s5089_s15 }
 0x25e   : > { %2204 = vrot.lane.b32.xlu1 %v5677_v14, %s5090_s16 }
 0x25f   : > { %v1483_v63 = vpop.permute.xlu2 %1482 }
 0x260   : > { %v1491_v7 = vsel %vm365_vm3, %v1481_v45, %v1483_v63 }
 0x261   : > { %1513 = vmatpush.bf16.msra.mxu3 %v1491_v7  ;;  %2100 = vrot.lane.b32.xlu0 %v5685_v29, %s5089_s15  ;;  %v4385_v7 = vld [vmem:[%s6548_s6 + $0x30] sm:$0xff] }
 0x265   : > { %2098 = vrot.lane.b32.xlu2 %v4568_v27, %s5089_s15 }
 0x266   : > { %2218 = vrot.lane.b32.xlu1 %v5685_v29, %s5090_s16 }
 0x267   : > { %v1485_v8 = vpop.permute.xlu2 %1484 }
 0x268   : > { %v1475_v62 = vpop.permute.xlu1 %1474  ;;  %v1492_v6 = vsel %vm365_vm3, %v1483_v63, %v1485_v8  ;;  %v4977_v63 = vld [vmem:[#allocation2 + $0x3c] sm:$0xf0] }
 0x269   : > { %v1488_v31 = vsel %vm365_vm3, %v1473_v39, %v1475_v62  ;;  %1532 = vmatpush.bf16.msrb.mxu0 %v1492_v6  ;;  %2092 = vrot.lane.b32.xlu0 %v5693_v37, %s5089_s15  ;;  %v4506_v39 = vor.u32 %v4973_v12, %v4503_v30  ;;  %v4501_v6 = vld [vmem:[#allocation2 + $0x4] sm:$0xf] }
 0x26a   : > { %1514 = vmatpush.bf16.msra.mxu3 %v1488_v31 }
 0x26d   : > { %4431 = vmatmul.msk.bf16.vlgmr.msra.gmra.mxu3 %vm1500_vm14, %v4965_v53  ;;  %2214 = vrot.lane.b32.xlu2 %v5658_v18, %s5090_s16 }
 0x26e   : > { %2330 = vrot.lane.b32.xlu1 %v5670_v3, %s5091_s17 }
 0x26f   : > { %v1479_v42 = vpop.permute.xlu2 %1478 }
 0x270   : > { %v1477_v9 = vpop.permute.xlu1 %1476 }
 0x271   : > { %v1489_v54 = vsel %vm365_vm3, %v1475_v62, %v1477_v9  ;;  %2210 = vrot.lane.b32.xlu0 %v5693_v37, %s5090_s16  ;;  %v1490_v43 = vsel %vm365_vm3, %v1477_v9, %v1479_v42  ;;  %v4968_v42 = vld [vmem:[%s6545_s3 + $0x28] sm:$0xff] }
 0x272   : > { %1533 = vmatpush.bf16.msrb.mxu0 %v1489_v54  ;;  %v4384_v9 = vld [vmem:[%s6548_s6 + $0x28] sm:$0xff] }
 0x275   : > { %2206 = vrot.lane.b32.xlu2 %v5664_v46, %s5090_s16  ;;  %4433 = vmatmul.msk.bf16.vlgmr.msrb.gmra.mxu0 %vm1500_vm14, %v4965_v53 }
 0x276   : > { %2322 = vrot.lane.b32.xlu1 %v5677_v14, %s5091_s17 }
 0x277   : > { %v1587_v26 = vpop.permute.xlu2 %1586 }
 0x278   : > { %v1585_v33 = vpop.permute.xlu1 %1584 }
 0x279   : > { %v1594_v1 = vsel %vm461_vm0, %v1585_v33, %v1587_v26  ;;  %2216 = vrot.lane.b32.xlu0 %v4568_v27, %s5090_s16 }
 0x27a   : > { %1633 = vmatpush.bf16.msrb.mxu3 %v1594_v1 }
 0x27b   : > { %v1487_v24 = vpop.permute.xlu0 %1486 }
 0x27c   : > { %v1493_v16 = vsel %vm365_vm3, %v1485_v8, %v1487_v24  ;;  %v4974_v8 = vld [vmem:[#allocation2 + $0x14] sm:$0xf0]  ;;  %v4978_v24 = vld [vmem:[#allocation2 + $0x44] sm:$0xf0] }
 0x27d   : > { %4432 = vmatmul.msk.bf16.gmra.mxu3 %vm1500_vm14, %v4966_v59  ;;  %2208 = vrot.lane.b32.xlu2 %v5681_v28, %s5090_s16 }
 0x27e   : > { %2336 = vrot.lane.b32.xlu1 %v5685_v29, %s5091_s17  ;;  %1551 = vmatpush.bf16.msrb.mxu1 %v1493_v16 }
 0x27f   : > { %v1579_v57 = vpop.permute.xlu2 %1578 }
 0x280   : > { %v1577_v60 = vpop.permute.xlu1 %1576 }
 0x281   : > { %v1591_v41 = vsel %vm461_vm0, %v1577_v60, %v1579_v57  ;;  %2334 = vrot.lane.b32.xlu0 %v4568_v27, %s5091_s17 }
 0x282   : > { %1634 = vmatpush.bf16.msrb.mxu3 %v1591_v41  ;;  %1552 = vmatpush.bf16.msrb.mxu1 %v1490_v43 }
 0x283   : > { %v1583_v61 = vpop.permute.xlu0 %1582 }
 0x284   : > { %v1593_v20 = vsel %vm461_vm0, %v1583_v61, %v1585_v33  ;;  %v4975_v61 = vld [vmem:[#allocation2 + $0x1c] sm:$0xf0] }
 0x285   : > { %2332 = vrot.lane.b32.xlu2 %v5658_v18, %s5091_s17  ;;  %4435 = vmatmul.msk.bf16.vlgmr.msrb.gmra.mxu1 %vm1500_vm14, %v4965_v53  ;;  %v4502_v53 = vor.u32 %v4974_v8, %v4501_v6 }
 0x286   : > { %2328 = vrot.lane.b32.xlu1 %v5693_v37, %s5091_s17  ;;  %1614 = vmatpush.bf16.msrb.mxu2 %v1593_v20  ;;  %v4969_v20 = vld [vmem:[%s6545_s3 + $0x30] sm:$0xff] }
 0x287   : > { %v1691_v25 = vpop.permute.xlu2 %1690  ;;  %4434 = vmatmul.msk.bf16.gmra.mxu0 %vm1500_vm14, %v4966_v59 }
 0x288   : > { %v1689_v21 = vpop.permute.xlu1 %1688 }
 0x289   : > { %v1699_v49 = vsel %vm560_vm4, %v1689_v21, %v1691_v25  ;;  %2326 = vrot.lane.b32.xlu0 %v5681_v28, %s5091_s17  ;;  %v4509_v21 = vld [vmem:[#allocation2 + $0xc] sm:$0xf] }
 0x28a   : > { %1720 = vmatpush.bf16.msra.mxu1 %v1699_v49 }
 0x28b   : > { %v1575_v2 = vpop.permute.xlu0 %1574 }
 0x28c   : > { %v1590_v51 = vsel %vm461_vm0, %v1575_v2, %v1577_v60  ;;  %v4510_v2 = vor.u32 %v4975_v61, %v4509_v21 }
 0x28d   : > { %4447 = vmatmul.msk.bf16.vlgmr.msrb.gmra.mxu3 %vm1500_vm14, %v4955_v17  ;;  %2324 = vrot.lane.b32.xlu2 %v5664_v46, %s5091_s17 }
 0x28e   : > { %2452 = vrot.lane.b32.xlu1 %v4568_v27, %s5092_s20  ;;  %1615 = vmatpush.bf16.msrb.mxu2 %v1590_v51 }
 0x28f   : > { %v1683_v32 = vpop.permute.xlu2 %1682 }
 0x290   : > { %v1681_v40 = vpop.permute.xlu1 %1680 }
 0x291   : > { %v1696_v56 = vsel %vm560_vm4, %v1681_v40, %v1683_v32  ;;  %4445 = vmatmul.msk.bf16.vlgmr.msrb.gmra.mxu2 %vm1500_vm14, %v4955_v17  ;;  %2450 = vrot.lane.b32.xlu0 %v5658_v18, %s5092_s20 }
 0x292   : > { %1721 = vmatpush.bf16.msra.mxu1 %v1696_v56 }
 0x293   : > { %v1589_v44 = vpop.permute.xlu0 %1588 }
 0x294   : > { %v1595_v5 = vsel %vm461_vm0, %v1587_v26, %v1589_v44 }
 0x295   : > { %2448 = vrot.lane.b32.xlu2 %v5670_v3, %s5092_s20  ;;  %4436 = vmatmul.msk.bf16.gmra.mxu1 %vm1500_vm14, %v4966_v59 }
 0x296   : > { %2446 = vrot.lane.b32.xlu1 %v5693_v37, %s5092_s20  ;;  %1652 = vmatpush.bf16.msra.mxu0 %v1595_v5  ;;  %v4514_v37 = vor.u32 %v4977_v63, %v4513_v0 }
 0x297   : > { %v1685_v11 = vpop.permute.xlu2 %1684 }
 0x298   : > { %v1695_v34 = vpop.permute.xlu1 %1694 }
 0x299   : > { %2442 = vrot.lane.b32.xlu0 %v5664_v46, %s5092_s20 }
 0x29b   : > { %v1581_v18 = vpop.permute.xlu0 %1580 }
 0x29c   : > { %v1592_v50 = vsel %vm461_vm0, %v1579_v57, %v1581_v18  ;;  %v4521_v57 = vld [vmem:[#allocation2 + $0x34] sm:$0xf] }
 0x29d   : > { %4448 = vmatmul.msk.bf16.gmra.mxu3 %vm1500_vm14, %v4956_v48  ;;  %2440 = vrot.lane.b32.xlu2 %v5677_v14, %s5092_s20  ;;  %v4515_v14 = vld [vmem:[#allocation2 + $0x40] sm:$0xf0]  ;;  %v4522_v43 = vor.u32 %v4978_v24, %v4521_v57 }
 0x29e   : > { %2545 = vperm.xlu1 %5064, %v4383_v4   ;;  %1653 = vmatpush.bf16.msra.mxu0 %v1592_v50  ;;  %v4518_v45 = vor.u32 %v4976_v38, %v4515_v14  ;;  %v4970_v4 = vld [vmem:[%s6545_s3 + $0x38] sm:$0xff]  ;;  %v4972_v14 = vld [vmem:[%s6545_s3 + $0x48] sm:$0xff]  ;;  %v4989_v57 = vld [vmem:[%s6545_s3 + $0x60] sm:$0xff] }
 0x29f   : > { %v1809_v19 = vpop.permute.xlu2 %1808 }
 0x2a0   : > { %v1807_v46 = vpop.permute.xlu1 %1806 }
 0x2a1   : > { %v1817_v52 = vsel %vm671_vm5, %v1807_v46, %v1809_v19  ;;  %4446 = vmatmul.msk.bf16.gmra.mxu2 %vm1500_vm14, %v4956_v48  ;;  %4449 = vmatmul.msk.bf16.vlgmr.msra.gmra.mxu0 %vm1500_vm14, %v4955_v17 }
 0x2a2   : > { %1838 = vmatpush.bf16.msrb.mxu0 %v1817_v52  ;;  %2444 = vrot.lane.b32.xlu0 %v5681_v28, %s5092_s20 }
 0x2a3   : > { %v1693_v3 = vpop.permute.xlu0 %1692 }
 0x2a4   : > { %v1700_v10 = vsel %vm560_vm4, %v1691_v25, %v1693_v3  ;;  %v1701_v15 = vsel %vm560_vm4, %v1693_v3, %v1695_v34 }
 0x2a5   : > { %2454 = vrot.lane.b32.xlu2 %v5685_v29, %s5092_s20  ;;  %4463 = vmatmul.msk.bf16.vlgmr.msra.gmra.mxu1 %vm1500_vm14, %v4967_v47  ;;  %v1697_v29 = vsel %vm560_vm4, %v1683_v32, %v1685_v11 }
 0x2a6   : > { %1739 = vmatpush.bf16.msra.mxu2 %v1700_v10  ;;  %1758 = vmatpush.bf16.msra.mxu3 %v1701_v15 }
 0x2a7   : > { %v1801_v22 = vpop.permute.xlu2 %1800 }
 0x2a8   : > { %v1799_v36 = vpop.permute.xlu1 %1798 }
 0x2a9   : > { %v1814_v28 = vsel %vm671_vm5, %v1799_v36, %v1801_v22 }
 0x2aa   : > { %1839 = vmatpush.bf16.msrb.mxu0 %v1814_v28  ;;  %2560 = vperm.xlu0 %5063, %v4386_v35  }
 0x2ab   : > { %1740 = vmatpush.bf16.msra.mxu2 %v1697_v29  ;;  %v1687_v13 = vpop.permute.xlu0 %1686 }
 0x2ac   : > { %v1698_v27 = vsel %vm560_vm4, %v1685_v11, %v1687_v13  ;;  %v4979_v13 = vld [vmem:[%s6545_s3 + $0x50] sm:$0xff] }
 0x2ad   : > { %2555 = vperm.xlu2 %5062, %v4385_v7   ;;  %1759 = vmatpush.bf16.msra.mxu3 %v1698_v27 }
 0x2ae   : > { %1987 = vmatpush.bf16.msra.mxu0 %v4518_v45 }
 0x2af   : > { %v1805_v62 = vpop.permute.xlu2 %1804 }
 0x2b0   : > { %v1813_v31 = vpop.permute.xlu1 %1812  ;;  %4467 = vmatmul.msk.bf16.vlgmr.msra.gmra.mxu3 %vm1500_vm14, %v4967_v47 }
 0x2b1   : > { %1968 = vmatpush.bf16.msrb.mxu3 %v4514_v37  ;;  %4450 = vmatmul.msk.bf16.gmra.mxu0 %vm1500_vm14, %v4956_v48  ;;  %v4971_v48 = vld [vmem:[%s6545_s3 + $0x40] sm:$0xff] }
 0x2b2   : > { %1988 = vmatpush.bf16.msra.mxu0 %v4506_v39  ;;  %4465 = vmatmul.msk.bf16.vlgmr.msra.gmra.mxu2 %vm1500_vm14, %v4967_v47 }
 0x2b3   : > { %v1811_v54 = vpop.permute.xlu0 %1810 }
 0x2b4   : > { %v1818_v26 = vsel %vm671_vm5, %v1809_v19, %v1811_v54  ;;  %v1819_v33 = vsel %vm671_vm5, %v1811_v54, %v1813_v31 }
 0x2b5   : > { %1969 = vmatpush.bf16.msrb.mxu3 %v4502_v53  ;;  %2550 = vperm.xlu2 %5062, %v4384_v9  }
 0x2b6   : > { %4464 = vmatmul.msk.bf16.gmra.mxu1 %vm1500_vm14, %v4968_v42  ;;  %1876 = vmatpush.bf16.msrb.mxu2 %v1819_v33 }
 0x2b7   : > { %1857 = vmatpush.bf16.msrb.mxu1 %v1818_v26  ;;  %v2091_v1 = vpop.permute.xlu2 %2090 }
 0x2b8   : > { %v2097_v59 = vpop.permute.xlu1 %2096 }
 0x2bb   : > { %v1803_v16 = vpop.permute.xlu0 %1802 }
 0x2bc   : > { %v1815_v60 = vsel %vm671_vm5, %v1801_v22, %v1803_v16  ;;  %v1816_v41 = vsel %vm671_vm5, %v1803_v16, %v1805_v62 }
 0x2bd   : > { %1858 = vmatpush.bf16.msrb.mxu1 %v1815_v60  ;;  %1877 = vmatpush.bf16.msrb.mxu2 %v1816_v41 }
 0x2bf   : > { %v2099_v25 = vpop.permute.xlu2 %2098 }
 0x2c0   : > { %v2089_v49 = vpop.permute.xlu1 %2088  ;;  %v2106_v17 = vsel %vm884_vm6, %v2097_v59, %v2099_v25  ;;  %4468 = vmatmul.msk.bf16.gmra.mxu3 %vm1500_vm14, %v4968_v42 }
 0x2c1   : > { %2006 = vmatpush.bf16.msra.mxu1 %v4522_v43  ;;  %2145 = vmatpush.bf16.msra.mxu3 %v2106_v17  ;;  %v2103_v32 = vsel %vm884_vm6, %v2089_v49, %v2091_v1 }
 0x2c2   : > { %4466 = vmatmul.msk.bf16.gmra.mxu2 %vm1500_vm14, %v4968_v42  ;;  %4481 = vmatmul.msk.bf16.vlgmr.msrb.gmra.mxu0 %vm1500_vm14, %v4969_v20 }
 0x2c3   : > { %v2095_v51 = vpop.permute.xlu0 %2094 }
 0x2c4   : > { %v2105_v40 = vsel %vm884_vm6, %v2095_v51, %v2097_v59 }
 0x2c5   : > { %2007 = vmatpush.bf16.msra.mxu1 %v4510_v2  ;;  %2146 = vmatpush.bf16.msra.mxu3 %v2103_v32 }
 0x2c6   : > { %4483 = vmatmul.msk.bf16.vlgmr.msrb.gmra.mxu1 %vm1500_vm14, %v4969_v20  ;;  %2126 = vmatpush.bf16.msra.mxu2 %v2105_v40 }
 0x2c7   : > { %v2215_v56 = vpop.permute.xlu2 %2214 }
 0x2c8   : > { %v2213_v44 = vpop.permute.xlu1 %2212 }
 0x2c9   : > { %v2223_v5 = vsel %vm995_vm7, %v2213_v44, %v2215_v56 }
 0x2ca   : > { %2244 = vmatpush.bf16.msrb.mxu1 %v2223_v5 }
 0x2cb   : > { %v2087_v11 = vpop.permute.xlu0 %2086 }
 0x2cc   : > { %v2102_v34 = vsel %vm884_vm6, %v2087_v11, %v2089_v49 }
 0x2cd   : > { %2127 = vmatpush.bf16.msra.mxu2 %v2102_v34 }
 0x2cf   : > { %v2207_v18 = vpop.permute.xlu2 %2206 }
 0x2d0   : > { %v2205_v50 = vpop.permute.xlu1 %2204  ;;  %4523 = vmatmul.msk.bf16.vlgmr.msrb.gmra.mxu3 %vm1500_vm14, %v4971_v48 }
 0x2d1   : > { %v2220_v19 = vsel %vm995_vm7, %v2205_v50, %v2207_v18 }
 0x2d2   : > { %4485 = vmatmul.msk.bf16.vlgmr.msrb.gmra.mxu2 %vm1500_vm14, %v4969_v20  ;;  %2245 = vmatpush.bf16.msrb.mxu1 %v2220_v19 }
 0x2d3   : > { %4482 = vmatmul.msk.bf16.gmra.mxu0 %vm1500_vm14, %v4970_v4  ;;  %v2101_v46 = vpop.permute.xlu0 %2100 }
 0x2d4   : > { %v2107_v52 = vsel %vm884_vm6, %v2099_v25, %v2101_v46 }
 0x2d5   : > { %2164 = vmatpush.bf16.msrb.mxu0 %v2107_v52 }
 0x2d6   : > { %4484 = vmatmul.msk.bf16.gmra.mxu1 %vm1500_vm14, %v4970_v4 }
 0x2d7   : > { %v2209_v47 = vpop.permute.xlu2 %2208 }
 0x2d8   : > { %v2219_v3 = vpop.permute.xlu1 %2218  ;;  %v2221_v39 = vsel %vm995_vm7, %v2207_v18, %v2209_v47 }
 0x2db   : > { %v2093_v10 = vpop.permute.xlu0 %2092 }
 0x2dc   : > { %v2104_v15 = vsel %vm884_vm6, %v2091_v1, %v2093_v10  ;;  %v4980_v1 = vld [vmem:[%s6545_s3 + $0x58] sm:$0xff] }
 0x2dd   : > { %2165 = vmatpush.bf16.msrb.mxu0 %v2104_v15 }
 0x2df   : > { %v2333_v22 = vpop.permute.xlu2 %2332 }
 0x2e0   : > { %v2331_v35 = vpop.permute.xlu1 %2330  ;;  %4524 = vmatmul.msk.bf16.gmra.mxu3 %vm1500_vm14, %v4972_v14 }
 0x2e1   : > { %v2341_v36 = vsel %vm1106_vm8, %v2331_v35, %v2333_v22 }
 0x2e2   : > { %4486 = vmatmul.msk.bf16.gmra.mxu2 %vm1500_vm14, %v4970_v4 }
 0x2e3   : > { %4525 = vmatmul.msk.bf16.vlgmr.msra.gmra.mxu0 %vm1500_vm14, %v4971_v48  ;;  %v2211_v38 = vpop.permute.xlu0 %2210 }
 0x2e4   : > { %2362 = vmatpush.bf16.msra.mxu0 %v2341_v36  ;;  %v2222_v37 = vsel %vm995_vm7, %v2209_v47, %v2211_v38 }
 0x2e6   : > { %4527 = vmatmul.msk.bf16.vlgmr.msra.gmra.mxu1 %vm1500_vm14, %v4971_v48 }
 0x2e7   : > { %v2325_v28 = vpop.permute.xlu2 %2324 }
 0x2e8   : > { %v2323_v45 = vpop.permute.xlu1 %2322 }
 0x2e9   : > { %v2338_v63 = vsel %vm1106_vm8, %v2323_v45, %v2325_v28 }
 0x2ea   : > { %2363 = vmatpush.bf16.msra.mxu0 %v2338_v63 }
 0x2eb   : > { %v2217_v29 = vpop.permute.xlu0 %2216 }
 0x2ec   : > { %v2224_v7 = vsel %vm995_vm7, %v2215_v56, %v2217_v29  ;;  %v2225_v30 = vsel %vm995_vm7, %v2217_v29, %v2219_v3  ;;  %v4990_v56 = vld [vmem:[%s6545_s3 + $0x68] sm:$0xff]  ;;  %v4991_v3 = vld [vmem:[%s6545_s3 + $0x70] sm:$0xff] }
 0x2ed   : > { %2263 = vmatpush.bf16.msrb.mxu2 %v2224_v7  ;;  %2282 = vmatpush.bf16.msrb.mxu3 %v2225_v30  ;;  %v4993_v7 = vld [vmem:[%s6545_s3 + $0x80] sm:$0xff] }
 0x2ef   : > { %v2449_v0 = vpop.permute.xlu2 %2448 }
 0x2f0   : > { %v2337_v12 = vpop.permute.xlu1 %2336  ;;  %v1516_v27 = vpop.f32.mrf.mxu3  ;;  %4575 = vmatmul.msk.bf16.vlgmr.msra.gmra.mxu3 %vm1500_vm14, %v4979_v13 }
 0x2f1   : > { %2283 = vmatpush.bf16.msrb.mxu3 %v2222_v37  ;;  %2264 = vmatpush.bf16.msrb.mxu2 %v2221_v39 }
 0x2f2   : > { %4573 = vmatmul.msk.bf16.vlgmr.msra.gmra.mxu2 %vm1500_vm14, %v4979_v13  ;;  %v1535_v53 = vpop.f32.mrf.mxu0 }
 0x2f3   : > { %4526 = vmatmul.msk.bf16.gmra.mxu0 %vm1500_vm14, %v4972_v14  ;;  %v2335_v8 = vpop.permute.xlu0 %2334 }
 0x2f4   : > { %v2342_v62 = vsel %vm1106_vm8, %v2333_v22, %v2335_v8  ;;  %v2343_v6 = vsel %vm1106_vm8, %v2335_v8, %v2337_v12 }
 0x2f5   : > { %2400 = vmatpush.bf16.msra.mxu2 %v2343_v6  ;;  %2381 = vmatpush.bf16.msra.mxu1 %v2342_v62 }
 0x2f6   : > { %4528 = vmatmul.msk.bf16.gmra.mxu1 %vm1500_vm14, %v4972_v14 }
 0x2f7   : > { %v2441_v31 = vpop.permute.xlu2 %2440 }
 0x2f8   : > { %v2329_v42 = vpop.permute.xlu1 %2328  ;;  %v5854_v9 = vpop.f32.mrf.mxu3 }
 0x2fa   : > { %v5863_v16 = vpop.f32.mrf.mxu0 }
 0x2fb   : > { %v2327_v54 = vpop.permute.xlu0 %2326 }
 0x2fc   : > { %v2339_v26 = vsel %vm1106_vm8, %v2325_v28, %v2327_v54  ;;  %v2340_v33 = vsel %vm1106_vm8, %v2327_v54, %v2329_v42  ;;  %v4994_v54 = vld [vmem:[%s6545_s3 + $0x88] sm:$0xff] }
 0x2fd   : > { %2382 = vmatpush.bf16.msra.mxu1 %v2339_v26  ;;  %2401 = vmatpush.bf16.msra.mxu2 %v2340_v33 }
 0x2ff   : > { %v2455_v24 = vpop.permute.xlu2 %2454 }
 0x300   : > { %v1521_v59 = vpop.f32.mrf.mxu3  ;;  %4576 = vmatmul.msk.bf16.gmra.mxu3 %vm1500_vm14, %v4980_v1  ;;  %v2453_v60 = vpop.permute.xlu1 %2452 }
 0x301   : > { %v2461_v25 = vsel %vm1217_vm9, %v2453_v60, %v2455_v24 }
 0x302   : > { %4574 = vmatmul.msk.bf16.gmra.mxu2 %vm1500_vm14, %v4980_v1  ;;  %v1554_v41 = vpop.f32.mrf.mxu1 }
 0x303   : > { %4577 = vmatmul.msk.bf16.vlgmr.msrb.gmra.mxu0 %vm1500_vm14, %v4979_v13  ;;  %v2451_v43 = vpop.permute.xlu0 %2450  ;;  %v4992_v13 = vld [vmem:[%s6545_s3 + $0x78] sm:$0xff] }
 0x304   : > { %v2459_v61 = vsel %vm1217_vm9, %v2449_v0, %v2451_v43  ;;  %v2460_v20 = vsel %vm1217_vm9, %v2451_v43, %v2453_v60  ;;  %v1540_v2 = vpop.f32.mrf.mxu0 }
 0x305   : > { %2480 = vmatpush.bf16.msra.mxu3 %v2459_v61  ;;  %2499 = vmatpush.bf16.msrb.mxu0 %v2460_v20 }
 0x306   : > { %4591 = vmatmul.msk.bf16.vlgmr.msrb.gmra.mxu1 %vm1500_vm14, %v4989_v57 }
 0x307   : > { %2518 = vmatpush.bf16.msrb.mxu1 %v2461_v25 }
 0x308   : > { %v5873_v21 = vpop.f32.mrf.mxu3  ;;  %v2447_v5 = vpop.permute.xlu1 %2446 }
 0x30a   : > { %v5875_v49 = vpop.f32.mrf.mxu1 }
 0x30b   : > { %v2443_v17 = vpop.permute.xlu0 %2442 }
 0x30c   : > { %v2456_v51 = vsel %vm1217_vm9, %v2441_v31, %v2443_v17  ;;  %v5887_v50 = vpop.f32.mrf.mxu0 }
 0x30d   : > { %2481 = vmatpush.bf16.msra.mxu3 %v2456_v51 }
 0x310   : > { %v1636_v32 = vpop.f32.mrf.mxu3  ;;  %4595 = vmatmul.msk.bf16.vlgmr.msrb.gmra.mxu3 %vm1500_vm14, %v4989_v57 }
 0x311   : > { %v1637_v40 = vadd.f32 %v1636_v32, %v1535_v53 }
 0x312   : > { %4593 = vmatmul.msk.bf16.vlgmr.msrb.gmra.mxu2 %vm1500_vm14, %v4989_v57  ;;  %v1559_v44 = vpop.f32.mrf.mxu1 }
 0x313   : > { %4578 = vmatmul.msk.bf16.gmra.mxu0 %vm1500_vm14, %v4980_v1 }
 0x314   : > { %v1617_v11 = vpop.f32.mrf.mxu2  ;;  %v2445_v34 = vpop.permute.xlu0 %2444 }
 0x315   : > { %v1618_v48 = vadd.f32 %v1617_v11, %v1516_v27  ;;  %v2457_v4 = vsel %vm1217_vm9, %v2443_v17, %v2445_v34  ;;  %v2458_v18 = vsel %vm1217_vm9, %v2445_v34, %v2447_v5 }
 0x316   : > { %4592 = vmatmul.msk.bf16.gmra.mxu1 %vm1500_vm14, %v4990_v56  ;;  %2500 = vmatpush.bf16.msrb.mxu0 %v2457_v4 }
 0x317   : > { %2519 = vmatpush.bf16.msrb.mxu1 %v2458_v18 }
 0x318   : > { %v5889_v19 = vpop.f32.mrf.mxu3 }
 0x31a   : > { %v5891_v46 = vpop.f32.mrf.mxu1 }
 0x31c   : > { %v5893_v52 = vpop.f32.mrf.mxu2 }
 0x31e   : > { %v1655_v47 = vpop.f32.mrf.mxu0 }
 0x31f   : > { %v1656_v10 = vadd.f32 %v1655_v47, %v1554_v41 }
 0x320   : > { %v1641_v15 = vpop.f32.mrf.mxu3  ;;  %4596 = vmatmul.msk.bf16.gmra.mxu3 %vm1500_vm14, %v4990_v56 }
 0x321   : > { %v1642_v14 = vadd.f32 %v1641_v15, %v1540_v2 }
 0x322   : > { %4594 = vmatmul.msk.bf16.gmra.mxu2 %vm1500_vm14, %v4990_v56  ;;  %v1723_v22 = vpop.f32.mrf.mxu1 }
 0x323   : > { %4609 = vmatmul.msk.bf16.vlgmr.msra.gmra.mxu0 %vm1500_vm14, %v4991_v3  ;;  %v1771_v35 = vadd.f32 %v1723_v22, %v1618_v48 }
 0x324   : > { %v1622_v36 = vpop.f32.mrf.mxu2 }
 0x325   : > { %v1623_v38 = vadd.f32 %v1622_v36, %v1521_v59 }
 0x326   : > { %4611 = vmatmul.msk.bf16.vlgmr.msra.gmra.mxu1 %vm1500_vm14, %v4991_v3  ;;  %v5902_v28 = vpop.f32.mrf.mxu0 }
 0x328   : > { %v5906_v63 = vpop.f32.mrf.mxu3 }
 0x32a   : > { %v5904_v45 = vpop.f32.mrf.mxu1 }
 0x32c   : > { %v5908_v29 = vpop.f32.mrf.mxu2 }
 0x32e   : > { %v1660_v30 = vpop.f32.mrf.mxu0 }
 0x32f   : > { %v1661_v0 = vadd.f32 %v1660_v30, %v1559_v44 }
 0x330   : > { %4627 = vmatmul.msk.bf16.vlgmr.msra.gmra.mxu3 %vm1500_vm14, %v4993_v7 }
 0x332   : > { %4613 = vmatmul.msk.bf16.vlgmr.msra.gmra.mxu2 %vm1500_vm14, %v4991_v3 }
 0x333   : > { %4610 = vmatmul.msk.bf16.gmra.mxu0 %vm1500_vm14, %v4992_v13  ;;  %v1728_v12 = vpop.f32.mrf.mxu1  ;;  %v1761_v37 = vpop.f32.mrf.mxu3 }
 0x334   : > { %v1777_v27 = vadd.f32 %v1728_v12, %v1623_v38  ;;  %v1773_v8 = vadd.f32 %v1761_v37, %v1656_v10 }
 0x335   : > { %v1742_v39 = vpop.f32.mrf.mxu2 }
 0x336   : > { %v1772_v62 = vadd.f32 %v1742_v39, %v1637_v40  ;;  %4612 = vmatmul.msk.bf16.gmra.mxu1 %vm1500_vm14, %v4992_v13  ;;  %v5920_v6 = vpop.f32.mrf.mxu0 }
 0x33b   : > { %v5922_v31 = vpop.f32.mrf.mxu1  ;;  %v5924_v53 = vpop.f32.mrf.mxu3 }
 0x33d   : > { %v5926_v42 = vpop.f32.mrf.mxu2 }
 0x33f   : > { %v1841_v26 = vpop.f32.mrf.mxu0 }
 0x340   : > { %v1889_v33 = vadd.f32 %v1841_v26, %v1771_v35  ;;  %4628 = vmatmul.msk.bf16.gmra.mxu3 %vm1500_vm14, %v4994_v54 }
 0x342   : > { %4614 = vmatmul.msk.bf16.gmra.mxu2 %vm1500_vm14, %v4992_v13 }
 0x343   : > { %4629 = vmatmul.msk.bf16.vlgmr.msrb.gmra.mxu0 %vm1500_vm14, %v4993_v7  ;;  %v1860_v1 = vpop.f32.mrf.mxu1  ;;  %v1766_v24 = vpop.f32.mrf.mxu3 }
 0x344   : > { %v1890_v59 = vadd.f32 %v1860_v1, %v1772_v62  ;;  %v1779_v60 = vadd.f32 %v1766_v24, %v1661_v0 }
 0x345   : > { %v1747_v57 = vpop.f32.mrf.mxu2 }
 0x346   : > { %v1778_v41 = vadd.f32 %v1747_v57, %v1642_v14  ;;  %4631 = vmatmul.msk.bf16.vlgmr.msrb.gmra.mxu1 %vm1500_vm14, %v4993_v7 }
 0x347   : > { %v5935_v43 = vpop.f32.mrf.mxu0 }
 0x34b   : > { %v5937_v61 = vpop.f32.mrf.mxu1  ;;  %v5939_v20 = vpop.f32.mrf.mxu3 }
 0x34c   : > { %6588 = vst [vmem:[#allocation8_spill] sm:$0xff] %v5939_v20 }
 0x34d   : > { %v5941_v25 = vpop.f32.mrf.mxu2 }
 0x350   : > { %v1846_v17 = vpop.f32.mrf.mxu0 }
 0x351   : > { %v1895_v2 = vadd.f32 %v1846_v17, %v1777_v27 }
 0x353   : > { %4630 = vmatmul.msk.bf16.gmra.mxu0 %vm1500_vm14, %v4994_v54  ;;  %v1865_v51 = vpop.f32.mrf.mxu1  ;;  %v1971_v40 = vpop.f32.mrf.mxu3 }
 0x354   : > { %v1896_v32 = vadd.f32 %v1865_v51, %v1778_v41  ;;  %v2019_v44 = vadd.f32 %v1971_v40, %v1889_v33 }
 0x355   : > { %v1879_v56 = vpop.f32.mrf.mxu2 }
 0x356   : > { %v1891_v5 = vadd.f32 %v1879_v56, %v1773_v8  ;;  %4632 = vmatmul.msk.bf16.gmra.mxu1 %vm1500_vm14, %v4994_v54 }
 0x358   : > { %v5945_v11 = vpop.f32.mrf.mxu0 }
 0x35b   : > { %v5947_v34 = vpop.f32.mrf.mxu1  ;;  %v1973_v48 = vpop.f32.mrf.mxu3 }
 0x35c   : > { %6589 = vst [vmem:[#allocation4_spill] sm:$0xff] %v5947_v34 }
 0x35d   : > { %v5949_v4 = vpop.f32.mrf.mxu2 }
 0x360   : > { %v1990_v18 = vpop.f32.mrf.mxu0 }
 0x361   : > { %v5951_v47 = vadd.f32 %v1990_v18, %v1890_v59 }
 0x363   : > { %v2009_v3 = vpop.f32.mrf.mxu1  ;;  %v1976_v15 = vpop.f32.mrf.mxu3 }
 0x364   : > { %v5953_v10 = vadd.f32 %v2009_v3, %v1891_v5  ;;  %v5955_v22 = vadd.f32 %v1976_v15, %v1895_v2 }
 0x365   : > { %v1884_v14 = vpop.f32.mrf.mxu2 }
 0x366   : > { %v1897_v35 = vadd.f32 %v1884_v14, %v1779_v60 }
 0x368   : > { %v5957_v36 = vpop.f32.mrf.mxu0 }
 0x36b   : > { %v5959_v38 = vpop.f32.mrf.mxu1  ;;  %v5961_v7 = vpop.f32.mrf.mxu3 }
 0x36d   : > { %v5963_v30 = vpop.f32.mrf.mxu2 }
 0x36e   : > { %6590 = vst [vmem:[#allocation7_spill] sm:$0xff] %v5963_v30  ;;  %v1620_v30 = vadd.f32 %v5893_v52, %v5854_v9  ;;  %v1639_v9 = vadd.f32 %v5889_v19, %v5863_v16  ;;  %v2546_v52 = vpop.permute.xlu1 %2545  ;;  %v1644_v16 = vadd.f32 %v5906_v63, %v5887_v50 }
 0x370   : > { %v1995_v13 = vpop.f32.mrf.mxu0  ;;  %v1774_v23 = vadd.f32 %v5904_v45, %v1620_v30  ;;  %v1658_v45 = vadd.f32 %v5902_v28, %v5875_v49  ;;  %v1625_v28 = vadd.f32 %v5908_v29, %v5873_v21 }
 0x371   : > { %v5965_v0 = vadd.f32 %v1995_v13, %v1896_v32 }
 0x372   : > { %v1780_v50 = vadd.f32 %v5922_v31, %v1625_v28 }
 0x373   : > { %6591 = vst [vmem:[#allocation9_spill] sm:$0xff] %v5965_v0  ;;  %v2014_v12 = vpop.f32.mrf.mxu1  ;;  %v2148_v37 = vpop.f32.mrf.mxu3 }
 0x374   : > { %v5967_v27 = vadd.f32 %v2014_v12, %v1897_v35  ;;  %v1898_v31 = vadd.f32 %v5945_v11, %v1780_v50 }
 0x375   : > { %v2129_v39 = vpop.f32.mrf.mxu2 }
 0x376   : > { %6592 = vst [vmem:[#allocation13_spill] sm:$0xff] %v5967_v27 }
 0x378   : > { %v5969_v8 = vpop.f32.mrf.mxu0 }
 0x379   : > { %6593 = vst [vmem:[#allocation15_spill] sm:$0xff] %v5969_v8 }
 0x37b   : > { %v5971_v62 = vpop.f32.mrf.mxu1  ;;  %v5973_v54 = vpop.f32.mrf.mxu3 }
 0x37c   : > { %6594 = vst [vmem:[#allocation12_spill] sm:$0xff] %v5971_v62 }
 0x37d   : > { %v2131_v26 = vpop.f32.mrf.mxu2 }
 0x380   : > { %v2167_v33 = vpop.f32.mrf.mxu0 }
 0x381   : > { %v2179_v49 = vadd.f32 %v2167_v33, %v5953_v10 }
 0x383   : > { %v2247_v1 = vpop.f32.mrf.mxu1  ;;  %v5975_v59 = vpop.f32.mrf.mxu3 }
 0x384   : > { %6595 = vst [vmem:[#allocation3_spill] sm:$0xff] %v5975_v59 }
 0x385   : > { %v5977_v24 = vpop.f32.mrf.mxu2 }
 0x386   : > { %v2183_v63 = vadd.f32 %v5977_v24, %v5955_v22 }
 0x388   : > { %v5979_v57 = vpop.f32.mrf.mxu0 }
 0x38b   : > { %v2249_v60 = vpop.f32.mrf.mxu1  ;;  %v5981_v41 = vpop.f32.mrf.mxu3  ;;  %v6609_v28 = vld [vmem:[#allocation3_spill] sm:$0xff] }
 0x38c   : > { %6596 = vst [vmem:[#allocation6_spill] sm:$0xff] %v5981_v41 }
 0x38d   : > { %v5983_v17 = vpop.f32.mrf.mxu2 }
 0x38e   : > { %6597 = vst [vmem:[#allocation5_spill] sm:$0xff] %v5983_v17  ;;  %v6015_v17 = vpop.permute.xlu2 %2555 }
 0x390   : > { %v5985_v2 = vpop.f32.mrf.mxu0 }
 0x391   : > { %6598 = vst [vmem:[#allocation14_spill] sm:$0xff] %v5985_v2 }
 0x393   : > { %v5987_v51 = vpop.f32.mrf.mxu1  ;;  %v2285_v32 = vpop.f32.mrf.mxu3 }
 0x394   : > { %v2301_v33 = vadd.f32 %v5987_v51, %v2183_v63  ;;  %v2028_v51 = vadd.f32 %v5961_v7, %v1898_v31  ;;  %v6605_v7 = vld [vmem:[#allocation8_spill] sm:$0xff] }
 0x395   : > { %v2266_v40 = vpop.f32.mrf.mxu2 }
 0x396   : > { %v6041_v29 = vpop.permute.xlu2 %2550 }
 0x398   : > { %v5989_v56 = vpop.f32.mrf.mxu0 }
 0x399   : > { %6599 = vst [vmem:[#allocation11_spill] sm:$0xff] %v5989_v56 }
 0x39b   : > { %v5991_v5 = vpop.f32.mrf.mxu1  ;;  %v5993_v18 = vpop.f32.mrf.mxu3 }
 0x39c   : > { %6600 = vst [vmem:[#allocation10_spill] sm:$0xff] %v5991_v5  ;;  %v2177_v5 = vadd.f32 %v2129_v39, %v2019_v44  ;;  %v2178_v44 = vadd.f32 %v2148_v37, %v5951_v47  ;;  %v1776_v39 = vadd.f32 %v5924_v53, %v1658_v45  ;;  %v4655_v37 = vld [vmem:[#allocation2] sm:$0xf] }
 0x39d   : > { %v5995_v3 = vpop.f32.mrf.mxu2 }
 0x3a0   : > { %v2365_v15 = vpop.f32.mrf.mxu0 }
 0x3a3   : > { %v2384_v14 = vpop.f32.mrf.mxu1  ;;  %v5997_v35 = vpop.f32.mrf.mxu3 }
 0x3a4   : > { %6601 = vst [vmem:[#allocation18_spill] sm:$0xff] %v5997_v35  ;;  %v2295_v35 = vadd.f32 %v2247_v1, %v2177_v5  ;;  %v2297_v1 = vadd.f32 %v2285_v32, %v2179_v49  ;;  %v6608_v49 = vld [vmem:[#allocation9_spill] sm:$0xff] }
 0x3a5   : > { %v5999_v13 = vpop.f32.mrf.mxu2 }
 0x3a6   : > { %6602 = vst [vmem:[#allocation17_spill] sm:$0xff] %v5999_v13  ;;  %v1892_v13 = vadd.f32 %v5935_v43, %v1774_v23  ;;  %v2413_v59 = vadd.f32 %v2365_v15, %v2295_v35  ;;  %v1775_v43 = vadd.f32 %v5926_v42, %v1639_v9 }
 0x3a8   : > { %v2367_v12 = vpop.f32.mrf.mxu0  ;;  %v2022_v0 = vadd.f32 %v1973_v48, %v1892_v13  ;;  %v1893_v19 = vadd.f32 %v5937_v61, %v1775_v43  ;;  %v1663_v61 = vadd.f32 %v5920_v6, %v5891_v46 }
 0x3aa   : > { %v2180_v34 = vadd.f32 %v2131_v26, %v2022_v0  ;;  %v2296_v0 = vadd.f32 %v2266_v40, %v2178_v44  ;;  %v2023_v53 = vadd.f32 %v5957_v36, %v1893_v19  ;;  %v4671_v44 = vld [vmem:[#allocation2 + $0x28] sm:$0xf] }
 0x3ab   : > { %v6001_v41 = vpop.f32.mrf.mxu1  ;;  %v6003_v62 = vpop.f32.mrf.mxu3 }
 0x3ac   : > { %6603 = vst [vmem:[#allocation16_spill] sm:$0xff] %v6003_v62  ;;  %v2298_v30 = vadd.f32 %v2249_v60, %v2180_v34  ;;  %v1894_v34 = vadd.f32 %v5949_v4, %v1776_v39  ;;  %v2414_v47 = vadd.f32 %v2384_v14, %v2296_v0  ;;  %v2181_v10 = vadd.f32 %v5973_v54, %v2023_v53 }
 0x3ad   : > { %v6005_v8 = vpop.f32.mrf.mxu2  ;;  %v1781_v54 = vadd.f32 %v5941_v25, %v1644_v16 }
 0x3ae   : > { %6604 = vst [vmem:[#allocation20_spill] sm:$0xff] %v6005_v8  ;;  %v2416_v26 = vadd.f32 %v2367_v12, %v2298_v30  ;;  %v2024_v4 = vadd.f32 %v5959_v38, %v1894_v34  ;;  %v2299_v46 = vadd.f32 %v5995_v3, %v2181_v10  ;;  %v5003_v30 = vld [vmem:[#allocation2 + $0x38] sm:$0xf0]  ;;  %v2184_v34 = vadd.f32 %v6609_v28, %v6608_v49 }
 0x3b0   : > { %v6007_v56 = vpop.f32.mrf.mxu0  ;;  %v2182_v15 = vadd.f32 %v5979_v57, %v2024_v4  ;;  %v2417_v13 = vadd.f32 %v6001_v41, %v2299_v46  ;;  %v6614_v4 = vld [vmem:[#allocation17_spill] sm:$0xff]  ;;  %v6617_v46 = vld [vmem:[#allocation18_spill] sm:$0xff] }
 0x3b1   : > { %v2419_v14 = vadd.f32 %v6007_v56, %v2301_v33  ;;  %v2302_v10 = vadd.f32 %v6614_v4, %v2184_v34 }
 0x3b2   : > { %v2300_v35 = vadd.f32 %v5993_v18, %v2182_v15  ;;  %v6606_v18 = vld [vmem:[#allocation4_spill] sm:$0xff] }
 0x3b3   : > { %v6012_v2 = vpop.f32.mrf.mxu1  ;;  %v2483_v27 = vpop.f32.mrf.mxu3  ;;  %v1899_v39 = vadd.f32 %v6606_v18, %v1781_v54  ;;  %v6622_v28 = vld [vmem:[#allocation16_spill] sm:$0xff] }
 0x3b4   : > { %v2531_v62 = vadd.f32 %v2483_v27, %v2413_v59 }
 0x3b5   : > { %v2403_v20 = vpop.f32.mrf.mxu2 }
 0x3b6   : > { %v2563_v48 = vadd.f32 %v2546_v52, %v2531_v62  ;;  %v4999_v62 = vld [vmem:[#allocation2 + $0x10] sm:$0xf0]  ;;  %v2415_v36 = vadd.f32 %v2403_v20, %v2297_v1 }
 0x3b7   : > { %v6036_v40 = vor.u32 %v4999_v62, %v4655_v37  ;;  %v6612_v62 = vld [vmem:[#allocation19_spill] sm:$0xff] }
 0x3b8   : > { %v6017_v8 = vpop.f32.mrf.mxu0  ;;  %v2587_v59 = vmul.f32 0.1, %v2563_v48  ;;  %vm2575_vm15 = vcmp.gt.f32.partialorder %v2563_v48, 0.0 }
 0x3b9   : > { %2704 = vrot.lane.b32.xlu1 %v6036_v40, %s5085_s11 }
 0x3ba   : > { %v2599_v6 = vsel %vm2575_vm15, %v2563_v48, %v2587_v59  ;;  %v6062_v48 = vor.u32 %v5003_v30, %v4671_v44 }
 0x3bb   : > { %v6024_v23 = vpop.f32.mrf.mxu1  ;;  %v2485_v27 = vpop.f32.mrf.mxu3  ;;  %v2611_v57 = vmul.f32 %v2599_v6, %v5570_v55 }
 0x3bc   : > { %v2534_v42 = vadd.f32 %v2485_v27, %v2416_v26  ;;  %v1782_v27 = vadd.f32 %v6605_v7, %v1663_v61  ;;  %2712 = vrot.lane.b32.xlu0 %v6062_v48, %s5085_s11  ;;  %v2561_v7 = vpop.permute.xlu0 %2560 }
 0x3bd   : > { %v2405_v22 = vpop.f32.mrf.mxu2 }
 0x3be   : > { %v2566_v24 = vadd.f32 %v6041_v29, %v2534_v42  ;;  %v2418_v26 = vadd.f32 %v2405_v22, %v2300_v35  ;;  %v6611_v42 = vld [vmem:[#allocation14_spill] sm:$0xff]  ;;  %v6615_v22 = vld [vmem:[#allocation7_spill] sm:$0xff] }
 0x3c0   : > { %v2502_v60 = vpop.f32.mrf.mxu0  ;;  %v2590_v3 = vmul.f32 0.1, %v2566_v24  ;;  %vm2578_vm10 = vcmp.gt.f32.partialorder %v2566_v24, 0.0 }
 0x3c1   : > { %v2532_v21 = vadd.f32 %v2502_v60, %v2414_v47  ;;  %v6610_v47 = vld [vmem:[#allocation13_spill] sm:$0xff]  ;;  %v6613_v60 = vld [vmem:[#allocation10_spill] sm:$0xff] }
 0x3c2   : > { %v2185_v37 = vadd.f32 %v6611_v42, %v6610_v47  ;;  %v2602_v63 = vsel %vm2578_vm10, %v2566_v24, %v2590_v3  ;;  %v2420_v24 = vadd.f32 %v6012_v2, %v2302_v10 }
 0x3c3   : > { %v2564_v32 = vadd.f32 %v2546_v52, %v2532_v21  ;;  %v2521_v5 = vpop.f32.mrf.mxu1  ;;  %v2488_v20 = vpop.f32.mrf.mxu3 }
 0x3c4   : > { %v2533_v38 = vadd.f32 %v2521_v5, %v2415_v36  ;;  %v2537_v45 = vadd.f32 %v2488_v20, %v2419_v14  ;;  %v6616_v5 = vld [vmem:[#allocation15_spill] sm:$0xff]  ;;  %v2303_v6 = vadd.f32 %v6617_v46, %v2185_v37  ;;  %v2614_v14 = vmul.f32 %v2602_v63, %v5570_v55 }
 0x3c5   : > { %vm2576_vm1 = vcmp.gt.f32.partialorder %v2564_v32, 0.0  ;;  %v2588_v11 = vmul.f32 0.1, %v2564_v32  ;;  %v2408_v31 = vpop.f32.mrf.mxu2  ;;  %v2029_v15 = vadd.f32 %v6616_v5, %v1899_v39  ;;  %v6621_v39 = vld [vmem:[#allocation20_spill] sm:$0xff] }
 0x3c6   : > { %v2565_v12 = vadd.f32 %v2546_v52, %v2533_v38  ;;  %v6607_v52 = vld [vmem:[#allocation5_spill] sm:$0xff]  ;;  %v2569_v21 = vadd.f32 %v6015_v17, %v2537_v45  ;;  %v6619_v45 = vld [vmem:[#allocation6_spill] sm:$0xff]  ;;  %v2421_v2 = vadd.f32 %v2408_v31, %v2303_v6 }
 0x3c7   : > { %v2600_v9 = vsel %vm2576_vm1, %v2564_v32, %v2588_v11  ;;  %v2186_v0 = vadd.f32 %v6607_v52, %v2028_v51  ;;  %v1900_v32 = vadd.f32 %v6615_v22, %v1782_v27  ;;  %v2187_v44 = vadd.f32 %v6619_v45, %v2029_v15  ;;  %v6620_v27 = vld [vmem:[#allocation11_spill] sm:$0xff] }
 0x3c8   : > { %v2612_v25 = vmul.f32 %v2600_v9, %v5572_v58  ;;  %vm2577_vm2 = vcmp.gt.f32.partialorder %v2565_v12, 0.0  ;;  %v2589_v56 = vmul.f32 0.1, %v2565_v12  ;;  %v2504_v43 = vpop.f32.mrf.mxu0  ;;  %v2593_v51 = vmul.f32 0.1, %v2569_v21 }
 0x3c9   : > { %v2535_v41 = vadd.f32 %v2504_v43, %v2417_v13  ;;  %v2304_v50 = vadd.f32 %v6613_v60, %v2186_v0  ;;  %vm2581_vm13 = vcmp.gt.f32.partialorder %v2569_v21, 0.0 }
 0x3ca   : > { %v2623_v16 = vpack.c.bf16 %v2612_v25, %v2611_v57  ;;  %v2601_v19 = vsel %vm2577_vm2, %v2565_v12, %v2589_v56  ;;  %v6618_v57 = vld [vmem:[#allocation12_spill] sm:$0xff]  ;;  %v2605_v52 = vsel %vm2581_vm13, %v2569_v21, %v2593_v51 }
 0x3cb   : > { %v2613_v53 = vmul.f32 %v2601_v19, %v6612_v62  ;;  %v2567_v1 = vadd.f32 %v6041_v29, %v2535_v41  ;;  %v2523_v59 = vpop.f32.mrf.mxu1  ;;  %v2490_v20 = vpop.f32.mrf.mxu3  ;;  %v2422_v54 = vadd.f32 %v6017_v8, %v2304_v50  ;;  %v2030_v3 = vadd.f32 %v6618_v57, %v1900_v32 }
 0x3cc   : > { %2631 = vst [vmem:[#allocation2 + $0x4] sm:$0xff] %v2623_v16  ;;  %v2536_v61 = vadd.f32 %v2523_v59, %v2418_v26  ;;  %v2305_v41 = vadd.f32 %v6621_v39, %v2187_v44 }
 0x3cd   : > { %v2624_v36 = vpack.c.bf16 %v2613_v53, %v2613_v53  ;;  %vm2579_vm11 = vcmp.gt.f32.partialorder %v2567_v1, 0.0  ;;  %v2591_v33 = vmul.f32 0.1, %v2567_v1  ;;  %v2540_v9 = vadd.f32 %v2490_v20, %v2422_v54  ;;  %v2410_v42 = vpop.f32.mrf.mxu2 }
 0x3ce   : > { %v2568_v38 = vadd.f32 %v6041_v29, %v2536_v61  ;;  %v2188_v18 = vadd.f32 %v6620_v27, %v2030_v3  ;;  %v2423_v47 = vadd.f32 %v6024_v23, %v2305_v41  ;;  %v2617_v53 = vmul.f32 %v2605_v52, %v5570_v55 }
 0x3cf   : > { %2632 = vst [vmem:[#allocation2 + $0xc] sm:$0xf] %v2624_v36  ;;  %v2603_v11 = vsel %vm2579_vm11, %v2567_v1, %v2591_v33  ;;  %v2572_v16 = vadd.f32 %v2561_v7, %v2540_v9 }
 0x3d0   : > { %v2615_v35 = vmul.f32 %v2603_v11, %v5572_v58  ;;  %vm2580_vm12 = vcmp.gt.f32.partialorder %v2568_v38, 0.0  ;;  %v2592_v13 = vmul.f32 0.1, %v2568_v38  ;;  %v2507_v12 = vpop.f32.mrf.mxu0  ;;  %v2306_v34 = vadd.f32 %v6622_v28, %v2188_v18 }
 0x3d1   : > { %v2538_v29 = vadd.f32 %v2507_v12, %v2420_v24  ;;  %v2596_v50 = vmul.f32 0.1, %v2572_v16  ;;  %vm2584_vm2 = vcmp.gt.f32.partialorder %v2572_v16, 0.0 }
 0x3d2   : > { %v2625_v30 = vpack.c.bf16 %v2615_v35, %v2614_v14  ;;  %v2604_v8 = vsel %vm2580_vm12, %v2568_v38, %v2592_v13  ;;  %v2424_v21 = vadd.f32 %v2410_v42, %v2306_v34 }
 0x3d3   : > { %v2616_v25 = vmul.f32 %v2604_v8, %v6612_v62  ;;  %v2570_v56 = vadd.f32 %v6015_v17, %v2538_v29  ;;  %v2526_v43 = vpop.f32.mrf.mxu1  ;;  %v2608_v31 = vsel %vm2584_vm2, %v2572_v16, %v2596_v50  ;;  %v4997_v44 = vld [vmem:[#allocation2 + $0x4] sm:$0xf]  ;;  %v5022_v50 = vld [vmem:[#allocation2 + $0x10] sm:$0xf] }
 0x3d4   : > { %2633 = vst [vmem:[#allocation2 + $0x18] sm:$0xff] %v2625_v30  ;;  %v2539_v0 = vadd.f32 %v2526_v43, %v2421_v2  ;;  %v2620_v15 = vmul.f32 %v2608_v31, %v5570_v55 }
 0x3d5   : > { %v2626_v26 = vpack.c.bf16 %v2616_v25, %v2616_v25  ;;  %vm2582_vm15 = vcmp.gt.f32.partialorder %v2570_v56, 0.0  ;;  %v2594_v19 = vmul.f32 0.1, %v2570_v56 }
 0x3d6   : > { %v2571_v49 = vadd.f32 %v6015_v17, %v2539_v0  ;;  %v4998_v2 = vld [vmem:[#allocation2 + $0xc] sm:$0xf] }
 0x3d7   : > { %2634 = vst [vmem:[#allocation2 + $0x20] sm:$0xf] %v2626_v26  ;;  %v2606_v37 = vsel %vm2582_vm15, %v2570_v56, %v2594_v19  ;;  %v4663_v56 = vld [vmem:[#allocation2 + $0x8] sm:$0xf]  ;;  %v4805_v39 = vld [vmem:[#allocation2 + $0xc] sm:$0xf] }
 0x3d8   : > { %v2618_v1 = vmul.f32 %v2606_v37, %v5572_v58  ;;  %vm2583_vm1 = vcmp.gt.f32.partialorder %v2571_v49, 0.0  ;;  %v2595_v59 = vmul.f32 0.1, %v2571_v49  ;;  %v2509_v60 = vpop.f32.mrf.mxu0  ;;  %v4797_v19 = vld [vmem:[#allocation2 + $0x4] sm:$0xf] }
 0x3d9   : > { %v2541_v63 = vadd.f32 %v2509_v60, %v2423_v47 }
 0x3da   : > { %v2627_v61 = vpack.c.bf16 %v2618_v1, %v2617_v53  ;;  %v2607_v17 = vsel %vm2583_vm1, %v2571_v49, %v2595_v59 }
 0x3db   : > { %v2619_v4 = vmul.f32 %v2607_v17, %v6612_v62  ;;  %v2573_v10 = vadd.f32 %v2561_v7, %v2541_v63  ;;  %v2528_v23 = vpop.f32.mrf.mxu1  ;;  %v4657_v29 = vld [vmem:[#allocation2 + $0x14] sm:$0xf0]  ;;  %v5000_v25 = vld [vmem:[#allocation2 + $0x18] sm:$0xf0]  ;;  %v4807_v63 = vld [vmem:[#allocation2 + $0x20] sm:$0xf0] }
 0x3dc   : > { %2635 = vst [vmem:[#allocation2 + $0x2c] sm:$0xff] %v2627_v61  ;;  %v2542_v36 = vadd.f32 %v2528_v23, %v2424_v21  ;;  %v4660_v30 = vor.u32 %v4997_v44, %v4657_v29  ;;  %v4664_v43 = vor.u32 %v5000_v25, %v4663_v56  ;;  %v4799_v52 = vld [vmem:[#allocation2 + $0x18] sm:$0xf0]  ;;  %v5023_v26 = vld [vmem:[#allocation2 + $0x14] sm:$0xf0]  ;;  %v6165_v61 = vor.u32 %v5022_v50, %v4807_v63 }
 0x3dd   : > { %v2628_v33 = vpack.c.bf16 %v2619_v4, %v2619_v4  ;;  %vm2585_vm10 = vcmp.gt.f32.partialorder %v2573_v10, 0.0  ;;  %v2597_v22 = vmul.f32 0.1, %v2573_v10  ;;  %v6149_v28 = vor.u32 %v5023_v26, %v4797_v19  ;;  %v4634_v19 = vld [vmem:[%s6548_s6 + $0x48] sm:$0xff]  ;;  %v5014_v50 = vld [vmem:[#allocation2 + $0x14] sm:$0xf0] }
 0x3de   : > { %v2574_v32 = vadd.f32 %v2561_v7, %v2542_v36  ;;  %v4665_v45 = vld [vmem:[#allocation2 + $0x1c] sm:$0xf0]  ;;  %v4823_v7 = vld [vmem:[#allocation2 + $0x48] sm:$0xf0] }
 0x3df   : > { %2636 = vst [vmem:[#allocation2 + $0x34] sm:$0xf] %v2628_v33  ;;  %v2609_v5 = vsel %vm2585_vm10, %v2573_v10, %v2597_v22  ;;  %v4668_v8 = vor.u32 %v4998_v2, %v4665_v45  ;;  %v5024_v27 = vld [vmem:[#allocation2 + $0x1c] sm:$0xf0] }
 0x3e0   : > { %v2621_v46 = vmul.f32 %v2609_v5, %v5572_v58  ;;  %vm2586_vm11 = vcmp.gt.f32.partialorder %v2574_v32, 0.0  ;;  %v2598_v6 = vmul.f32 0.1, %v2574_v32  ;;  %v6139_v41 = vor.u32 %v5024_v27, %v4805_v39 }
 0x3e2   : > { %v2629_v38 = vpack.c.bf16 %v2621_v46, %v2620_v15  ;;  %v2610_v20 = vsel %vm2586_vm11, %v2574_v32, %v2598_v6  ;;  %v5005_v15 = vld [vmem:[%s6545_s3 + $0xa0] sm:$0xff] }
 0x3e3   : > { %v2622_v24 = vmul.f32 %v2610_v20, %v6612_v62  ;;  %v4679_v14 = vld [vmem:[#allocation2 + $0x30] sm:$0xf]  ;;  %v5001_v51 = vld [vmem:[#allocation2 + $0x2c] sm:$0xf] }
 0x3e4   : > { %2637 = vst [vmem:[#allocation2 + $0x40] sm:$0xff] %v2629_v38  ;;  %v5025_v42 = vld [vmem:[#allocation2 + $0x30] sm:$0xf]  ;;  %v4813_v59 = vld [vmem:[#allocation2 + $0x2c] sm:$0xf] }
 0x3e5   : > { %v2630_v54 = vpack.c.bf16 %v2622_v24, %v2622_v24 }
 0x3e6   : > { %v5002_v57 = vld [vmem:[#allocation2 + $0x34] sm:$0xf] }
 0x3e7   : > { %2638 = vst [vmem:[#allocation2 + $0x48] sm:$0xf] %v2630_v54  ;;  %v4821_v49 = vld [vmem:[#allocation2 + $0x34] sm:$0xf] }
 0x3eb   : > { %v5004_v11 = vld [vmem:[#allocation2 + $0x40] sm:$0xf0]  ;;  %v4673_v35 = vld [vmem:[#allocation2 + $0x3c] sm:$0xf0] }
 0x3ec   : > { %v4680_v13 = vor.u32 %v5004_v11, %v4679_v14  ;;  %v4676_v12 = vor.u32 %v5001_v51, %v4673_v35  ;;  %v4815_v47 = vld [vmem:[#allocation2 + $0x40] sm:$0xf0]  ;;  %v5027_v1 = vld [vmem:[#allocation2 + $0x3c] sm:$0xf0]  ;;  %v5006_v51 = vld [vmem:[%s6545_s3 + $0xa8] sm:$0xff] }
 0x3ed   : > { %v6157_v37 = vor.u32 %v5025_v42, %v4815_v47  ;;  %v4814_v60 = vor.u32 %v5027_v1, %v4813_v59 }
 0x3ee   : > { %2716 = vrot.lane.b32.xlu2 %v4680_v13, %s5085_s11  ;;  %2714 = vrot.lane.b32.xlu1 %v4676_v12, %s5085_s11  ;;  %v4681_v3 = vld [vmem:[#allocation2 + $0x44] sm:$0xf0] }
 0x3ef   : > { %v4684_v9 = vor.u32 %v5002_v57, %v4681_v3  ;;  %v5028_v16 = vld [vmem:[#allocation2 + $0x44] sm:$0xf0] }
 0x3f0   : > { %v6151_v34 = vor.u32 %v5028_v16, %v4821_v49 }
 0x3f1   : > { %2718 = vrot.lane.b32.xlu0 %v4684_v9, %s5085_s11 }
 0x3f6   : > { %2706 = vrot.lane.b32.xlu2 %v4660_v30, %s5085_s11  ;;  %2710 = vrot.lane.b32.xlu1 %v4668_v8, %s5085_s11 }
 0x3f9   : > { %2708 = vrot.lane.b32.xlu0 %v4664_v43, %s5085_s11  ;;  %s5044_s11 = smul.u32 24, %s6624_s28 }
 0x3fe   : > { %2813 = vrot.lane.b32.xlu2 %v6062_v48, %s5086_s12  ;;  %2809 = vrot.lane.b32.xlu1 %v4664_v43, %s5086_s12 }
 0x401   : > { %2919 = vrot.lane.b32.xlu0 %v6062_v48, %s5087_s13 }
 0x406   : > { %2805 = vrot.lane.b32.xlu2 %v6036_v40, %s5086_s12  ;;  %2817 = vrot.lane.b32.xlu1 %v4680_v13, %s5086_s12 }
 0x409   : > { %2807 = vrot.lane.b32.xlu0 %v4660_v30, %s5086_s12 }
 0x40e   : > { %2819 = vrot.lane.b32.xlu2 %v4684_v9, %s5086_s12  ;;  %2921 = vrot.lane.b32.xlu1 %v4676_v12, %s5087_s13 }
 0x411   : > { %2815 = vrot.lane.b32.xlu0 %v4676_v12, %s5086_s12 }
 0x416   : > { %2811 = vrot.lane.b32.xlu2 %v4668_v8, %s5086_s12  ;;  %2913 = vrot.lane.b32.xlu1 %v4660_v30, %s5087_s13 }
 0x419   : > { %2911 = vrot.lane.b32.xlu0 %v6036_v40, %s5087_s13 }
 0x41e   : > { %2917 = vrot.lane.b32.xlu2 %v4668_v8, %s5087_s13  ;;  %3037 = vrot.lane.b32.xlu1 %v6062_v48, %s5088_s14  ;;  %v5026_v48 = vld [vmem:[#allocation2 + $0x38] sm:$0xf] }
 0x41f   : > { %v6137_v18 = vor.u32 %v5026_v48, %v4823_v7 }
 0x421   : > { %2925 = vrot.lane.b32.xlu0 %v4684_v9, %s5087_s13 }
 0x426   : > { %2923 = vrot.lane.b32.xlu2 %v4680_v13, %s5087_s13  ;;  %2915 = vrot.lane.b32.xlu1 %v4664_v43, %s5087_s13 }
 0x429   : > { %3041 = vrot.lane.b32.xlu0 %v4680_v13, %s5088_s14 }
 0x42b   : > { %v2705_v17 = vpop.permute.xlu1 %2704 }
 0x42e   : > { %3039 = vrot.lane.b32.xlu2 %v4676_v12, %s5088_s14  ;;  %3031 = vrot.lane.b32.xlu1 %v4660_v30, %s5088_s14  ;;  %v2713_v10 = vpop.permute.xlu0 %2712 }
 0x431   : > { %3029 = vrot.lane.b32.xlu0 %v6036_v40, %s5088_s14  ;;  %v5021_v40 = vld [vmem:[#allocation2 + $0x8] sm:$0xf] }
 0x432   : > { %v6145_v0 = vor.u32 %v5021_v40, %v4799_v52  ;;  %v6249_v52 = vld [vmem:[%s6545_s3 + $0xb0] sm:$0xff] }
 0x436   : > { %3033 = vrot.lane.b32.xlu2 %v4664_v43, %s5088_s14  ;;  %3035 = vrot.lane.b32.xlu1 %v4668_v8, %s5088_s14  ;;  %v4995_v43 = vld [vmem:[%s6545_s3 + $0x90] sm:$0xff] }
 0x439   : > { %3043 = vrot.lane.b32.xlu0 %v4684_v9, %s5088_s14  ;;  %s6534_s14 = scalar_lea.vmem %s6550_s8, %s5044_s11 }
 0x43e   : > { %3331 = vrot.lane.b32.xlu2 %v6137_v18, %s5089_s15  ;;  %3321 = vrot.lane.b32.xlu1 %v6139_v41, %s5089_s15 }
 0x441   : > { %3319 = vrot.lane.b32.xlu0 %v6145_v0, %s5089_s15 }
 0x446   : > { %3317 = vrot.lane.b32.xlu2 %v6149_v28, %s5089_s15  ;;  %3329 = vrot.lane.b32.xlu1 %v6151_v34, %s5089_s15 }
 0x448   : > { %v2717_v53 = vpop.permute.xlu2 %2716 }
 0x449   : > { %3327 = vrot.lane.b32.xlu0 %v6157_v37, %s5089_s15 }
 0x44e   : > { %3325 = vrot.lane.b32.xlu2 %v4814_v60, %s5089_s15  ;;  %3445 = vrot.lane.b32.xlu1 %v6157_v37, %s5090_s16 }
 0x450   : > { %v2707_v21 = vpop.permute.xlu2 %2706 }
 0x451   : > { %3443 = vrot.lane.b32.xlu0 %v4814_v60, %s5090_s16  ;;  %v2720_v5 = vsel %vm365_vm3, %v2705_v17, %v2707_v21 }
 0x456   : > { %3323 = vrot.lane.b32.xlu2 %v6165_v61, %s5089_s15  ;;  %3437 = vrot.lane.b32.xlu1 %v6145_v0, %s5090_s16 }
 0x458   : > { %v2814_v4 = vpop.permute.xlu2 %2813 }
 0x459   : > { %3435 = vrot.lane.b32.xlu0 %v6149_v28, %s5090_s16 }
 0x45e   : > { %3441 = vrot.lane.b32.xlu2 %v6165_v61, %s5090_s16  ;;  %3439 = vrot.lane.b32.xlu1 %v6139_v41, %s5090_s16 }
 0x460   : > { %v6177_v23 = vpop.permute.xlu2 %2805  ;;  %v2715_v36 = vpop.permute.xlu1 %2714 }
 0x461   : > { %v2723_v31 = vsel %vm365_vm3, %v2713_v10, %v2715_v36  ;;  %v2724_v33 = vsel %vm365_vm3, %v2715_v36, %v2717_v53  ;;  %3449 = vrot.lane.b32.xlu0 %v6137_v18, %s5090_s16  ;;  %v5008_v10 = vld [vmem:[%s6545_s3 + $0xb8] sm:$0xff] }
 0x462   : > { %2744 = vmatpush.bf16.msrb.mxu2 %v2723_v31  ;;  %2763 = vmatpush.bf16.msrb.mxu3 %v2724_v33  ;;  %v4890_v36 = vld [vmem:[%s6548_s6 + $0x78] sm:$0xff]  ;;  %v5018_v31 = vld [vmem:[#allocation2 + $0x44] sm:$0xf0] }
 0x463   : > { %v2719_v22 = vpop.permute.xlu0 %2718 }
 0x464   : > { %v2725_v32 = vsel %vm365_vm3, %v2717_v53, %v2719_v22  ;;  %v4996_v53 = vld [vmem:[%s6545_s3 + $0x98] sm:$0xff] }
 0x465   : > { %2782 = vmatpush.bf16.msra.mxu0 %v2725_v32  ;;  %v4775_v32 = vld [vmem:[#allocation2 + $0x34] sm:$0xf] }
 0x466   : > { %3447 = vrot.lane.b32.xlu2 %v6151_v34, %s5090_s16  ;;  %3561 = vrot.lane.b32.xlu1 %v4814_v60, %s5091_s17 }
 0x467   : > { %2745 = vmatpush.bf16.msrb.mxu2 %v2720_v5 }
 0x468   : > { %v2820_v46 = vpop.permute.xlu2 %2819  ;;  %v2711_v6 = vpop.permute.xlu1 %2710 }
 0x469   : > { %3565 = vrot.lane.b32.xlu0 %v6151_v34, %s5091_s17 }
 0x46a   : > { %4685 = vmatmul.msk.bf16.vlgmr.msrb.gmra.mxu2 %vm1500_vm14, %v5005_v15 }
 0x46b   : > { %v2709_v38 = vpop.permute.xlu0 %2708 }
 0x46c   : > { %v2721_v20 = vsel %vm365_vm3, %v2707_v21, %v2709_v38  ;;  %v2722_v24 = vsel %vm365_vm3, %v2709_v38, %v2711_v6  ;;  %v4889_v21 = vld [vmem:[%s6548_s6 + $0x70] sm:$0xff]  ;;  %v5015_v6 = vld [vmem:[#allocation2 + $0x1c] sm:$0xf0] }
 0x46d   : > { %2764 = vmatpush.bf16.msrb.mxu3 %v2721_v20  ;;  %2783 = vmatpush.bf16.msra.mxu0 %v2722_v24  ;;  %v4888_v20 = vld [vmem:[%s6548_s6 + $0x68] sm:$0xff]  ;;  %v5016_v24 = vld [vmem:[#allocation2 + $0x30] sm:$0xf] }
 0x46e   : > { %3563 = vrot.lane.b32.xlu2 %v6157_v37, %s5091_s17  ;;  %3555 = vrot.lane.b32.xlu1 %v6145_v0, %s5091_s17 }
 0x470   : > { %v2812_v54 = vpop.permute.xlu2 %2811  ;;  %v2810_v14 = vpop.permute.xlu1 %2809  ;;  %4687 = vmatmul.msk.bf16.vlgmr.msrb.gmra.mxu3 %vm1500_vm14, %v5005_v15  ;;  %4689 = vmatmul.msk.bf16.vlgmr.msra.gmra.mxu0 %vm1500_vm14, %v5005_v15  ;;  %v4776_v15 = vor.u32 %v5018_v31, %v4775_v32 }
 0x471   : > { %3553 = vrot.lane.b32.xlu0 %v6149_v28, %s5091_s17  ;;  %v2823_v3 = vsel %vm461_vm0, %v2810_v14, %v2812_v54 }
 0x473   : > { %v2920_v11 = vpop.permute.xlu0 %2919 }
 0x476   : > { %3557 = vrot.lane.b32.xlu2 %v6139_v41, %s5091_s17  ;;  %3685 = vrot.lane.b32.xlu1 %v6137_v18, %s5092_s20 }
 0x478   : > { %v6211_v35 = vpop.permute.xlu2 %2917  ;;  %v2818_v13 = vpop.permute.xlu1 %2817 }
 0x479   : > { %v2826_v12 = vsel %vm461_vm0, %v2818_v13, %v2820_v46  ;;  %3567 = vrot.lane.b32.xlu0 %v6137_v18, %s5091_s17  ;;  %v4635_v18 = vld [vmem:[%s6548_s6 + $0x50] sm:$0xff]  ;;  %v4769_v46 = vld [vmem:[#allocation2 + $0x40] sm:$0xf0] }
 0x47a   : > { %4686 = vmatmul.msk.bf16.gmra.mxu2 %vm1500_vm14, %v5006_v51  ;;  %2883 = vmatpush.bf16.msra.mxu3 %v2826_v12  ;;  %v5013_v12 = vld [vmem:[#allocation2 + $0x8] sm:$0xf] }
 0x47b   : > { %v2808_v57 = vpop.permute.xlu0 %2807 }
 0x47c   : > { %v2821_v56 = vsel %vm461_vm0, %v6177_v23, %v2808_v57  ;;  %v2822_v7 = vsel %vm461_vm0, %v2808_v57, %v2810_v14  ;;  %v4772_v14 = vor.u32 %v5016_v24, %v4769_v46 }
 0x47e   : > { %3559 = vrot.lane.b32.xlu2 %v6165_v61, %s5091_s17  ;;  %3679 = vrot.lane.b32.xlu1 %v4814_v60, %s5092_s20 }
 0x47f   : > { %2884 = vmatpush.bf16.msra.mxu3 %v2823_v3 }
 0x480   : > { %v2924_v9 = vpop.permute.xlu2 %2923  ;;  %v2922_v29 = vpop.permute.xlu1 %2921  ;;  %4688 = vmatmul.msk.bf16.gmra.mxu3 %vm1500_vm14, %v5006_v51  ;;  %4690 = vmatmul.msk.bf16.gmra.mxu0 %vm1500_vm14, %v5006_v51 }
 0x481   : > { %v2930_v45 = vsel %vm560_vm4, %v2920_v11, %v2922_v29  ;;  %3671 = vrot.lane.b32.xlu0 %v6149_v28, %s5092_s20  ;;  %v2931_v48 = vsel %vm560_vm4, %v2922_v29, %v2924_v9  ;;  %v4633_v28 = vld [vmem:[%s6548_s6 + $0x40] sm:$0xff]  ;;  %v4763_v11 = vld [vmem:[#allocation2 + $0xc] sm:$0xf] }
 0x482   : > { %2951 = vmatpush.bf16.msrb.mxu0 %v2930_v45  ;;  %v4764_v51 = vor.u32 %v5015_v6, %v4763_v11  ;;  %v5029_v6 = vld [vmem:[%s6545_s3 + $0xf0] sm:$0xff] }
 0x483   : > { %v2816_v44 = vpop.permute.xlu0 %2815 }
 0x484   : > { %v2824_v2 = vsel %vm461_vm0, %v2814_v4, %v2816_v44  ;;  %v2825_v30 = vsel %vm461_vm0, %v2816_v44, %v2818_v13  ;;  %v4755_v4 = vld [vmem:[#allocation2 + $0x4] sm:$0xf] }
 0x485   : > { %2845 = vmatpush.bf16.msra.mxu1 %v2824_v2  ;;  %2864 = vmatpush.bf16.msra.mxu2 %v2825_v30  ;;  %v4756_v23 = vor.u32 %v5014_v50, %v4755_v4  ;;  %v4055_v13 = vld [vmem:[%s6549_s7] sm:$0xff] }
 0x486   : > { %3681 = vrot.lane.b32.xlu2 %v6157_v37, %s5092_s20  ;;  %3673 = vrot.lane.b32.xlu1 %v6145_v0, %s5092_s20  ;;  %v4767_v37 = vld [vmem:[#allocation2 + $0x2c] sm:$0xf]  ;;  %v5009_v44 = vld [vmem:[%s6545_s3 + $0xc0] sm:$0xff] }
 0x488   : > { %v3040_v8 = vpop.permute.xlu2 %3039  ;;  %v2914_v25 = vpop.permute.xlu1 %2913 }
 0x489   : > { %3683 = vrot.lane.b32.xlu0 %v6151_v34, %s5092_s20  ;;  %2846 = vmatpush.bf16.msra.mxu1 %v2821_v56  ;;  %v5017_v34 = vld [vmem:[#allocation2 + $0x3c] sm:$0xf0] }
 0x48a   : > { %2865 = vmatpush.bf16.msra.mxu2 %v2822_v7  ;;  %v4768_v60 = vor.u32 %v5017_v34, %v4767_v37 }
 0x48b   : > { %v2912_v27 = vpop.permute.xlu0 %2911 }
 0x48c   : > { %4699 = vmatmul.msk.bf16.vlgmr.msra.gmra.mxu1 %vm1500_vm14, %v4995_v43  ;;  %v2927_v39 = vsel %vm560_vm4, %v2912_v27, %v2914_v25 }
 0x48d   : > { %2970 = vmatpush.bf16.msrb.mxu1 %v2931_v48  ;;  %4701 = vmatmul.msk.bf16.vlgmr.msra.gmra.mxu2 %vm1500_vm14, %v4995_v43 }
 0x48e   : > { %2952 = vmatpush.bf16.msrb.mxu0 %v2927_v39  ;;  %3675 = vrot.lane.b32.xlu2 %v6139_v41, %s5092_s20  ;;  %v4636_v41 = vld [vmem:[%s6548_s6 + $0x58] sm:$0xff] }
 0x48f   : > { %3786 = vperm.xlu1 %5064, %v4635_v18   ;;  %v5010_v18 = vld [vmem:[%s6545_s3 + $0xc8] sm:$0xff] }
 0x490   : > { %v6254_v40 = vpop.permute.xlu2 %3033  ;;  %v3038_v0 = vpop.permute.xlu1 %3037  ;;  %4703 = vmatmul.msk.bf16.vlgmr.msra.gmra.mxu3 %vm1500_vm14, %v4995_v43 }
 0x491   : > { %4717 = vmatmul.msk.bf16.vlgmr.msrb.gmra.mxu0 %vm1500_vm14, %v6249_v52  ;;  %v3048_v26 = vsel %vm671_vm5, %v3038_v0, %v3040_v8  ;;  %3677 = vrot.lane.b32.xlu0 %v6165_v61, %s5092_s20  ;;  %v4887_v61 = vld [vmem:[%s6548_s6 + $0x60] sm:$0xff] }
 0x492   : > { %3069 = vmatpush.bf16.msrb.mxu3 %v3048_v26 }
 0x493   : > { %v2926_v16 = vpop.permute.xlu0 %2925 }
 0x494   : > { %v2932_v49 = vsel %vm560_vm4, %v2924_v9, %v2926_v16 }
 0x495   : > { %2989 = vmatpush.bf16.msrb.mxu2 %v2932_v49 }
 0x496   : > { %3791 = vperm.xlu2 %5062, %v4636_v41  }
 0x497   : > { %3781 = vperm.xlu1 %5064, %v4634_v19  }
 0x498   : > { %v6272_v47 = vpop.permute.xlu2 %3331  ;;  %v2916_v42 = vpop.permute.xlu1 %2915 }
 0x499   : > { %3776 = vperm.xlu0 %5063, %v4633_v28   ;;  %v2928_v1 = vsel %vm560_vm4, %v2914_v25, %v2916_v42  ;;  %v2929_v59 = vsel %vm560_vm4, %v2916_v42, %v6211_v35  ;;  %v4757_v35 = vld [vmem:[#allocation2 + $0x18] sm:$0xf0]  ;;  %v5011_v28 = vld [vmem:[%s6545_s3 + $0xd0] sm:$0xff] }
 0x49a   : > { %2971 = vmatpush.bf16.msrb.mxu1 %v2928_v1  ;;  %2990 = vmatpush.bf16.msrb.mxu2 %v2929_v59  ;;  %v4760_v3 = vor.u32 %v5013_v12, %v4757_v35 }
 0x49b   : > { %v3042_v63 = vpop.permute.xlu0 %3041 }
 0x49c   : > { %v3049_v17 = vsel %vm671_vm5, %v3040_v8, %v3042_v63  ;;  %4700 = vmatmul.msk.bf16.gmra.mxu1 %vm1500_vm14, %v4996_v53 }
 0x49d   : > { %4702 = vmatmul.msk.bf16.gmra.mxu2 %vm1500_vm14, %v4996_v53  ;;  %3088 = vmatpush.bf16.msra.mxu0 %v3049_v17 }
 0x49e   : > { %3199 = vmatpush.bf16.msra.mxu2 %v4768_v60  ;;  %3899 = vperm.xlu2 %5062, %v4889_v21  }
 0x49f   : > { %3889 = vperm.xlu1 %5064, %v4887_v61   ;;  %v5012_v61 = vld [vmem:[%s6545_s3 + $0xd8] sm:$0xff] }
 0x4a0   : > { %v3318_v33 = vpop.permute.xlu2 %3317  ;;  %v3032_v22 = vpop.permute.xlu1 %3031  ;;  %4704 = vmatmul.msk.bf16.gmra.mxu3 %vm1500_vm14, %v4996_v53 }
 0x4a1   : > { %4718 = vmatmul.msk.bf16.gmra.mxu0 %vm1500_vm14, %v5008_v10  ;;  %3904 = vperm.xlu0 %5063, %v4890_v36   ;;  %v3046_v5 = vsel %vm671_vm5, %v3032_v22, %v6254_v40 }
 0x4a2   : > { %3200 = vmatpush.bf16.msra.mxu2 %v4756_v23  ;;  %3089 = vmatpush.bf16.msra.mxu0 %v3046_v5  ;;  %v5019_v5 = vld [vmem:[%s6545_s3 + $0xe0] sm:$0xff] }
 0x4a3   : > { %v3030_v38 = vpop.permute.xlu0 %3029 }
 0x4a4   : > { %v3045_v54 = vsel %vm671_vm5, %v3030_v38, %v3032_v22 }
 0x4a5   : > { %3070 = vmatpush.bf16.msrb.mxu3 %v3045_v54 }
 0x4a6   : > { %3237 = vmatpush.bf16.msrb.mxu0 %v4776_v15  ;;  %3894 = vperm.xlu2 %5062, %v4888_v20  }
 0x4a8   : > { %v3036_v57 = vpop.permute.xlu1 %3035  ;;  %v3326_v9 = vpop.permute.xlu2 %3325 }
 0x4a9   : > { %3218 = vmatpush.bf16.msra.mxu3 %v4772_v14  ;;  %4058 = vperm.xlu0 %5063, %v4055_v13   ;;  %v3047_v30 = vsel %vm671_vm5, %v6254_v40, %v3036_v57 }
 0x4aa   : > { %3238 = vmatpush.bf16.msrb.mxu0 %v4764_v51 }
 0x4ab   : > { %v3044_v29 = vpop.permute.xlu0 %3043 }
 0x4ac   : > { %v3050_v45 = vsel %vm671_vm5, %v3042_v63, %v3044_v29  ;;  %4719 = vmatmul.msk.bf16.vlgmr.msrb.gmra.mxu1 %vm1500_vm14, %v6249_v52 }
 0x4ad   : > { %3219 = vmatpush.bf16.msra.mxu3 %v4760_v3  ;;  %4721 = vmatmul.msk.bf16.vlgmr.msrb.gmra.mxu2 %vm1500_vm14, %v6249_v52  ;;  %v5020_v3 = vld [vmem:[%s6545_s3 + $0xe8] sm:$0xff] }
 0x4ae   : > { %3107 = vmatpush.bf16.msra.mxu1 %v3050_v45 }
 0x4b0   : > { %v3322_v2 = vpop.permute.xlu1 %3321  ;;  %4735 = vmatmul.msk.bf16.vlgmr.msrb.gmra.mxu3 %vm1500_vm14, %v5009_v44  ;;  %v3324_v25 = vpop.permute.xlu2 %3323 }
 0x4b1   : > { %4737 = vmatmul.msk.bf16.vlgmr.msra.gmra.mxu0 %vm1500_vm14, %v5009_v44  ;;  %v3335_v39 = vsel %vm884_vm6, %v3322_v2, %v3324_v25 }
 0x4b2   : > { %3108 = vmatpush.bf16.msra.mxu1 %v3047_v30  ;;  %v5030_v30 = vld [vmem:[%s6545_s3 + $0xf8] sm:$0xff] }
 0x4b3   : > { %v3320_v8 = vpop.permute.xlu0 %3319 }
 0x4b4   : > { %v3333_v0 = vsel %vm884_vm6, %v3318_v33, %v3320_v8  ;;  %v3334_v26 = vsel %vm884_vm6, %v3320_v8, %v3322_v2 }
 0x4b8   : > { %v3330_v56 = vpop.permute.xlu1 %3329  ;;  %v3442_v52 = vpop.permute.xlu2 %3441 }
 0x4b9   : > { %v3338_v43 = vsel %vm884_vm6, %v3330_v56, %v6272_v47 }
 0x4ba   : > { %3395 = vmatpush.bf16.msrb.mxu3 %v3338_v43 }
 0x4bb   : > { %v3328_v48 = vpop.permute.xlu0 %3327 }
 0x4bc   : > { %v3336_v7 = vsel %vm884_vm6, %v3326_v9, %v3328_v48  ;;  %v3337_v27 = vsel %vm884_vm6, %v3328_v48, %v3330_v56  ;;  %4720 = vmatmul.msk.bf16.gmra.mxu1 %vm1500_vm14, %v5008_v10 }
 0x4bd   : > { %4722 = vmatmul.msk.bf16.gmra.mxu2 %vm1500_vm14, %v5008_v10  ;;  %3357 = vmatpush.bf16.msrb.mxu1 %v3336_v7 }
 0x4be   : > { %3376 = vmatpush.bf16.msrb.mxu2 %v3337_v27  ;;  %3396 = vmatpush.bf16.msrb.mxu3 %v3335_v39 }
 0x4c0   : > { %v3446_v40 = vpop.permute.xlu1 %3445  ;;  %4736 = vmatmul.msk.bf16.gmra.mxu3 %vm1500_vm14, %v5010_v18  ;;  %v3448_v19 = vpop.permute.xlu2 %3447 }
 0x4c1   : > { %4738 = vmatmul.msk.bf16.gmra.mxu0 %vm1500_vm14, %v5010_v18  ;;  %3358 = vmatpush.bf16.msrb.mxu1 %v3333_v0  ;;  %v3455_v47 = vsel %vm995_vm7, %v3446_v40, %v3448_v19 }
 0x4c2   : > { %3377 = vmatpush.bf16.msrb.mxu2 %v3334_v26  ;;  %v5031_v26 = vld [vmem:[%s6545_s3 + $0x100] sm:$0xff] }
 0x4c3   : > { %v3444_v16 = vpop.permute.xlu0 %3443 }
 0x4c4   : > { %v3454_v41 = vsel %vm995_vm7, %v3444_v16, %v3446_v40 }
 0x4c5   : > { %3475 = vmatpush.bf16.msra.mxu0 %v3454_v41 }
 0x4c8   : > { %v3438_v49 = vpop.permute.xlu1 %3437  ;;  %v3564_v1 = vpop.permute.xlu2 %3563 }
 0x4cb   : > { %v3436_v34 = vpop.permute.xlu0 %3435 }
 0x4cc   : > { %4739 = vmatmul.msk.bf16.vlgmr.msra.gmra.mxu1 %vm1500_vm14, %v5009_v44  ;;  %v3451_v42 = vsel %vm995_vm7, %v3436_v34, %v3438_v49 }
 0x4cd   : > { %4777 = vmatmul.msk.bf16.vlgmr.msra.gmra.mxu2 %vm1500_vm14, %v5011_v28  ;;  %3494 = vmatpush.bf16.msra.mxu1 %v3455_v47 }
 0x4ce   : > { %3476 = vmatpush.bf16.msra.mxu0 %v3451_v42 }
 0x4d0   : > { %v3440_v37 = vpop.permute.xlu1 %3439  ;;  %4779 = vmatmul.msk.bf16.vlgmr.msra.gmra.mxu3 %vm1500_vm14, %v5011_v28  ;;  %v3558_v4 = vpop.permute.xlu2 %3557 }
 0x4d1   : > { %4781 = vmatmul.msk.bf16.vlgmr.msrb.gmra.mxu0 %vm1500_vm14, %v5011_v28  ;;  %v3452_v53 = vsel %vm995_vm7, %v3438_v49, %v3440_v37  ;;  %v3453_v63 = vsel %vm995_vm7, %v3440_v37, %v3442_v52 }
 0x4d2   : > { %3495 = vmatpush.bf16.msra.mxu1 %v3452_v53 }
 0x4d3   : > { %v3450_v59 = vpop.permute.xlu0 %3449 }
 0x4d4   : > { %v3456_v60 = vsel %vm995_vm7, %v3448_v19, %v3450_v59 }
 0x4d5   : > { %3513 = vmatpush.bf16.msra.mxu2 %v3456_v60  ;;  %v5032_v60 = vld [vmem:[%s6545_s3 + $0x108] sm:$0xff] }
 0x4d8   : > { %v3562_v50 = vpop.permute.xlu1 %3561  ;;  %v3560_v22 = vpop.permute.xlu2 %3559 }
 0x4d9   : > { %v3572_v21 = vsel %vm1106_vm8, %v3562_v50, %v3564_v1  ;;  %3514 = vmatpush.bf16.msra.mxu2 %v3453_v63  ;;  %v3571_v14 = vsel %vm1106_vm8, %v3558_v4, %v3560_v22 }
 0x4da   : > { %3593 = vmatpush.bf16.msra.mxu3 %v3572_v21 }
 0x4db   : > { %v3566_v17 = vpop.permute.xlu0 %3565 }
 0x4dc   : > { %v3573_v10 = vsel %vm1106_vm8, %v3564_v1, %v3566_v17  ;;  %4740 = vmatmul.msk.bf16.gmra.mxu1 %vm1500_vm14, %v5010_v18 }
 0x4dd   : > { %4778 = vmatmul.msk.bf16.gmra.mxu2 %vm1500_vm14, %v5012_v61  ;;  %3612 = vmatpush.bf16.msrb.mxu0 %v3573_v10 }
 0x4e0   : > { %v3556_v23 = vpop.permute.xlu1 %3555  ;;  %4780 = vmatmul.msk.bf16.gmra.mxu3 %vm1500_vm14, %v5012_v61  ;;  %v3682_v24 = vpop.permute.xlu2 %3681 }
 0x4e1   : > { %4782 = vmatmul.msk.bf16.gmra.mxu0 %vm1500_vm14, %v5012_v61  ;;  %v3570_v36 = vsel %vm1106_vm8, %v3556_v23, %v3558_v4 }
 0x4e2   : > { %3613 = vmatpush.bf16.msrb.mxu0 %v3570_v36 }
 0x4e3   : > { %v3554_v31 = vpop.permute.xlu0 %3553 }
 0x4e4   : > { %v3569_v33 = vsel %vm1106_vm8, %v3554_v31, %v3556_v23 }
 0x4e5   : > { %3594 = vmatpush.bf16.msra.mxu3 %v3569_v33 }
 0x4e8   : > { %v3686_v32 = vpop.permute.xlu1 %3685  ;;  %v3676_v56 = vpop.permute.xlu2 %3675 }
 0x4eb   : > { %v3568_v15 = vpop.permute.xlu0 %3567 }
 0x4ec   : > { %v3574_v46 = vsel %vm1106_vm8, %v3566_v17, %v3568_v15  ;;  %4827 = vmatmul.msk.bf16.vlgmr.msrb.gmra.mxu1 %vm1500_vm14, %v5019_v5 }
 0x4ed   : > { %v2747_v38 = vpop.f32.mrf.mxu2  ;;  %4829 = vmatmul.msk.bf16.vlgmr.msrb.gmra.mxu2 %vm1500_vm14, %v5019_v5  ;;  %v2785_v20 = vpop.f32.mrf.mxu0  ;;  %3631 = vmatpush.bf16.msrb.mxu1 %v3574_v46 }
 0x4f0   : > { %v3680_v54 = vpop.permute.xlu1 %3679  ;;  %4831 = vmatmul.msk.bf16.vlgmr.msrb.gmra.mxu3 %vm1500_vm14, %v5019_v5 }
 0x4f1   : > { %4845 = vmatmul.msk.bf16.vlgmr.msra.gmra.mxu0 %vm1500_vm14, %v5029_v6  ;;  %v3690_v11 = vsel %vm1217_vm9, %v3680_v54, %v3682_v24  ;;  %3632 = vmatpush.bf16.msrb.mxu1 %v3571_v14 }
 0x4f2   : > { %3711 = vmatpush.bf16.msrb.mxu2 %v3690_v11 }
 0x4f3   : > { %v2766_v51 = vpop.f32.mrf.mxu3  ;;  %v3672_v35 = vpop.permute.xlu0 %3671 }
 0x4f5   : > { %v6369_v13 = vpop.f32.mrf.mxu2  ;;  %v6371_v12 = vpop.f32.mrf.mxu0 }
 0x4f8   : > { %v3674_v57 = vpop.permute.xlu1 %3673 }
 0x4f9   : > { %v3687_v9 = vsel %vm1217_vm9, %v3672_v35, %v3674_v57  ;;  %v3688_v43 = vsel %vm1217_vm9, %v3674_v57, %v3676_v56 }
 0x4fa   : > { %3712 = vmatpush.bf16.msrb.mxu2 %v3687_v9 }
 0x4fb   : > { %v6377_v29 = vpop.f32.mrf.mxu3  ;;  %v3684_v45 = vpop.permute.xlu0 %3683 }
 0x4fc   : > { %v3691_v44 = vsel %vm1217_vm9, %v3682_v24, %v3684_v45  ;;  %v3692_v2 = vsel %vm1217_vm9, %v3684_v45, %v3686_v32  ;;  %4828 = vmatmul.msk.bf16.gmra.mxu1 %vm1500_vm14, %v5020_v3  ;;  %v5033_v32 = vld [vmem:[%s6545_s3 + $0x110] sm:$0xff] }
 0x4fd   : > { %4830 = vmatmul.msk.bf16.gmra.mxu2 %vm1500_vm14, %v5020_v3  ;;  %v2790_v8 = vpop.f32.mrf.mxu0  ;;  %3730 = vmatpush.bf16.msrb.mxu3 %v3691_v44  ;;  %v2752_v25 = vpop.f32.mrf.mxu2  ;;  %v5034_v44 = vld [vmem:[%s6545_s3 + $0x118] sm:$0xff] }
 0x4fe   : > { %3749 = vmatpush.bf16.msra.mxu0 %v3692_v2 }
 0x500   : > { %4832 = vmatmul.msk.bf16.gmra.mxu3 %vm1500_vm14, %v5020_v3 }
 0x501   : > { %4846 = vmatmul.msk.bf16.gmra.mxu0 %vm1500_vm14, %v5030_v30  ;;  %3731 = vmatpush.bf16.msrb.mxu3 %v3688_v43 }
 0x503   : > { %v2771_v48 = vpop.f32.mrf.mxu3  ;;  %v3678_v7 = vpop.permute.xlu0 %3677 }
 0x504   : > { %v3689_v27 = vsel %vm1217_vm9, %v3676_v56, %v3678_v7 }
 0x505   : > { %v6390_v18 = vpop.f32.mrf.mxu0  ;;  %3750 = vmatpush.bf16.msra.mxu0 %v3689_v27  ;;  %v2754_v39 = vpop.f32.mrf.mxu2 }
 0x509   : > { %v2848_v52 = vpop.f32.mrf.mxu1 }
 0x50a   : > { %v2849_v40 = vadd.f32 %v2848_v52, %v2747_v38 }
 0x50b   : > { %v6392_v0 = vpop.f32.mrf.mxu3 }
 0x50c   : > { %4847 = vmatmul.msk.bf16.vlgmr.msra.gmra.mxu1 %vm1500_vm14, %v5029_v6 }
 0x50d   : > { %4849 = vmatmul.msk.bf16.vlgmr.msra.gmra.mxu2 %vm1500_vm14, %v5029_v6 }
 0x50e   : > { %v2954_v16 = vpop.f32.mrf.mxu0 }
 0x50f   : > { %v3002_v41 = vadd.f32 %v2954_v16, %v2849_v40 }
 0x510   : > { %v2867_v19 = vpop.f32.mrf.mxu2  ;;  %4863 = vmatmul.msk.bf16.vlgmr.msra.gmra.mxu3 %vm1500_vm14, %v5031_v26 }
 0x511   : > { %4865 = vmatmul.msk.bf16.vlgmr.msrb.gmra.mxu0 %vm1500_vm14, %v5031_v26  ;;  %v2868_v49 = vadd.f32 %v2867_v19, %v2766_v51  ;;  %v2850_v28 = vpop.f32.mrf.mxu1 }
 0x512   : > { %v2851_v3 = vadd.f32 %v2850_v28, %v6369_v13 }
 0x513   : > { %v2886_v34 = vpop.f32.mrf.mxu3 }
 0x514   : > { %v2887_v47 = vadd.f32 %v2886_v34, %v2785_v20 }
 0x516   : > { %v2956_v42 = vpop.f32.mrf.mxu0 }
 0x517   : > { %v3005_v2 = vadd.f32 %v2956_v42, %v2851_v3 }
 0x518   : > { %v2869_v37 = vpop.f32.mrf.mxu2 }
 0x519   : > { %v2853_v53 = vpop.f32.mrf.mxu1  ;;  %v2870_v54 = vadd.f32 %v2869_v37, %v6377_v29 }
 0x51a   : > { %v2854_v1 = vadd.f32 %v2853_v53, %v2752_v25 }
 0x51b   : > { %v6401_v59 = vpop.f32.mrf.mxu3 }
 0x51c   : > { %4848 = vmatmul.msk.bf16.gmra.mxu1 %vm1500_vm14, %v5030_v30  ;;  %v2889_v42 = vadd.f32 %v6401_v59, %v6371_v12 }
 0x51d   : > { %4850 = vmatmul.msk.bf16.gmra.mxu2 %vm1500_vm14, %v5030_v30 }
 0x51e   : > { %v2959_v50 = vpop.f32.mrf.mxu0 }
 0x51f   : > { %v3008_v63 = vadd.f32 %v2959_v50, %v2854_v1 }
 0x520   : > { %v2872_v21 = vpop.f32.mrf.mxu2  ;;  %4864 = vmatmul.msk.bf16.gmra.mxu3 %vm1500_vm14, %v5032_v60 }
 0x521   : > { %4866 = vmatmul.msk.bf16.gmra.mxu0 %vm1500_vm14, %v5032_v60  ;;  %v2873_v61 = vadd.f32 %v2872_v21, %v2771_v48  ;;  %v2855_v17 = vpop.f32.mrf.mxu1 }
 0x522   : > { %v2856_v10 = vadd.f32 %v2855_v17, %v2754_v39 }
 0x523   : > { %v2891_v4 = vpop.f32.mrf.mxu3 }
 0x524   : > { %v2892_v23 = vadd.f32 %v2891_v4, %v2790_v8 }
 0x526   : > { %v2961_v36 = vpop.f32.mrf.mxu0 }
 0x527   : > { %v3011_v31 = vadd.f32 %v2961_v36, %v2856_v10 }
 0x528   : > { %v2874_v33 = vpop.f32.mrf.mxu2 }
 0x529   : > { %v2973_v22 = vpop.f32.mrf.mxu1  ;;  %v2875_v43 = vadd.f32 %v2874_v33, %v6392_v0 }
 0x52a   : > { %v3003_v5 = vadd.f32 %v2973_v22, %v2868_v49 }
 0x52b   : > { %v2893_v15 = vpop.f32.mrf.mxu3 }
 0x52c   : > { %4867 = vmatmul.msk.bf16.vlgmr.msrb.gmra.mxu1 %vm1500_vm14, %v5031_v26  ;;  %v2894_v16 = vadd.f32 %v2893_v15, %v6390_v18 }
 0x52d   : > { %4881 = vmatmul.msk.bf16.vlgmr.msrb.gmra.mxu2 %vm1500_vm14, %v5033_v32 }
 0x52e   : > { %v3091_v46 = vpop.f32.mrf.mxu0 }
 0x52f   : > { %v3121_v6 = vadd.f32 %v3091_v46, %v3003_v5 }
 0x530   : > { %v2992_v38 = vpop.f32.mrf.mxu2  ;;  %4883 = vmatmul.msk.bf16.vlgmr.msrb.gmra.mxu3 %vm1500_vm14, %v5033_v32 }
 0x531   : > { %4885 = vmatmul.msk.bf16.vlgmr.msra.gmra.mxu0 %vm1500_vm14, %v5033_v32  ;;  %v3004_v20 = vadd.f32 %v2992_v38, %v2887_v47  ;;  %v2975_v24 = vpop.f32.mrf.mxu1 }
 0x532   : > { %v3006_v11 = vadd.f32 %v2975_v24, %v2870_v54 }
 0x533   : > { %v3072_v14 = vpop.f32.mrf.mxu3 }
 0x534   : > { %v3120_v51 = vadd.f32 %v3072_v14, %v3002_v41 }
 0x536   : > { %v3093_v35 = vpop.f32.mrf.mxu0 }
 0x537   : > { %v3124_v57 = vadd.f32 %v3093_v35, %v3006_v11 }
 0x538   : > { %v2994_v9 = vpop.f32.mrf.mxu2 }
 0x539   : > { %v2978_v45 = vpop.f32.mrf.mxu1  ;;  %v3007_v53 = vadd.f32 %v2994_v9, %v2889_v42 }
 0x53a   : > { %v3009_v30 = vadd.f32 %v2978_v45, %v2873_v61 }
 0x53b   : > { %v3074_v8 = vpop.f32.mrf.mxu3 }
 0x53c   : > { %v3123_v25 = vadd.f32 %v3074_v8, %v3005_v2  ;;  %4868 = vmatmul.msk.bf16.gmra.mxu1 %vm1500_vm14, %v5032_v60 }
 0x53d   : > { %4882 = vmatmul.msk.bf16.gmra.mxu2 %vm1500_vm14, %v5034_v44 }
 0x53e   : > { %v3096_v29 = vpop.f32.mrf.mxu0 }
 0x53f   : > { %v3127_v56 = vadd.f32 %v3096_v29, %v3009_v30 }
 0x540   : > { %v2997_v48 = vpop.f32.mrf.mxu2  ;;  %4884 = vmatmul.msk.bf16.gmra.mxu3 %vm1500_vm14, %v5034_v44 }
 0x541   : > { %4886 = vmatmul.msk.bf16.gmra.mxu0 %vm1500_vm14, %v5034_v44  ;;  %v3010_v13 = vadd.f32 %v2997_v48, %v2892_v23  ;;  %v2980_v7 = vpop.f32.mrf.mxu1 }
 0x542   : > { %v3012_v27 = vadd.f32 %v2980_v7, %v2875_v43 }
 0x543   : > { %v3077_v39 = vpop.f32.mrf.mxu3 }
 0x544   : > { %v3126_v52 = vadd.f32 %v3077_v39, %v3008_v63 }
 0x546   : > { %v3098_v40 = vpop.f32.mrf.mxu0 }
 0x547   : > { %v3130_v26 = vadd.f32 %v3098_v40, %v3012_v27 }
 0x548   : > { %v2999_v41 = vpop.f32.mrf.mxu2 }
 0x549   : > { %v3013_v19 = vadd.f32 %v2999_v41, %v2894_v16  ;;  %v3110_v49 = vpop.f32.mrf.mxu1 }
 0x54a   : > { %v3122_v28 = vadd.f32 %v3110_v49, %v3004_v20 }
 0x54b   : > { %v3079_v34 = vpop.f32.mrf.mxu3 }
 0x54c   : > { %v3129_v0 = vadd.f32 %v3079_v34, %v3011_v31 }
 0x54e   : > { %v3240_v47 = vpop.f32.mrf.mxu0 }
 0x54f   : > { %v6430_v37 = vadd.f32 %v3240_v47, %v3122_v28 }
 0x550   : > { %v3202_v1 = vpop.f32.mrf.mxu2 }
 0x551   : > { %v3250_v60 = vadd.f32 %v3202_v1, %v3120_v51  ;;  %v3112_v50 = vpop.f32.mrf.mxu1 }
 0x552   : > { %v3125_v63 = vadd.f32 %v3112_v50, %v3007_v53 }
 0x553   : > { %v3221_v21 = vpop.f32.mrf.mxu3 }
 0x554   : > { %v6432_v61 = vadd.f32 %v3221_v21, %v3121_v6 }
 0x556   : > { %v3242_v18 = vpop.f32.mrf.mxu0 }
 0x557   : > { %v6434_v17 = vadd.f32 %v3242_v18, %v3125_v63 }
 0x558   : > { %v3204_v4 = vpop.f32.mrf.mxu2 }
 0x559   : > { %v3253_v10 = vadd.f32 %v3204_v4, %v3123_v25  ;;  %v3115_v23 = vpop.f32.mrf.mxu1 }
 0x55a   : > { %v3128_v36 = vadd.f32 %v3115_v23, %v3010_v13 }
 0x55b   : > { %v3223_v31 = vpop.f32.mrf.mxu3 }
 0x55c   : > { %v6436_v33 = vadd.f32 %v3223_v31, %v3124_v57 }
 0x55e   : > { %v3245_v12 = vpop.f32.mrf.mxu0 }
 0x55f   : > { %v6438_v59 = vadd.f32 %v3245_v12, %v3128_v36 }
 0x560   : > { %v3207_v22 = vpop.f32.mrf.mxu2 }
 0x561   : > { %v3256_v32 = vadd.f32 %v3207_v22, %v3126_v52  ;;  %v3117_v5 = vpop.f32.mrf.mxu1  ;;  %v6473_v22 = vpop.permute.xlu1 %3786 }
 0x562   : > { %v3131_v15 = vadd.f32 %v3117_v5, %v3013_v19 }
 0x563   : > { %v3226_v46 = vpop.f32.mrf.mxu3 }
 0x564   : > { %v6440_v6 = vadd.f32 %v3226_v46, %v3127_v56  ;;  %v3777_v46 = vpop.permute.xlu0 %3776 }
 0x566   : > { %v3247_v38 = vpop.f32.mrf.mxu0 }
 0x567   : > { %v6442_v20 = vadd.f32 %v3247_v38, %v3131_v15 }
 0x568   : > { %v3209_v24 = vpop.f32.mrf.mxu2 }
 0x569   : > { %v3259_v54 = vadd.f32 %v3209_v24, %v3129_v0  ;;  %v3360_v14 = vpop.f32.mrf.mxu1 }
 0x56a   : > { %v3408_v11 = vadd.f32 %v3360_v14, %v3250_v60 }
 0x56b   : > { %v3228_v51 = vpop.f32.mrf.mxu3 }
 0x56c   : > { %v6444_v35 = vadd.f32 %v3228_v51, %v3130_v26 }
 0x56e   : > { %v3478_v57 = vpop.f32.mrf.mxu0 }
 0x56f   : > { %v3526_v3 = vadd.f32 %v3478_v57, %v3408_v11 }
 0x570   : > { %v3379_v9 = vpop.f32.mrf.mxu2 }
 0x571   : > { %v3362_v45 = vpop.f32.mrf.mxu1  ;;  %v3409_v5 = vadd.f32 %v3379_v9, %v6432_v61 }
 0x572   : > { %v3411_v44 = vadd.f32 %v3362_v45, %v3253_v10 }
 0x573   : > { %v3398_v2 = vpop.f32.mrf.mxu3 }
 0x574   : > { %v3410_v4 = vadd.f32 %v3398_v2, %v6430_v37 }
 0x576   : > { %v3480_v30 = vpop.f32.mrf.mxu0 }
 0x577   : > { %v6446_v8 = vadd.f32 %v3480_v30, %v3411_v44 }
 0x578   : > { %v3381_v25 = vpop.f32.mrf.mxu2 }
 0x579   : > { %v3365_v29 = vpop.f32.mrf.mxu1  ;;  %v3412_v61 = vadd.f32 %v3381_v25, %v6436_v33 }
 0x57a   : > { %v3414_v56 = vadd.f32 %v3365_v29, %v3256_v32 }
 0x57b   : > { %v3400_v43 = vpop.f32.mrf.mxu3 }
 0x57c   : > { %v3413_v24 = vadd.f32 %v3400_v43, %v6434_v17 }
 0x57e   : > { %v3483_v48 = vpop.f32.mrf.mxu0 }
 0x57f   : > { %v6448_v13 = vadd.f32 %v3483_v48, %v3414_v56 }
 0x580   : > { %v6450_v7 = vpop.f32.mrf.mxu2 }
 0x581   : > { %v3367_v27 = vpop.f32.mrf.mxu1 }
 0x582   : > { %v3417_v39 = vadd.f32 %v3367_v27, %v3259_v54 }
 0x583   : > { %v3403_v52 = vpop.f32.mrf.mxu3 }
 0x586   : > { %v3485_v40 = vpop.f32.mrf.mxu0 }
 0x587   : > { %v6452_v26 = vadd.f32 %v3485_v40, %v3417_v39  ;;  %v3782_v39 = vpop.permute.xlu1 %3781  ;;  %v3416_v40 = vadd.f32 %v3403_v52, %v6438_v59 }
 0x588   : > { %v6454_v16 = vpop.f32.mrf.mxu2 }
 0x589   : > { %v3497_v41 = vpop.f32.mrf.mxu1 }
 0x58a   : > { %v3527_v54 = vadd.f32 %v3497_v41, %v3409_v5 }
 0x58b   : > { %v6456_v19 = vpop.f32.mrf.mxu3 }
 0x58e   : > { %v3615_v49 = vpop.f32.mrf.mxu0 }
 0x58f   : > { %v3645_v57 = vadd.f32 %v3615_v49, %v3527_v54 }
 0x590   : > { %v3516_v28 = vpop.f32.mrf.mxu2 }
 0x591   : > { %v3499_v34 = vpop.f32.mrf.mxu1  ;;  %v3528_v36 = vadd.f32 %v3516_v28, %v3410_v4 }
 0x592   : > { %v3530_v41 = vadd.f32 %v3499_v34, %v3412_v61  ;;  %v3415_v34 = vadd.f32 %v6450_v7, %v6440_v6 }
 0x593   : > { %v3596_v0 = vpop.f32.mrf.mxu3 }
 0x594   : > { %v3644_v38 = vadd.f32 %v3596_v0, %v3526_v3 }
 0x596   : > { %v3617_v47 = vpop.f32.mrf.mxu0 }
 0x597   : > { %v3648_v33 = vadd.f32 %v3617_v47, %v3530_v41 }
 0x598   : > { %v3518_v42 = vpop.f32.mrf.mxu2 }
 0x599   : > { %v6458_v53 = vpop.f32.mrf.mxu1  ;;  %v3531_v45 = vadd.f32 %v3518_v42, %v3413_v24 }
 0x59b   : > { %v3598_v1 = vpop.f32.mrf.mxu3 }
 0x59c   : > { %v3647_v49 = vadd.f32 %v3598_v1, %v6446_v8 }
 0x59e   : > { %v6460_v60 = vpop.f32.mrf.mxu0 }
 0x5a0   : > { %v3521_v50 = vpop.f32.mrf.mxu2 }
 0x5a1   : > { %v6462_v63 = vpop.f32.mrf.mxu1 }
 0x5a3   : > { %v6464_v21 = vpop.f32.mrf.mxu3 }
 0x5a6   : > { %v6466_v18 = vpop.f32.mrf.mxu0 }
 0x5a8   : > { %v6469_v10 = vpop.f32.mrf.mxu2 }
 0x5a9   : > { %v3634_v23 = vpop.f32.mrf.mxu1 }
 0x5aa   : > { %v3646_v12 = vadd.f32 %v3634_v23, %v3528_v36 }
 0x5ab   : > { %v6471_v31 = vpop.f32.mrf.mxu3 }
 0x5ae   : > { %v3752_v32 = vpop.f32.mrf.mxu0 }
 0x5af   : > { %v3764_v15 = vadd.f32 %v3752_v32, %v3646_v12  ;;  %v3534_v12 = vadd.f32 %v3521_v50, %v3416_v40 }
 0x5b0   : > { %v3714_v37 = vpop.f32.mrf.mxu2 }
 0x5b1   : > { %v3796_v14 = vadd.f32 %v3777_v46, %v3764_v15  ;;  %v3762_v11 = vadd.f32 %v3714_v37, %v3644_v38  ;;  %v3636_v51 = vpop.f32.mrf.mxu1 }
 0x5b2   : > { %v3649_v56 = vadd.f32 %v3636_v51, %v3531_v45  ;;  %v3533_v51 = vadd.f32 %v6458_v53, %v3415_v34 }
 0x5b3   : > { %vm3808_vm0 = vcmp.gt.f32.partialorder %v3796_v14, 0.0  ;;  %v3820_v44 = vmul.f32 0.1, %v3796_v14  ;;  %v3794_v2 = vadd.f32 %v3777_v46, %v3762_v11  ;;  %v3733_v30 = vpop.f32.mrf.mxu3  ;;  %v3419_v11 = vadd.f32 %v6456_v19, %v6442_v20 }
 0x5b4   : > { %v3763_v48 = vadd.f32 %v3733_v30, %v3645_v57  ;;  %v3650_v57 = vadd.f32 %v6464_v21, %v6448_v13  ;;  %v3651_v30 = vadd.f32 %v6460_v60, %v3533_v51 }
 0x5b5   : > { %v3832_v29 = vsel %vm3808_vm0, %v3796_v14, %v3820_v44  ;;  %vm3806_vm3 = vcmp.gt.f32.partialorder %v3794_v2, 0.0  ;;  %v3818_v17 = vmul.f32 0.1, %v3794_v2  ;;  %v3537_v20 = vadd.f32 %v6469_v10, %v3419_v11 }
 0x5b6   : > { %v3844_v3 = vmul.f32 %v3832_v29, %v6612_v62  ;;  %v3754_v9 = vpop.f32.mrf.mxu0  ;;  %v3795_v43 = vadd.f32 %v3777_v46, %v3763_v48 }
 0x5b7   : > { %v3767_v27 = vadd.f32 %v3754_v9, %v3649_v56  ;;  %v3830_v0 = vsel %vm3806_vm3, %v3794_v2, %v3818_v17 }
 0x5b8   : > { %v3855_v28 = vpack.c.bf16 %v3844_v3, %v3844_v3  ;;  %vm3807_vm4 = vcmp.gt.f32.partialorder %v3795_v43, 0.0  ;;  %v3819_v42 = vmul.f32 0.1, %v3795_v43  ;;  %v3716_v23 = vpop.f32.mrf.mxu2  ;;  %v3842_v15 = vmul.f32 %v3830_v0, %v5570_v55 }
 0x5b9   : > { %v3799_v4 = vadd.f32 %v3782_v39, %v3767_v27  ;;  %v3765_v25 = vadd.f32 %v3716_v23, %v3647_v49  ;;  %v3639_v36 = vpop.f32.mrf.mxu1  ;;  %v3418_v3 = vadd.f32 %v6454_v16, %v6444_v35  ;;  %v3792_v49 = vpop.permute.xlu2 %3791  ;;  %v3653_v0 = vadd.f32 %v6471_v31, %v6452_v26 }
 0x5ba   : > { %3863 = vst [vmem:[#allocation2 + $0xc] sm:$0xf] %v3855_v28  ;;  %v3831_v32 = vsel %vm3807_vm4, %v3795_v43, %v3819_v42  ;;  %v3652_v46 = vadd.f32 %v3639_v36, %v3534_v12 }
 0x5bb   : > { %vm3811_vm5 = vcmp.gt.f32.partialorder %v3799_v4, 0.0  ;;  %v3823_v5 = vmul.f32 0.1, %v3799_v4  ;;  %v3843_v59 = vmul.f32 %v3831_v32, %v5572_v58  ;;  %v3797_v52 = vadd.f32 %v3782_v39, %v3765_v25  ;;  %v3735_v8 = vpop.f32.mrf.mxu3 }
 0x5bc   : > { %v3766_v38 = vadd.f32 %v3735_v8, %v3648_v33  ;;  %v3536_v28 = vadd.f32 %v6462_v63, %v3418_v3 }
 0x5bd   : > { %v3835_v1 = vsel %vm3811_vm5, %v3799_v4, %v3823_v5  ;;  %v3854_v47 = vpack.c.bf16 %v3843_v59, %v3842_v15  ;;  %vm3809_vm6 = vcmp.gt.f32.partialorder %v3797_v52, 0.0  ;;  %v3821_v50 = vmul.f32 0.1, %v3797_v52 }
 0x5be   : > { %v3847_v24 = vmul.f32 %v3835_v1, %v6612_v62  ;;  %v3757_v54 = vpop.f32.mrf.mxu0  ;;  %v3798_v14 = vadd.f32 %v3782_v39, %v3766_v38  ;;  %v3654_v25 = vadd.f32 %v6466_v18, %v3536_v28 }
 0x5bf   : > { %v3770_v37 = vadd.f32 %v3757_v54, %v3652_v46  ;;  %3862 = vst [vmem:[#allocation2 + $0x4] sm:$0xff] %v3854_v47  ;;  %v3833_v7 = vsel %vm3809_vm6, %v3797_v52, %v3821_v50 }
 0x5c0   : > { %v3857_v6 = vpack.c.bf16 %v3847_v24, %v3847_v24  ;;  %vm3810_vm7 = vcmp.gt.f32.partialorder %v3798_v14, 0.0  ;;  %v3822_v45 = vmul.f32 0.1, %v3798_v14  ;;  %v3719_v2 = vpop.f32.mrf.mxu2  ;;  %v3845_v13 = vmul.f32 %v3833_v7, %v5570_v55 }
 0x5c1   : > { %v3802_v44 = vadd.f32 %v6473_v22, %v3770_v37  ;;  %v3768_v29 = vadd.f32 %v3719_v2, %v3650_v57  ;;  %v3641_v56 = vpop.f32.mrf.mxu1  ;;  %v4909_v37 = vld [vmem:[#allocation2 + $0xc] sm:$0xf]  ;;  %v5041_v57 = vld [vmem:[%s6546_s4] sm:$0xff]  ;;  %v3900_v3 = vpop.permute.xlu2 %3899 }
 0x5c2   : > { %3865 = vst [vmem:[#allocation2 + $0x20] sm:$0xf] %v3857_v6  ;;  %v3834_v19 = vsel %vm3810_vm7, %v3798_v14, %v3822_v45  ;;  %v3655_v60 = vadd.f32 %v3641_v56, %v3537_v20 }
 0x5c3   : > { %vm3814_vm8 = vcmp.gt.f32.partialorder %v3802_v44, 0.0  ;;  %v3826_v53 = vmul.f32 0.1, %v3802_v44  ;;  %v3846_v21 = vmul.f32 %v3834_v19, %v5572_v58  ;;  %v3800_v48 = vadd.f32 %v6473_v22, %v3768_v29  ;;  %v3738_v61 = vpop.f32.mrf.mxu3  ;;  %v5042_v19 = vld [vmem:[%s6546_s4 + $0x8] sm:$0xff] }
 0x5c4   : > { %v3769_v9 = vadd.f32 %v3738_v61, %v3651_v30 }
 0x5c5   : > { %v3838_v17 = vsel %vm3814_vm8, %v3802_v44, %v3826_v53  ;;  %v3856_v43 = vpack.c.bf16 %v3846_v21, %v3845_v13  ;;  %vm3812_vm9 = vcmp.gt.f32.partialorder %v3800_v48, 0.0  ;;  %v3824_v10 = vmul.f32 0.1, %v3800_v48 }
 0x5c6   : > { %v3850_v27 = vmul.f32 %v3838_v17, %v6612_v62  ;;  %v3759_v39 = vpop.f32.mrf.mxu0  ;;  %v3801_v40 = vadd.f32 %v6473_v22, %v3769_v9  ;;  %v4901_v30 = vld [vmem:[#allocation2 + $0x4] sm:$0xf]  ;;  %v5035_v29 = vld [vmem:[#allocation2 + $0x8] sm:$0xf] }
 0x5c7   : > { %v3773_v41 = vadd.f32 %v3759_v39, %v3655_v60  ;;  %3864 = vst [vmem:[#allocation2 + $0x18] sm:$0xff] %v3856_v43  ;;  %v3836_v16 = vsel %vm3812_vm9, %v3800_v48, %v3824_v10  ;;  %v3890_v43 = vpop.permute.xlu1 %3889 }
 0x5c8   : > { %v3859_v35 = vpack.c.bf16 %v3850_v27, %v3850_v27  ;;  %vm3813_vm12 = vcmp.gt.f32.partialorder %v3801_v40, 0.0  ;;  %v3825_v42 = vmul.f32 0.1, %v3801_v40  ;;  %v3721_v23 = vpop.f32.mrf.mxu2  ;;  %v3848_v12 = vmul.f32 %v3836_v16, %v5570_v55 }
 0x5c9   : > { %v3805_v4 = vadd.f32 %v3792_v49, %v3773_v41  ;;  %v3771_v33 = vadd.f32 %v3721_v23, %v3653_v0  ;;  %v3895_v10 = vpop.permute.xlu2 %3894  ;;  %v3905_v0 = vpop.permute.xlu0 %3904 }
 0x5ca   : > { %3867 = vst [vmem:[#allocation2 + $0x34] sm:$0xf] %v3859_v35  ;;  %v3837_v36 = vsel %vm3813_vm12, %v3801_v40, %v3825_v42 }
 0x5cb   : > { %vm3817_vm13 = vcmp.gt.f32.partialorder %v3805_v4, 0.0  ;;  %v3829_v22 = vmul.f32 0.1, %v3805_v4  ;;  %v3849_v63 = vmul.f32 %v3837_v36, %v5572_v58  ;;  %v3803_v32 = vadd.f32 %v3792_v49, %v3771_v33  ;;  %v3740_v26 = vpop.f32.mrf.mxu3 }
 0x5cc   : > { %v3772_v5 = vadd.f32 %v3740_v26, %v3654_v25 }
 0x5cd   : > { %v3841_v31 = vsel %vm3817_vm13, %v3805_v4, %v3829_v22  ;;  %v3858_v15 = vpack.c.bf16 %v3849_v63, %v3848_v12  ;;  %vm3815_vm15 = vcmp.gt.f32.partialorder %v3803_v32, 0.0  ;;  %v3827_v52 = vmul.f32 0.1, %v3803_v32 }
 0x5ce   : > { %v3853_v59 = vmul.f32 %v3841_v31, %v6612_v62  ;;  %v3804_v8 = vadd.f32 %v3792_v49, %v3772_v5  ;;  %v5037_v62 = vld [vmem:[#allocation2 + $0x1c] sm:$0xf0]  ;;  %v5036_v44 = vld [vmem:[#allocation2 + $0x14] sm:$0xf0]  ;;  %v4903_v2 = vld [vmem:[#allocation2 + $0x18] sm:$0xf0] }
 0x5cf   : > { %3866 = vst [vmem:[#allocation2 + $0x2c] sm:$0xff] %v3858_v15  ;;  %v3839_v18 = vsel %vm3815_vm15, %v3803_v32, %v3827_v52  ;;  %v4910_v11 = vor.u32 %v5037_v62, %v4909_v37  ;;  %v4902_v56 = vor.u32 %v5036_v44, %v4901_v30  ;;  %v4906_v20 = vor.u32 %v5035_v29, %v4903_v2 }
 0x5d0   : > { %v3861_v34 = vpack.c.bf16 %v3853_v59, %v3853_v59  ;;  %vm3816_vm1 = vcmp.gt.f32.partialorder %v3804_v8, 0.0  ;;  %v3828_v1 = vmul.f32 0.1, %v3804_v8  ;;  %v3851_v38 = vmul.f32 %v3839_v18, %v5570_v55 }
 0x5d1   : > { %v4921_v50 = vld [vmem:[#allocation2 + $0x34] sm:$0xf]  ;;  %v4059_v30 = vpop.permute.xlu0 %4058 }
 0x5d2   : > { %3869 = vst [vmem:[#allocation2 + $0x48] sm:$0xf] %v3861_v34  ;;  %v3840_v46 = vsel %vm3816_vm1, %v3804_v8, %v3828_v1 }
 0x5d3   : > { %v3852_v47 = vmul.f32 %v3840_v46, %v5572_v58 }
 0x5d5   : > { %v3860_v24 = vpack.c.bf16 %v3852_v47, %v3851_v38 }
 0x5d6   : > { %v4913_v51 = vld [vmem:[#allocation2 + $0x2c] sm:$0xf]  ;;  %v5038_v7 = vld [vmem:[#allocation2 + $0x30] sm:$0xf] }
 0x5d7   : > { %3868 = vst [vmem:[#allocation2 + $0x40] sm:$0xff] %v3860_v24 }
 0x5d9   : > { %v5040_v54 = vld [vmem:[#allocation2 + $0x44] sm:$0xf0] }
 0x5da   : > { %v4922_v14 = vor.u32 %v5040_v54, %v4921_v50 }
 0x5dc   : > { %3999 = vmatpush.bf16.msra.mxu3 %v4922_v14 }
 0x5de   : > { %v5039_v6 = vld [vmem:[#allocation2 + $0x3c] sm:$0xf0]  ;;  %v4915_v45 = vld [vmem:[#allocation2 + $0x40] sm:$0xf0] }
 0x5df   : > { %v4914_v55 = vor.u32 %v5039_v6, %v4913_v51  ;;  %v4918_v58 = vor.u32 %v5038_v7, %v4915_v45 }
 0x5e0   : > { %4000 = vmatpush.bf16.msra.mxu3 %v4910_v11 }
 0x5e1   : > { %3961 = vmatpush.bf16.msra.mxu1 %v4914_v55  ;;  %3980 = vmatpush.bf16.msra.mxu2 %v4918_v58  ;;  %v4048_v55 = vld [vmem:[%s6547_s5] sm:$0xf] }
 0x5e3   : > { %4927 = vmatmul.msk.bf16.vlgmr.msra.gmra.mxu3 %vm1500_vm14, %v5041_v57 }
 0x5e5   : > { %3962 = vmatpush.bf16.msra.mxu1 %v4902_v56  ;;  %3981 = vmatpush.bf16.msra.mxu2 %v4906_v20 }
 0x5e8   : > { %4923 = vmatmul.msk.bf16.vlgmr.msra.gmra.mxu1 %vm1500_vm14, %v5041_v57  ;;  %4925 = vmatmul.msk.bf16.vlgmr.msra.gmra.mxu2 %vm1500_vm14, %v5041_v57 }
 0x5f3   : > { %4928 = vmatmul.msk.bf16.gmra.mxu3 %vm1500_vm14, %v5042_v19 }
 0x5f8   : > { %4924 = vmatmul.msk.bf16.gmra.mxu1 %vm1500_vm14, %v5042_v19  ;;  %4926 = vmatmul.msk.bf16.gmra.mxu2 %vm1500_vm14, %v5042_v19 }
 0x665   : > { %v3964_v53 = vpop.f32.mrf.mxu1 }
 0x666   : > { %v4002_v13 = vpop.f32.mrf.mxu3  ;;  %v3965_v27 = vadd.f32 %v3964_v53, %v3890_v43 }
 0x667   : > { %v4003_v39 = vadd.f32 %v4002_v13, %v3890_v43 }
 0x668   : > { %vm4012_vm2 = vcmp.gt.f32.partialorder %v3965_v27, 0.0  ;;  %v4024_v35 = vmul.f32 0.1, %v3965_v27 }
 0x669   : > { %v4026_v23 = vmul.f32 0.1, %v4003_v39  ;;  %vm4014_vm4 = vcmp.gt.f32.partialorder %v4003_v39, 0.0 }
 0x66a   : > { %v4036_v62 = vsel %vm4012_vm2, %v3965_v27, %v4024_v35 }
 0x66b   : > { %v3983_v21 = vpop.f32.mrf.mxu2  ;;  %v4038_v11 = vsel %vm4014_vm4, %v4003_v39, %v4026_v23 }
 0x66c   : > { %v3984_v52 = vadd.f32 %v3983_v21, %v3890_v43 }
 0x66d   : > { %v3966_v48 = vpop.f32.mrf.mxu1 }
 0x66e   : > { %v4004_v61 = vpop.f32.mrf.mxu3  ;;  %v3967_v41 = vadd.f32 %v3966_v48, %v3895_v10  ;;  %v4025_v51 = vmul.f32 0.1, %v3984_v52  ;;  %vm4013_vm12 = vcmp.gt.f32.partialorder %v3984_v52, 0.0 }
 0x66f   : > { %v4005_v16 = vadd.f32 %v4004_v61, %v3895_v10 }
 0x670   : > { %v4027_v22 = vmul.f32 0.1, %v3967_v41  ;;  %vm4015_vm5 = vcmp.gt.f32.partialorder %v3967_v41, 0.0  ;;  %v4037_v44 = vsel %vm4013_vm12, %v3984_v52, %v4025_v51 }
 0x671   : > { %v4029_v26 = vmul.f32 0.1, %v4005_v16  ;;  %vm4017_vm6 = vcmp.gt.f32.partialorder %v4005_v16, 0.0 }
 0x672   : > { %v4039_v24 = vsel %vm4015_vm5, %v3967_v41, %v4027_v22 }
 0x673   : > { %v3985_v17 = vpop.f32.mrf.mxu2  ;;  %v4041_v50 = vsel %vm4017_vm6, %v4005_v16, %v4029_v26  ;;  %v4049_v37 = vpack.c.bf16 %v4039_v24, %v4036_v62 }
 0x674   : > { %v3986_v5 = vadd.f32 %v3985_v17, %v3895_v10  ;;  %v4051_v7 = vpack.c.bf16 %v4041_v50, %v4038_v11 }
 0x675   : > { %v3969_v60 = vpop.f32.mrf.mxu1 }
 0x676   : > { %v4007_v9 = vpop.f32.mrf.mxu3  ;;  %v3970_v40 = vadd.f32 %v3969_v60, %v3900_v3  ;;  %v4028_v54 = vmul.f32 0.1, %v3986_v5  ;;  %vm4016_vm9 = vcmp.gt.f32.partialorder %v3986_v5, 0.0 }
 0x677   : > { %v4008_v49 = vadd.f32 %v4007_v9, %v3900_v3 }
 0x678   : > { %v4030_v33 = vmul.f32 0.1, %v3970_v40  ;;  %vm4018_vm10 = vcmp.gt.f32.partialorder %v3970_v40, 0.0  ;;  %v4040_v58 = vsel %vm4016_vm9, %v3986_v5, %v4028_v54 }
 0x679   : > { %vm4020_vm11 = vcmp.gt.f32.partialorder %v4008_v49, 0.0  ;;  %v4032_v12 = vmul.f32 0.1, %v4008_v49  ;;  %v4050_v2 = vpack.c.bf16 %v4040_v58, %v4037_v44 }
 0x67a   : > { %v4042_v15 = vsel %vm4018_vm10, %v3970_v40, %v4030_v33 }
 0x67b   : > { %v3988_v28 = vpop.f32.mrf.mxu2  ;;  %v4044_v8 = vsel %vm4020_vm11, %v4008_v49, %v4032_v12 }
 0x67c   : > { %v3989_v63 = vadd.f32 %v3988_v28, %v3900_v3 }
 0x67d   : > { %v3971_v42 = vpop.f32.mrf.mxu1 }
 0x67e   : > { %v4009_v4 = vpop.f32.mrf.mxu3  ;;  %v3972_v25 = vadd.f32 %v3971_v42, %v3905_v0  ;;  %v4031_v46 = vmul.f32 0.1, %v3989_v63  ;;  %vm4019_vm7 = vcmp.gt.f32.partialorder %v3989_v63, 0.0 }
 0x67f   : > { %v4010_v36 = vadd.f32 %v4009_v4, %v3905_v0 }
 0x680   : > { %vm4021_vm0 = vcmp.gt.f32.partialorder %v3972_v25, 0.0  ;;  %v4033_v32 = vmul.f32 0.1, %v3972_v25  ;;  %v4043_v57 = vsel %vm4019_vm7, %v3989_v63, %v4031_v46 }
 0x681   : > { %vm4023_vm3 = vcmp.gt.f32.partialorder %v4010_v36, 0.0  ;;  %v4035_v31 = vmul.f32 0.1, %v4010_v36 }
 0x682   : > { %v4045_v59 = vsel %vm4021_vm0, %v3972_v25, %v4033_v32 }
 0x683   : > { %v4052_v34 = vpack.c.bf16 %v4045_v59, %v4042_v15  ;;  %v4047_v18 = vsel %vm4023_vm3, %v4010_v36, %v4035_v31  ;;  %v3990_v1 = vpop.f32.mrf.mxu2 }
 0x684   : > { %v4054_v38 = vpack.c.bf16 %v4047_v18, %v4044_v8  ;;  %v3991_v47 = vadd.f32 %v3990_v1, %v3905_v0 }
 0x685   : > { %4070 = vmatpush.bf16.msrb.mxu0 %v4052_v34 }
 0x686   : > { %vm4022_vm8 = vcmp.gt.f32.partialorder %v3991_v47, 0.0  ;;  %v4034_v14 = vmul.f32 0.1, %v3991_v47  ;;  %4096 = vmatpush.bf16.msrb.mxu2 %v4054_v38 }
 0x688   : > { %v4046_v6 = vsel %vm4022_vm8, %v3991_v47, %v4034_v14 }
 0x689   : > { %v4053_v45 = vpack.c.bf16 %v4046_v6, %v4043_v57  ;;  %4071 = vmatpush.bf16.msrb.mxu0 %v4049_v37 }
 0x68a   : > { %4097 = vmatpush.bf16.msrb.mxu2 %v4051_v7 }
 0x68b   : > { %4083 = vmatpush.bf16.msrb.mxu1 %v4053_v45 }
 0x68c   : > { %4929 = vmatmul.msk.bf16.vlgmr.msrb.gmra.mxu0 %vm1500_vm14, %v4048_v55 }
 0x68d   : > { %4931 = vmatmul.msk.bf16.vlgmr.msrb.gmra.mxu2 %vm1500_vm14, %v4048_v55 }
 0x68f   : > { %4084 = vmatpush.bf16.msrb.mxu1 %v4050_v2 }
 0x692   : > { %4930 = vmatmul.msk.bf16.vlgmr.msrb.gmra.mxu1 %vm1500_vm14, %v4048_v55 }
 0x709   : > { %v4073_v29 = vpop.f32.mrf.mxu0 }
 0x70a   : > { %v4074_v56 = vadd.f32 %v4073_v29, %v4059_v30 }
 0x70c   : > { %v4932_v20 = vmul.f32 -1.442695, %v4074_v56 }
 0x70e   : > { %5065 = vpow2.f32 %v4932_v20 }
 0x70f   : > { %v4086_v19 = vpop.f32.mrf.mxu1 }
 0x710   : > { %v4087_v53 = vadd.f32 %v4086_v19, %v4059_v30  ;;  %v4099_v13 = vpop.f32.mrf.mxu2 }
 0x711   : > { %v4100_v21 = vadd.f32 %v4099_v13, %v4059_v30  ;;  %v4075_v48 = vpop.f32.mrf.mxu0 }
 0x712   : > { %v4933_v61 = vmul.f32 -1.442695, %v4087_v53 }
 0x713   : > { %v4934_v3 = vmul.f32 -1.442695, %v4100_v21 }
 0x714   : > { %v5066_v17 = vpop.eup %5065  ;;  %5067 = vpow2.f32 %v4933_v61 }
 0x715   : > { %v4112_v60 = vadd.f32 1.0, %v5066_v17  ;;  %5069 = vpow2.f32 %v4934_v3 }
 0x717   : > { %5071 = vrcp.f32 %v4112_v60  ;;  %v4088_v9 = vpop.f32.mrf.mxu1  ;;  %v4126_v0 = vand.u32 2147483648, %v4112_v60  ;;  %v4124_v16 = vand.u32 2147483647, %v4112_v60  ;;  %vm4120_vm13 = vweird.f32 %v4112_v60 }
 0x718   : > { %v4101_v43 = vpop.f32.mrf.mxu2 }
 0x719   : > { %v4127_v25 = vor.u32 1.1754944e-38, %v4126_v0  ;;  %vm4125_vm1 = vcmp.eq.f32.partialorder %v4124_v16, 8.507059e+37 }
 0x71a   : > { %v5068_v27 = vpop.eup %5067 }
 0x71b   : > { %v5070_v10 = vpop.eup %5069  ;;  %v4113_v39 = vadd.f32 1.0, %v5068_v27 }
 0x71c   : > { %v4114_v40 = vadd.f32 1.0, %v5070_v10 }
 0x71d   : > { %v5072_v41 = vpop.eup %5071  ;;  %5073 = vrcp.f32 %v4113_v39  ;;  %v4141_v32 = vand.u32 2147483648, %v4113_v39  ;;  %v4139_v5 = vand.u32 2147483647, %v4113_v39  ;;  %vm4135_vm11 = vweird.f32 %v4113_v39 }
 0x71e   : > { %v4116_v49 = vmul.f32 %v5072_v41, %v4112_v60  ;;  %5075 = vrcp.f32 %v4114_v40  ;;  %vm4121_vm14 = vweird.f32 %v5072_v41  ;;  %v4156_v15 = vand.u32 2147483648, %v4114_v40 }
 0x71f   : > { %vm4122_vm15 = vmor %vm4120_vm13, %vm4121_vm14  ;;  %v4154_v52 = vand.u32 2147483647, %v4114_v40  ;;  %v4142_v34 = vor.u32 1.1754944e-38, %v4141_v32  ;;  %vm4150_vm3 = vweird.f32 %v4114_v40  ;;  %vm4140_vm4 = vcmp.eq.f32.partialorder %v4139_v5, 8.507059e+37 }
 0x720   : > { %v4117_v28 = vsub.f32 1.0, %v4116_v49  ;;  %v4157_v46 = vor.u32 1.1754944e-38, %v4156_v15 }
 0x721   : > { %vm4155_vm6 = vcmp.eq.f32.partialorder %v4154_v52, 8.507059e+37 }
 0x722   : > { %v4118_v35 = vmul.f32 %v5072_v41, %v4117_v28 }
 0x723   : > { %v5074_v42 = vpop.eup %5073 }
 0x724   : > { %v5076_v4 = vpop.eup %5075  ;;  %v4119_v23 = vadd.f32 %v5072_v41, %v4118_v35  ;;  %v4131_v33 = vmul.f32 %v5074_v42, %v4113_v39  ;;  %vm4136_vm2 = vweird.f32 %v5074_v42 }
 0x725   : > { %v4146_v36 = vmul.f32 %v5076_v4, %v4114_v40  ;;  %vm4151_vm10 = vweird.f32 %v5076_v4  ;;  %vm4137_vm0 = vmor %vm4135_vm11, %vm4136_vm2 }
 0x726   : > { %v4123_v22 = vsel %vm4122_vm15, %v5072_v41, %v4119_v23  ;;  %v4132_v12 = vsub.f32 1.0, %v4131_v33  ;;  %vm4152_vm5 = vmor %vm4150_vm3, %vm4151_vm10 }
 0x727   : > { %v4128_v63 = vsel %vm4125_vm1, %v4127_v25, %v4123_v22  ;;  %v4147_v26 = vsub.f32 1.0, %v4146_v36 }
 0x728   : > { %4160 = vst [vmem:[%s6534_s14] sm:$0xff] %v4128_v63  ;;  %v4133_v31 = vmul.f32 %v5074_v42, %v4132_v12 }
 0x729   : > { %v4148_v59 = vmul.f32 %v5076_v4, %v4147_v26 }
 0x72a   : > { %v4134_v8 = vadd.f32 %v5074_v42, %v4133_v31 }
 0x72b   : > { %v4149_v18 = vadd.f32 %v5076_v4, %v4148_v59 }
 0x72c   : > { %v4138_v1 = vsel %vm4137_vm0, %v5074_v42, %v4134_v8 }
 0x72d   : > { %v4143_v38 = vsel %vm4140_vm4, %v4142_v34, %v4138_v1  ;;  %v4153_v47 = vsel %vm4152_vm5, %v5076_v4, %v4149_v18 }
 0x72e   : > { %4161 = vst [vmem:[%s6534_s14 + $0x8] sm:$0xff] %v4143_v38  ;;  %v4158_v24 = vsel %vm4155_vm6, %v4157_v46, %v4153_v47 }
 0x72f   : > { %4162 = vst [vmem:[%s6534_s14 + $0x10] sm:$0xff] %v4158_v24 }
 0x730 PF: > { %s18_s27 = sadd.s32 1, %s5083_s27  }
 0x731   : > { %p15_p4 = scmp.ge.s32.totalorder %s18_s27, 4  }
 0x733   :  { %17 = sbr.rel (!%p15_p4) target bundleno = 1 (0x1), region = 110 }

</bundles_post_ra>
